<compile_context>
chip_gen: v7x
topology: tpu7x:2x2x1
jax: 0.10.0
libtpu: 0.0.40
codegen_flags: <defaults>
</compile_context>

<pallas_src>
import jax
import jax.numpy as jnp
from jax.experimental import pallas as pl
from jax.experimental.pallas import tpu as pltpu

# ----------------------------------------------------------------------------
# Model dimensions (Cora-style)
# ----------------------------------------------------------------------------
N = 64                       # small synthetic graph (Cora has 2708 nodes)
F_IN = 1433                  # dataset.num_node_features (Cora)
NUM_CLASSES = 7              # dataset.num_classes (Cora)
H1, C1 = 4, 16               # conv1: 1433 -> 4 heads x 16 (concat)
H2, C2 = 4, 16               # conv2:   64 -> 4 heads x 16 (concat)
H3, C3 = 6, NUM_CLASSES      # conv3:   64 -> 6 heads x 7  (concat=False, mean)
F_PAD = ((F_IN + 127) // 128) * 128   # 1536: pad feature dim for lane tiling


# ----------------------------------------------------------------------------
# In-kernel helpers
# ----------------------------------------------------------------------------
def _leaky_relu(x, slope=0.2):
    return jnp.where(x > 0, x, slope * x)


def _elu(x):
    return jnp.where(x > 0, x, jnp.exp(jnp.minimum(x, 0.0)) - 1.0)


def _gat_layer(h, w, asrc_pack, adst_col, dst_expand, mask_pack, seg, colexp,
               heads, srow_ref):
    """One GATConv (no bias), heads lane-packed.  Returns [N, heads*C]."""
    # 1) Feature transform (MXU; bf16 operands for conv1, f32 accumulation).
    hx = jnp.dot(h, w, preferred_element_type=jnp.float32)                 # [N, H*C]

    # 2) Destination logits, broadcast to all H*N lanes with two tiny matmuls
    #    on the otherwise-idle MXU: dst_part[i, hh*N + j] = <hx_i^hh, a_dst^hh>.
    e_dst = jnp.dot(hx, adst_col, preferred_element_type=jnp.float32)      # [N, H]
    dst_part = jnp.dot(e_dst, dst_expand,
                       preferred_element_type=jnp.float32)                 # [N, H*N]

    # 3) Source logits per head: e_src[hh, j] = <hx_j^hh, a_src^hh>.
    e_src = jax.lax.dot_general(asrc_pack, hx, (((1,), (1,)), ((), ())),
                                preferred_element_type=jnp.float32)        # [H, N]
    # Pack the H rows head-major into one [1, H*N] row via a tiny VMEM scratch
    # (static-offset ref stores; avoids value reshapes / transposes).
    for hh in range(heads):                                 # static, unrolled
        srow_ref[0:1, hh * N:(hh + 1) * N] = e_src[hh:hh + 1, :]
    src_row = srow_ref[0:1, 0:heads * N]                                   # [1, H*N]

    # 4) Lane-packed attention: LeakyReLU + mask + softmax over source nodes,
    #    one pass over full vregs.  A single shared row max is exact (softmax
    #    is shift-invariant per head segment; every segment has a self-loop).
    scores = _leaky_relu(dst_part + src_row) + mask_pack                   # [N, H*N]
    m = jnp.max(scores, axis=-1, keepdims=True)
    p = jnp.exp(scores - m)                                                # [N, H*N]
    denom = jnp.dot(p, seg, preferred_element_type=jnp.float32)            # [N, H]
    # TODO(synk): attention-coefficient dropout (p=0.2) is training-only; this
    # kernel implements inference semantics.

    # 5) Aggregation for ALL heads in one matmul against block-diagonal hx,
    #    then per-head normalization on the small [N, H*C] output.
    hx_rep = jnp.concatenate([hx] * heads, axis=0)                         # [H*N, H*C]
    blkmask = jnp.dot(seg, colexp, preferred_element_type=jnp.float32)     # [H*N, H*C]
    out_un = jnp.dot(p, hx_rep * blkmask,
                     preferred_element_type=jnp.float32)                   # [N, H*C]
    inv = 1.0 / denom                                     # exact divide (parity)
    return out_un * jnp.dot(inv, colexp, preferred_element_type=jnp.float32)


# ----------------------------------------------------------------------------
# Fused forward kernel
# ----------------------------------------------------------------------------
def gat_forward_kernel(x_ref, maskp_ref,
                       w1_ref, s1_ref, d1_ref, b1_ref,
                       w2_ref, s2_ref, d2_ref, b2_ref,
                       w3_ref, s3_ref, d3_ref, b3_ref,
                       exp4_ref, seg4_ref, cexp4_ref,
                       exp6_ref, seg6_ref, cexp6_ref,
                       mean3_ref,
                       o_ref, srow_ref):
    maskp = maskp_ref[...]                       # [N, 6*N]  pre-tiled mask
    mask4 = maskp[:, :H1 * N]                    # [N, 4*N]  (128-aligned slice)
    exp4 = exp4_ref[...]
    seg4 = seg4_ref[...]
    cexp4 = cexp4_ref[...]

    # conv1 + bias + ELU   (F.dropout p=0.4 is a no-op in eval mode)
    h = _gat_layer(x_ref[...], w1_ref[...], s1_ref[...], d1_ref[...],
                   exp4, mask4, seg4, cexp4, H1, srow_ref)
    h = _elu(h + b1_ref[...])

    # conv2 + bias + ELU
    h = _gat_layer(h, w2_ref[...], s2_ref[...], d2_ref[...],
                   exp4, mask4, seg4, cexp4, H2, srow_ref)
    h = _elu(h + b2_ref[...])

    # conv3 (concat=False: mean over heads) + bias + ELU
    h = _gat_layer(h, w3_ref[...], s3_ref[...], d3_ref[...],
                   exp6_ref[...], maskp, seg6_ref[...], cexp6_ref[...],
                   H3, srow_ref)
    h = jnp.dot(h, mean3_ref[...], preferred_element_type=jnp.float32)   # head mean
    h = _elu(h + b3_ref[...])

    # log_softmax(dim=1)
    m = jnp.max(h, axis=-1, keepdims=True)
    s = h - m
    lse = jnp.log(jnp.sum(jnp.exp(s), axis=-1, keepdims=True))
    o_ref[...] = s - lse


@jax.jit
def gat_forward(xp, maskp, w1p, s1, d1, b1, w2, s2, d2, b2, w3, s3, d3, b3,
                exp4, seg4, cexp4, exp6, seg6, cexp6, mean3):
    n = xp.shape[0]
    vmem = pl.BlockSpec(memory_space=pltpu.MemorySpace.VMEM)
    return pl.pallas_call(
        gat_forward_kernel,
        out_shape=jax.ShapeDtypeStruct((n, NUM_CLASSES), jnp.float32),
        in_specs=[vmem] * 21,
        out_specs=vmem,
        scratch_shapes=[pltpu.VMEM((1, H3 * N), jnp.float32)],
    )(xp, maskp, w1p, s1, d1, b1, w2, s2, d2, b2, w3, s3, d3, b3,
      exp4, seg4, cexp4, exp6, seg6, cexp6, mean3)


# ----------------------------------------------------------------------------
# Host-side parameter / constant helpers (data-prep time, run once)
# ----------------------------------------------------------------------------
def glorot(key, shape, fan_in, fan_out):
    limit = (6.0 / (fan_in + fan_out)) ** 0.5
    return jax.random.uniform(key, shape, jnp.float32, -limit, limit)


def pack_att(att, heads, out_ch):
    """att [heads, C] -> block-diagonal [heads, heads*C]."""
    eye = jnp.eye(heads, dtype=att.dtype)
    return (eye[:, :, None] * att[None, :, :]).reshape(heads, heads * out_ch)


def expand_mat(heads, width):
    """[heads, heads*width] 0/1: row hh is 1 on columns hh*width..(hh+1)*width-1."""
    return jnp.kron(jnp.eye(heads, dtype=jnp.float32),
                    jnp.ones((1, width), jnp.float32))


def segment_mat(heads, width):
    """[heads*width, heads] 0/1: transpose of expand_mat."""
    return jnp.kron(jnp.eye(heads, dtype=jnp.float32),
                    jnp.ones((width, 1), jnp.float32))


# ----------------------------------------------------------------------------
# Main
# ----------------------------------------------------------------------------
if __name__ == "__main__":
    key = jax.random.PRNGKey(0)
    keys = jax.random.split(key, 12)

    x = jax.random.normal(keys[0], (N, F_IN), jnp.float32)
    rand_adj = jax.random.bernoulli(keys[1], 0.08, (N, N)).astype(jnp.float32)
    adj = jnp.maximum(jnp.maximum(rand_adj, rand_adj.T),
                      jnp.eye(N, dtype=jnp.float32))     # symmetric + self-loops
    # Additive mask: 0 on edges (j -> i), -1e30 elsewhere; pre-tiled for the
    # maximum head count (first 4*N lanes serve layers 1/2).
    mask_bias = jnp.where(adj > 0, 0.0, -1e30).astype(jnp.float32)
    maskp = jnp.tile(mask_bias, (1, H3))                 # [N, 6*N]

    # Data-prep: pad the feature dim to a multiple of 128 and cast to bf16 once
    # (removes the per-call pad/convert fusion + dispatch in front of the kernel).
    xp = jnp.zeros((N, F_PAD), jnp.float32).at[:, :F_IN].set(x).astype(jnp.bfloat16)

    # conv1: 1433 -> 4 heads x 16 (concat). w1 padded to [1536, 64], bf16.
    w1 = glorot(keys[2], (F_IN, H1 * C1), F_IN, H1 * C1)
    w1p = jnp.zeros((F_PAD, H1 * C1), jnp.float32).at[:F_IN, :].set(w1)
    w1p = w1p.astype(jnp.bfloat16)
    a_src1 = glorot(keys[3], (H1, C1), C1, C1)
    a_dst1 = glorot(keys[4], (H1, C1), C1, C1)
    s1 = pack_att(a_src1, H1, C1)                        # [H1, H1*C1]
    d1 = pack_att(a_dst1, H1, C1).T                      # [H1*C1, H1]
    b1 = jnp.zeros((1, H1 * C1), jnp.float32)

    # conv2: 64 -> 4 heads x 16 (concat)
    w2 = glorot(keys[5], (H1 * C1, H2 * C2), H1 * C1, H2 * C2)
    a_src2 = glorot(keys[6], (H2, C2), C2, C2)
    a_dst2 = glorot(keys[7], (H2, C2), C2, C2)
    s2 = pack_att(a_src2, H2, C2)
    d2 = pack_att(a_dst2, H2, C2).T
    b2 = jnp.zeros((1, H2 * C2), jnp.float32)

    # conv3: 64 -> 6 heads x 7, concat=False (heads averaged)
    w3 = glorot(keys[8], (H2 * C2, H3 * C3), H2 * C2, H3 * C3)
    a_src3 = glorot(keys[9], (H3, C3), C3, C3)
    a_dst3 = glorot(keys[10], (H3, C3), C3, C3)
    s3 = pack_att(a_src3, H3, C3)
    d3 = pack_att(a_dst3, H3, C3).T
    b3 = jnp.zeros((1, C3), jnp.float32)

    # Tiny 0/1 helper matrices for the lane-packed attention.
    exp4 = expand_mat(H1, N)        # [4, 256]  dst broadcast
    seg4 = segment_mat(H1, N)       # [256, 4]  per-head row sums
    cexp4 = expand_mat(H1, C1)      # [4, 64]   per-head column expansion
    exp6 = expand_mat(H3, N)        # [6, 384]
    seg6 = segment_mat(H3, N)       # [384, 6]
    cexp6 = expand_mat(H3, C3)      # [6, 42]
    mean3 = jnp.kron(jnp.ones((H3, 1), jnp.float32),
                     jnp.eye(C3, dtype=jnp.float32)) / H3   # [42, 7] head mean

    out = gat_forward(xp, maskp, w1p, s1, d1, b1,
                      w2, s2, d2, b2, w3, s3, d3, b3,
                      exp4, seg4, cexp4, exp6, seg6, cexp6, mean3)
    out = jax.block_until_ready(out)

    assert out.shape == (N, NUM_CLASSES)
    assert bool(jnp.all(jnp.isfinite(out)))
    # log_softmax sanity: rows of exp(out) sum to ~1
    assert bool(jnp.all(jnp.abs(jnp.sum(jnp.exp(out), axis=-1) - 1.0) < 1e-2))
    print("KERNEL_OK")
</pallas_src>

<mosaic_0001>
module attributes {stable_mosaic.version = 11 : i64} {
  func.func @gat_forward_kernel(%arg0: memref<64x1536xbf16, #tpu.memory_space<vmem>>, %arg1: memref<64x384xf32, #tpu.memory_space<vmem>>, %arg2: memref<1536x64xbf16, #tpu.memory_space<vmem>>, %arg3: memref<4x64xf32, #tpu.memory_space<vmem>>, %arg4: memref<64x4xf32, #tpu.memory_space<vmem>>, %arg5: memref<1x64xf32, #tpu.memory_space<vmem>>, %arg6: memref<64x64xf32, #tpu.memory_space<vmem>>, %arg7: memref<4x64xf32, #tpu.memory_space<vmem>>, %arg8: memref<64x4xf32, #tpu.memory_space<vmem>>, %arg9: memref<1x64xf32, #tpu.memory_space<vmem>>, %arg10: memref<64x42xf32, #tpu.memory_space<vmem>>, %arg11: memref<6x42xf32, #tpu.memory_space<vmem>>, %arg12: memref<42x6xf32, #tpu.memory_space<vmem>>, %arg13: memref<1x7xf32, #tpu.memory_space<vmem>>, %arg14: memref<4x256xf32, #tpu.memory_space<vmem>>, %arg15: memref<256x4xf32, #tpu.memory_space<vmem>>, %arg16: memref<4x64xf32, #tpu.memory_space<vmem>>, %arg17: memref<6x384xf32, #tpu.memory_space<vmem>>, %arg18: memref<384x6xf32, #tpu.memory_space<vmem>>, %arg19: memref<6x42xf32, #tpu.memory_space<vmem>>, %arg20: memref<42x7xf32, #tpu.memory_space<vmem>>, %arg21: memref<64x7xf32, #tpu.memory_space<vmem>>, %arg22: memref<1x384xf32, #tpu.memory_space<vmem>>) attributes {dimension_semantics = [], scalar_prefetch = 0 : i64, scratch_operands = 1 : i64, tpu.core_type = #tpu.core_type<tc>} {
    %c0 = arith.constant 0 : index
    %c0_0 = arith.constant 0 : index
    %0 = vector.load %arg1[%c0, %c0_0] : memref<64x384xf32, #tpu.memory_space<vmem>>, vector<64x384xf32>
    %1 = vector.extract_strided_slice %0 {offsets = [0, 0], sizes = [64, 256], strides = [1, 1]} : vector<64x384xf32> to vector<64x256xf32>
    %c0_1 = arith.constant 0 : index
    %c0_2 = arith.constant 0 : index
    %2 = vector.load %arg14[%c0_1, %c0_2] : memref<4x256xf32, #tpu.memory_space<vmem>>, vector<4x256xf32>
    %c0_3 = arith.constant 0 : index
    %c0_4 = arith.constant 0 : index
    %3 = vector.load %arg15[%c0_3, %c0_4] : memref<256x4xf32, #tpu.memory_space<vmem>>, vector<256x4xf32>
    %c0_5 = arith.constant 0 : index
    %c0_6 = arith.constant 0 : index
    %4 = vector.load %arg16[%c0_5, %c0_6] : memref<4x64xf32, #tpu.memory_space<vmem>>, vector<4x64xf32>
    %c0_7 = arith.constant 0 : index
    %c0_8 = arith.constant 0 : index
    %5 = vector.load %arg0[%c0_7, %c0_8] : memref<64x1536xbf16, #tpu.memory_space<vmem>>, vector<64x1536xbf16>
    %c0_9 = arith.constant 0 : index
    %c0_10 = arith.constant 0 : index
    %6 = vector.load %arg2[%c0_9, %c0_10] : memref<1536x64xbf16, #tpu.memory_space<vmem>>, vector<1536x64xbf16>
    %c0_11 = arith.constant 0 : index
    %c0_12 = arith.constant 0 : index
    %7 = vector.load %arg3[%c0_11, %c0_12] : memref<4x64xf32, #tpu.memory_space<vmem>>, vector<4x64xf32>
    %c0_13 = arith.constant 0 : index
    %c0_14 = arith.constant 0 : index
    %8 = vector.load %arg4[%c0_13, %c0_14] : memref<64x4xf32, #tpu.memory_space<vmem>>, vector<64x4xf32>
    %cst = arith.constant dense<0.000000e+00> : vector<64x64xf32>
    %9 = tpu.matmul %5, %6, %cst {dimension_numbers = #tpu.dot_dimension_numbers<[1], [0], [0], [1], [0, 0, 1, 1], [], []>} : vector<64x1536xbf16>, vector<1536x64xbf16>, vector<64x64xf32> -> vector<64x64xf32>
    %cst_15 = arith.constant dense<0.000000e+00> : vector<64x4xf32>
    %10 = tpu.matmul %9, %8, %cst_15 {dimension_numbers = #tpu.dot_dimension_numbers<[1], [0], [0], [1], [0, 0, 1, 1], [], []>} : vector<64x64xf32>, vector<64x4xf32>, vector<64x4xf32> -> vector<64x4xf32>
    %cst_16 = arith.constant dense<0.000000e+00> : vector<64x256xf32>
    %11 = tpu.matmul %10, %2, %cst_16 {dimension_numbers = #tpu.dot_dimension_numbers<[1], [0], [0], [1], [0, 0, 1, 1], [], []>} : vector<64x4xf32>, vector<4x256xf32>, vector<64x256xf32> -> vector<64x256xf32>
    %cst_17 = arith.constant dense<0.000000e+00> : vector<4x64xf32>
    %12 = tpu.matmul %7, %9, %cst_17 {dimension_numbers = #tpu.dot_dimension_numbers<[1], [1], [0], [0], [0, 0, 1, 0], [], []>} : vector<4x64xf32>, vector<64x64xf32>, vector<4x64xf32> -> vector<4x64xf32>
    %13 = vector.extract_strided_slice %12 {offsets = [0, 0], sizes = [1, 64], strides = [1, 1]} : vector<4x64xf32> to vector<1x64xf32>
    %c0_18 = arith.constant 0 : index
    %c0_19 = arith.constant 0 : index
    %14 = vector.load %arg22[%c0_18, %c0_19] : memref<1x384xf32, #tpu.memory_space<vmem>>, vector<1x64xf32>
    tpu.vector_store %arg22[%c0_18, %c0_19], %13 {strides = array<i32>} : memref<1x384xf32, #tpu.memory_space<vmem>>, vector<1x64xf32>,
    %15 = vector.extract_strided_slice %12 {offsets = [1, 0], sizes = [1, 64], strides = [1, 1]} : vector<4x64xf32> to vector<1x64xf32>
    %c0_20 = arith.constant 0 : index
    %c64 = arith.constant 64 : index
    %16 = vector.load %arg22[%c0_20, %c64] : memref<1x384xf32, #tpu.memory_space<vmem>>, vector<1x64xf32>
    tpu.vector_store %arg22[%c0_20, %c64], %15 {strides = array<i32>} : memref<1x384xf32, #tpu.memory_space<vmem>>, vector<1x64xf32>,
    %17 = vector.extract_strided_slice %12 {offsets = [2, 0], sizes = [1, 64], strides = [1, 1]} : vector<4x64xf32> to vector<1x64xf32>
    %c0_21 = arith.constant 0 : index
    %c128 = arith.constant 128 : index
    %18 = vector.load %arg22[%c0_21, %c128] : memref<1x384xf32, #tpu.memory_space<vmem>>, vector<1x64xf32>
    tpu.vector_store %arg22[%c0_21, %c128], %17 {strides = array<i32>} : memref<1x384xf32, #tpu.memory_space<vmem>>, vector<1x64xf32>,
    %19 = vector.extract_strided_slice %12 {offsets = [3, 0], sizes = [1, 64], strides = [1, 1]} : vector<4x64xf32> to vector<1x64xf32>
    %c0_22 = arith.constant 0 : index
    %c192 = arith.constant 192 : index
    %20 = vector.load %arg22[%c0_22, %c192] : memref<1x384xf32, #tpu.memory_space<vmem>>, vector<1x64xf32>
    tpu.vector_store %arg22[%c0_22, %c192], %19 {strides = array<i32>} : memref<1x384xf32, #tpu.memory_space<vmem>>, vector<1x64xf32>,
    %c0_23 = arith.constant 0 : index
    %c0_24 = arith.constant 0 : index
    %21 = vector.load %arg22[%c0_23, %c0_24] : memref<1x384xf32, #tpu.memory_space<vmem>>, vector<1x256xf32>
    %22 = vector.broadcast %21 : vector<1x256xf32> to vector<64x256xf32>
    %23 = arith.addf %11, %22 : vector<64x256xf32>
    %cst_25 = arith.constant 0.000000e+00 : f32
    %24 = vector.broadcast %cst_25 : f32 to vector<64x256xf32>
    %25 = arith.cmpf ogt, %23, %24 : vector<64x256xf32>
    %cst_26 = arith.constant 2.000000e-01 : f32
    %26 = vector.broadcast %cst_26 : f32 to vector<64x256xf32>
    %27 = arith.mulf %26, %23 : vector<64x256xf32>
    %28 = arith.select %25, %23, %27 : vector<64x256xi1>, vector<64x256xf32>
    %29 = arith.addf %28, %1 : vector<64x256xf32>
    %cst_27 = arith.constant dense<0xFF800000> : vector<64xf32>
    %30 = vector.multi_reduction <maximumf>, %29, %cst_27 [1] : vector<64x256xf32> to vector<64xf32>
    %31 = vector.shape_cast %30 : vector<64xf32> to vector<64x1xf32>
    %32 = vector.broadcast %31 : vector<64x1xf32> to vector<64x256xf32>
    %33 = arith.subf %29, %32 : vector<64x256xf32>
    %34 = math.exp %33 : vector<64x256xf32>
    %cst_28 = arith.constant dense<0.000000e+00> : vector<64x4xf32>
    %35 = tpu.matmul %34, %3, %cst_28 {dimension_numbers = #tpu.dot_dimension_numbers<[1], [0], [0], [1], [0, 0, 1, 1], [], []>} : vector<64x256xf32>, vector<256x4xf32>, vector<64x4xf32> -> vector<64x4xf32>
    %36 = tpu.concatenate %9, %9, %9, %9 in 0 : vector<64x64xf32>, vector<64x64xf32>, vector<64x64xf32>, vector<64x64xf32> -> vector<256x64xf32>
    %cst_29 = arith.constant dense<0.000000e+00> : vector<256x64xf32>
    %37 = tpu.matmul %3, %4, %cst_29 {dimension_numbers = #tpu.dot_dimension_numbers<[1], [0], [0], [1], [0, 0, 1, 1], [], []>} : vector<256x4xf32>, vector<4x64xf32>, vector<256x64xf32> -> vector<256x64xf32>
    %38 = arith.mulf %36, %37 : vector<256x64xf32>
    %cst_30 = arith.constant dense<0.000000e+00> : vector<64x64xf32>
    %39 = tpu.matmul %34, %38, %cst_30 {dimension_numbers = #tpu.dot_dimension_numbers<[1], [0], [0], [1], [0, 0, 1, 1], [], []>} : vector<64x256xf32>, vector<256x64xf32>, vector<64x64xf32> -> vector<64x64xf32>
    %cst_31 = arith.constant 1.000000e+00 : f32
    %40 = vector.broadcast %cst_31 : f32 to vector<64x4xf32>
    %41 = arith.divf %40, %35 : vector<64x4xf32>
    %cst_32 = arith.constant dense<0.000000e+00> : vector<64x64xf32>
    %42 = tpu.matmul %41, %4, %cst_32 {dimension_numbers = #tpu.dot_dimension_numbers<[1], [0], [0], [1], [0, 0, 1, 1], [], []>} : vector<64x4xf32>, vector<4x64xf32>, vector<64x64xf32> -> vector<64x64xf32>
    %43 = arith.mulf %39, %42 : vector<64x64xf32>
    %c0_33 = arith.constant 0 : index
    %c0_34 = arith.constant 0 : index
    %44 = vector.load %arg5[%c0_33, %c0_34] : memref<1x64xf32, #tpu.memory_space<vmem>>, vector<1x64xf32>
    %45 = vector.broadcast %44 : vector<1x64xf32> to vector<64x64xf32>
    %46 = arith.addf %43, %45 : vector<64x64xf32>
    %cst_35 = arith.constant 0.000000e+00 : f32
    %47 = vector.broadcast %cst_35 : f32 to vector<64x64xf32>
    %48 = arith.cmpf ogt, %46, %47 : vector<64x64xf32>
    %cst_36 = arith.constant 0.000000e+00 : f32
    %49 = vector.broadcast %cst_36 : f32 to vector<64x64xf32>
    %50 = arith.minimumf %46, %49 : vector<64x64xf32>
    %51 = math.exp %50 : vector<64x64xf32>
    %cst_37 = arith.constant 1.000000e+00 : f32
    %52 = vector.broadcast %cst_37 : f32 to vector<64x64xf32>
    %53 = arith.subf %51, %52 : vector<64x64xf32>
    %54 = arith.select %48, %46, %53 : vector<64x64xi1>, vector<64x64xf32>
    %c0_38 = arith.constant 0 : index
    %c0_39 = arith.constant 0 : index
    %55 = vector.load %arg6[%c0_38, %c0_39] : memref<64x64xf32, #tpu.memory_space<vmem>>, vector<64x64xf32>
    %c0_40 = arith.constant 0 : index
    %c0_41 = arith.constant 0 : index
    %56 = vector.load %arg7[%c0_40, %c0_41] : memref<4x64xf32, #tpu.memory_space<vmem>>, vector<4x64xf32>
    %c0_42 = arith.constant 0 : index
    %c0_43 = arith.constant 0 : index
    %57 = vector.load %arg8[%c0_42, %c0_43] : memref<64x4xf32, #tpu.memory_space<vmem>>, vector<64x4xf32>
    %cst_44 = arith.constant dense<0.000000e+00> : vector<64x64xf32>
    %58 = tpu.matmul %54, %55, %cst_44 {dimension_numbers = #tpu.dot_dimension_numbers<[1], [0], [0], [1], [0, 0, 1, 1], [], []>} : vector<64x64xf32>, vector<64x64xf32>, vector<64x64xf32> -> vector<64x64xf32>
    %cst_45 = arith.constant dense<0.000000e+00> : vector<64x4xf32>
    %59 = tpu.matmul %58, %57, %cst_45 {dimension_numbers = #tpu.dot_dimension_numbers<[1], [0], [0], [1], [0, 0, 1, 1], [], []>} : vector<64x64xf32>, vector<64x4xf32>, vector<64x4xf32> -> vector<64x4xf32>
    %cst_46 = arith.constant dense<0.000000e+00> : vector<64x256xf32>
    %60 = tpu.matmul %59, %2, %cst_46 {dimension_numbers = #tpu.dot_dimension_numbers<[1], [0], [0], [1], [0, 0, 1, 1], [], []>} : vector<64x4xf32>, vector<4x256xf32>, vector<64x256xf32> -> vector<64x256xf32>
    %cst_47 = arith.constant dense<0.000000e+00> : vector<4x64xf32>
    %61 = tpu.matmul %56, %58, %cst_47 {dimension_numbers = #tpu.dot_dimension_numbers<[1], [1], [0], [0], [0, 0, 1, 0], [], []>} : vector<4x64xf32>, vector<64x64xf32>, vector<4x64xf32> -> vector<4x64xf32>
    %62 = vector.extract_strided_slice %61 {offsets = [0, 0], sizes = [1, 64], strides = [1, 1]} : vector<4x64xf32> to vector<1x64xf32>
    %c0_48 = arith.constant 0 : index
    %c0_49 = arith.constant 0 : index
    %63 = vector.load %arg22[%c0_48, %c0_49] : memref<1x384xf32, #tpu.memory_space<vmem>>, vector<1x64xf32>
    tpu.vector_store %arg22[%c0_48, %c0_49], %62 {strides = array<i32>} : memref<1x384xf32, #tpu.memory_space<vmem>>, vector<1x64xf32>,
    %64 = vector.extract_strided_slice %61 {offsets = [1, 0], sizes = [1, 64], strides = [1, 1]} : vector<4x64xf32> to vector<1x64xf32>
    %c0_50 = arith.constant 0 : index
    %c64_51 = arith.constant 64 : index
    %65 = vector.load %arg22[%c0_50, %c64_51] : memref<1x384xf32, #tpu.memory_space<vmem>>, vector<1x64xf32>
    tpu.vector_store %arg22[%c0_50, %c64_51], %64 {strides = array<i32>} : memref<1x384xf32, #tpu.memory_space<vmem>>, vector<1x64xf32>,
    %66 = vector.extract_strided_slice %61 {offsets = [2, 0], sizes = [1, 64], strides = [1, 1]} : vector<4x64xf32> to vector<1x64xf32>
    %c0_52 = arith.constant 0 : index
    %c128_53 = arith.constant 128 : index
    %67 = vector.load %arg22[%c0_52, %c128_53] : memref<1x384xf32, #tpu.memory_space<vmem>>, vector<1x64xf32>
    tpu.vector_store %arg22[%c0_52, %c128_53], %66 {strides = array<i32>} : memref<1x384xf32, #tpu.memory_space<vmem>>, vector<1x64xf32>,
    %68 = vector.extract_strided_slice %61 {offsets = [3, 0], sizes = [1, 64], strides = [1, 1]} : vector<4x64xf32> to vector<1x64xf32>
    %c0_54 = arith.constant 0 : index
    %c192_55 = arith.constant 192 : index
    %69 = vector.load %arg22[%c0_54, %c192_55] : memref<1x384xf32, #tpu.memory_space<vmem>>, vector<1x64xf32>
    tpu.vector_store %arg22[%c0_54, %c192_55], %68 {strides = array<i32>} : memref<1x384xf32, #tpu.memory_space<vmem>>, vector<1x64xf32>,
    %c0_56 = arith.constant 0 : index
    %c0_57 = arith.constant 0 : index
    %70 = vector.load %arg22[%c0_56, %c0_57] : memref<1x384xf32, #tpu.memory_space<vmem>>, vector<1x256xf32>
    %71 = vector.broadcast %70 : vector<1x256xf32> to vector<64x256xf32>
    %72 = arith.addf %60, %71 : vector<64x256xf32>
    %cst_58 = arith.constant 0.000000e+00 : f32
    %73 = vector.broadcast %cst_58 : f32 to vector<64x256xf32>
    %74 = arith.cmpf ogt, %72, %73 : vector<64x256xf32>
    %cst_59 = arith.constant 2.000000e-01 : f32
    %75 = vector.broadcast %cst_59 : f32 to vector<64x256xf32>
    %76 = arith.mulf %75, %72 : vector<64x256xf32>
    %77 = arith.select %74, %72, %76 : vector<64x256xi1>, vector<64x256xf32>
    %78 = arith.addf %77, %1 : vector<64x256xf32>
    %cst_60 = arith.constant dense<0xFF800000> : vector<64xf32>
    %79 = vector.multi_reduction <maximumf>, %78, %cst_60 [1] : vector<64x256xf32> to vector<64xf32>
    %80 = vector.shape_cast %79 : vector<64xf32> to vector<64x1xf32>
    %81 = vector.broadcast %80 : vector<64x1xf32> to vector<64x256xf32>
    %82 = arith.subf %78, %81 : vector<64x256xf32>
    %83 = math.exp %82 : vector<64x256xf32>
    %cst_61 = arith.constant dense<0.000000e+00> : vector<64x4xf32>
    %84 = tpu.matmul %83, %3, %cst_61 {dimension_numbers = #tpu.dot_dimension_numbers<[1], [0], [0], [1], [0, 0, 1, 1], [], []>} : vector<64x256xf32>, vector<256x4xf32>, vector<64x4xf32> -> vector<64x4xf32>
    %85 = tpu.concatenate %58, %58, %58, %58 in 0 : vector<64x64xf32>, vector<64x64xf32>, vector<64x64xf32>, vector<64x64xf32> -> vector<256x64xf32>
    %cst_62 = arith.constant dense<0.000000e+00> : vector<256x64xf32>
    %86 = tpu.matmul %3, %4, %cst_62 {dimension_numbers = #tpu.dot_dimension_numbers<[1], [0], [0], [1], [0, 0, 1, 1], [], []>} : vector<256x4xf32>, vector<4x64xf32>, vector<256x64xf32> -> vector<256x64xf32>
    %87 = arith.mulf %85, %86 : vector<256x64xf32>
    %cst_63 = arith.constant dense<0.000000e+00> : vector<64x64xf32>
    %88 = tpu.matmul %83, %87, %cst_63 {dimension_numbers = #tpu.dot_dimension_numbers<[1], [0], [0], [1], [0, 0, 1, 1], [], []>} : vector<64x256xf32>, vector<256x64xf32>, vector<64x64xf32> -> vector<64x64xf32>
    %cst_64 = arith.constant 1.000000e+00 : f32
    %89 = vector.broadcast %cst_64 : f32 to vector<64x4xf32>
    %90 = arith.divf %89, %84 : vector<64x4xf32>
    %cst_65 = arith.constant dense<0.000000e+00> : vector<64x64xf32>
    %91 = tpu.matmul %90, %4, %cst_65 {dimension_numbers = #tpu.dot_dimension_numbers<[1], [0], [0], [1], [0, 0, 1, 1], [], []>} : vector<64x4xf32>, vector<4x64xf32>, vector<64x64xf32> -> vector<64x64xf32>
    %92 = arith.mulf %88, %91 : vector<64x64xf32>
    %c0_66 = arith.constant 0 : index
    %c0_67 = arith.constant 0 : index
    %93 = vector.load %arg9[%c0_66, %c0_67] : memref<1x64xf32, #tpu.memory_space<vmem>>, vector<1x64xf32>
    %94 = vector.broadcast %93 : vector<1x64xf32> to vector<64x64xf32>
    %95 = arith.addf %92, %94 : vector<64x64xf32>
    %cst_68 = arith.constant 0.000000e+00 : f32
    %96 = vector.broadcast %cst_68 : f32 to vector<64x64xf32>
    %97 = arith.cmpf ogt, %95, %96 : vector<64x64xf32>
    %cst_69 = arith.constant 0.000000e+00 : f32
    %98 = vector.broadcast %cst_69 : f32 to vector<64x64xf32>
    %99 = arith.minimumf %95, %98 : vector<64x64xf32>
    %100 = math.exp %99 : vector<64x64xf32>
    %cst_70 = arith.constant 1.000000e+00 : f32
    %101 = vector.broadcast %cst_70 : f32 to vector<64x64xf32>
    %102 = arith.subf %100, %101 : vector<64x64xf32>
    %103 = arith.select %97, %95, %102 : vector<64x64xi1>, vector<64x64xf32>
    %c0_71 = arith.constant 0 : index
    %c0_72 = arith.constant 0 : index
    %104 = vector.load %arg10[%c0_71, %c0_72] : memref<64x42xf32, #tpu.memory_space<vmem>>, vector<64x42xf32>
    %c0_73 = arith.constant 0 : index
    %c0_74 = arith.constant 0 : index
    %105 = vector.load %arg11[%c0_73, %c0_74] : memref<6x42xf32, #tpu.memory_space<vmem>>, vector<6x42xf32>
    %c0_75 = arith.constant 0 : index
    %c0_76 = arith.constant 0 : index
    %106 = vector.load %arg12[%c0_75, %c0_76] : memref<42x6xf32, #tpu.memory_space<vmem>>, vector<42x6xf32>
    %c0_77 = arith.constant 0 : index
    %c0_78 = arith.constant 0 : index
    %107 = vector.load %arg17[%c0_77, %c0_78] : memref<6x384xf32, #tpu.memory_space<vmem>>, vector<6x384xf32>
    %c0_79 = arith.constant 0 : index
    %c0_80 = arith.constant 0 : index
    %108 = vector.load %arg18[%c0_79, %c0_80] : memref<384x6xf32, #tpu.memory_space<vmem>>, vector<384x6xf32>
    %c0_81 = arith.constant 0 : index
    %c0_82 = arith.constant 0 : index
    %109 = vector.load %arg19[%c0_81, %c0_82] : memref<6x42xf32, #tpu.memory_space<vmem>>, vector<6x42xf32>
    %cst_83 = arith.constant dense<0.000000e+00> : vector<64x42xf32>
    %110 = tpu.matmul %103, %104, %cst_83 {dimension_numbers = #tpu.dot_dimension_numbers<[1], [0], [0], [1], [0, 0, 1, 1], [], []>} : vector<64x64xf32>, vector<64x42xf32>, vector<64x42xf32> -> vector<64x42xf32>
    %cst_84 = arith.constant dense<0.000000e+00> : vector<64x6xf32>
    %111 = tpu.matmul %110, %106, %cst_84 {dimension_numbers = #tpu.dot_dimension_numbers<[1], [0], [0], [1], [0, 0, 1, 1], [], []>} : vector<64x42xf32>, vector<42x6xf32>, vector<64x6xf32> -> vector<64x6xf32>
    %cst_85 = arith.constant dense<0.000000e+00> : vector<64x384xf32>
    %112 = tpu.matmul %111, %107, %cst_85 {dimension_numbers = #tpu.dot_dimension_numbers<[1], [0], [0], [1], [0, 0, 1, 1], [], []>} : vector<64x6xf32>, vector<6x384xf32>, vector<64x384xf32> -> vector<64x384xf32>
    %cst_86 = arith.constant dense<0.000000e+00> : vector<6x64xf32>
    %113 = tpu.matmul %105, %110, %cst_86 {dimension_numbers = #tpu.dot_dimension_numbers<[1], [1], [0], [0], [0, 0, 1, 0], [], []>} : vector<6x42xf32>, vector<64x42xf32>, vector<6x64xf32> -> vector<6x64xf32>
    %114 = vector.extract_strided_slice %113 {offsets = [0, 0], sizes = [1, 64], strides = [1, 1]} : vector<6x64xf32> to vector<1x64xf32>
    %c0_87 = arith.constant 0 : index
    %c0_88 = arith.constant 0 : index
    %115 = vector.load %arg22[%c0_87, %c0_88] : memref<1x384xf32, #tpu.memory_space<vmem>>, vector<1x64xf32>
    tpu.vector_store %arg22[%c0_87, %c0_88], %114 {strides = array<i32>} : memref<1x384xf32, #tpu.memory_space<vmem>>, vector<1x64xf32>,
    %116 = vector.extract_strided_slice %113 {offsets = [1, 0], sizes = [1, 64], strides = [1, 1]} : vector<6x64xf32> to vector<1x64xf32>
    %c0_89 = arith.constant 0 : index
    %c64_90 = arith.constant 64 : index
    %117 = vector.load %arg22[%c0_89, %c64_90] : memref<1x384xf32, #tpu.memory_space<vmem>>, vector<1x64xf32>
    tpu.vector_store %arg22[%c0_89, %c64_90], %116 {strides = array<i32>} : memref<1x384xf32, #tpu.memory_space<vmem>>, vector<1x64xf32>,
    %118 = vector.extract_strided_slice %113 {offsets = [2, 0], sizes = [1, 64], strides = [1, 1]} : vector<6x64xf32> to vector<1x64xf32>
    %c0_91 = arith.constant 0 : index
    %c128_92 = arith.constant 128 : index
    %119 = vector.load %arg22[%c0_91, %c128_92] : memref<1x384xf32, #tpu.memory_space<vmem>>, vector<1x64xf32>
    tpu.vector_store %arg22[%c0_91, %c128_92], %118 {strides = array<i32>} : memref<1x384xf32, #tpu.memory_space<vmem>>, vector<1x64xf32>,
    %120 = vector.extract_strided_slice %113 {offsets = [3, 0], sizes = [1, 64], strides = [1, 1]} : vector<6x64xf32> to vector<1x64xf32>
    %c0_93 = arith.constant 0 : index
    %c192_94 = arith.constant 192 : index
    %121 = vector.load %arg22[%c0_93, %c192_94] : memref<1x384xf32, #tpu.memory_space<vmem>>, vector<1x64xf32>
    tpu.vector_store %arg22[%c0_93, %c192_94], %120 {strides = array<i32>} : memref<1x384xf32, #tpu.memory_space<vmem>>, vector<1x64xf32>,
    %122 = vector.extract_strided_slice %113 {offsets = [4, 0], sizes = [1, 64], strides = [1, 1]} : vector<6x64xf32> to vector<1x64xf32>
    %c0_95 = arith.constant 0 : index
    %c256 = arith.constant 256 : index
    %123 = vector.load %arg22[%c0_95, %c256] : memref<1x384xf32, #tpu.memory_space<vmem>>, vector<1x64xf32>
    tpu.vector_store %arg22[%c0_95, %c256], %122 {strides = array<i32>} : memref<1x384xf32, #tpu.memory_space<vmem>>, vector<1x64xf32>,
    %124 = vector.extract_strided_slice %113 {offsets = [5, 0], sizes = [1, 64], strides = [1, 1]} : vector<6x64xf32> to vector<1x64xf32>
    %c0_96 = arith.constant 0 : index
    %c320 = arith.constant 320 : index
    %125 = vector.load %arg22[%c0_96, %c320] : memref<1x384xf32, #tpu.memory_space<vmem>>, vector<1x64xf32>
    tpu.vector_store %arg22[%c0_96, %c320], %124 {strides = array<i32>} : memref<1x384xf32, #tpu.memory_space<vmem>>, vector<1x64xf32>,
    %c0_97 = arith.constant 0 : index
    %c0_98 = arith.constant 0 : index
    %126 = vector.load %arg22[%c0_97, %c0_98] : memref<1x384xf32, #tpu.memory_space<vmem>>, vector<1x384xf32>
    %127 = vector.broadcast %126 : vector<1x384xf32> to vector<64x384xf32>
    %128 = arith.addf %112, %127 : vector<64x384xf32>
    %cst_99 = arith.constant 0.000000e+00 : f32
    %129 = vector.broadcast %cst_99 : f32 to vector<64x384xf32>
    %130 = arith.cmpf ogt, %128, %129 : vector<64x384xf32>
    %cst_100 = arith.constant 2.000000e-01 : f32
    %131 = vector.broadcast %cst_100 : f32 to vector<64x384xf32>
    %132 = arith.mulf %131, %128 : vector<64x384xf32>
    %133 = arith.select %130, %128, %132 : vector<64x384xi1>, vector<64x384xf32>
    %134 = arith.addf %133, %0 : vector<64x384xf32>
    %cst_101 = arith.constant dense<0xFF800000> : vector<64xf32>
    %135 = vector.multi_reduction <maximumf>, %134, %cst_101 [1] : vector<64x384xf32> to vector<64xf32>
    %136 = vector.shape_cast %135 : vector<64xf32> to vector<64x1xf32>
    %137 = vector.broadcast %136 : vector<64x1xf32> to vector<64x384xf32>
    %138 = arith.subf %134, %137 : vector<64x384xf32>
    %139 = math.exp %138 : vector<64x384xf32>
    %cst_102 = arith.constant dense<0.000000e+00> : vector<64x6xf32>
    %140 = tpu.matmul %139, %108, %cst_102 {dimension_numbers = #tpu.dot_dimension_numbers<[1], [0], [0], [1], [0, 0, 1, 1], [], []>} : vector<64x384xf32>, vector<384x6xf32>, vector<64x6xf32> -> vector<64x6xf32>
    %141 = tpu.concatenate %110, %110, %110, %110, %110, %110 in 0 : vector<64x42xf32>, vector<64x42xf32>, vector<64x42xf32>, vector<64x42xf32>, vector<64x42xf32>, vector<64x42xf32> -> vector<384x42xf32>
    %cst_103 = arith.constant dense<0.000000e+00> : vector<384x42xf32>
    %142 = tpu.matmul %108, %109, %cst_103 {dimension_numbers = #tpu.dot_dimension_numbers<[1], [0], [0], [1], [0, 0, 1, 1], [], []>} : vector<384x6xf32>, vector<6x42xf32>, vector<384x42xf32> -> vector<384x42xf32>
    %143 = arith.mulf %141, %142 : vector<384x42xf32>
    %cst_104 = arith.constant dense<0.000000e+00> : vector<64x42xf32>
    %144 = tpu.matmul %139, %143, %cst_104 {dimension_numbers = #tpu.dot_dimension_numbers<[1], [0], [0], [1], [0, 0, 1, 1], [], []>} : vector<64x384xf32>, vector<384x42xf32>, vector<64x42xf32> -> vector<64x42xf32>
    %cst_105 = arith.constant 1.000000e+00 : f32
    %145 = vector.broadcast %cst_105 : f32 to vector<64x6xf32>
    %146 = arith.divf %145, %140 : vector<64x6xf32>
    %cst_106 = arith.constant dense<0.000000e+00> : vector<64x42xf32>
    %147 = tpu.matmul %146, %109, %cst_106 {dimension_numbers = #tpu.dot_dimension_numbers<[1], [0], [0], [1], [0, 0, 1, 1], [], []>} : vector<64x6xf32>, vector<6x42xf32>, vector<64x42xf32> -> vector<64x42xf32>
    %148 = arith.mulf %144, %147 : vector<64x42xf32>
    %c0_107 = arith.constant 0 : index
    %c0_108 = arith.constant 0 : index
    %149 = vector.load %arg20[%c0_107, %c0_108] : memref<42x7xf32, #tpu.memory_space<vmem>>, vector<42x7xf32>
    %cst_109 = arith.constant dense<0.000000e+00> : vector<64x7xf32>
    %150 = tpu.matmul %148, %149, %cst_109 {dimension_numbers = #tpu.dot_dimension_numbers<[1], [0], [0], [1], [0, 0, 1, 1], [], []>} : vector<64x42xf32>, vector<42x7xf32>, vector<64x7xf32> -> vector<64x7xf32>
    %c0_110 = arith.constant 0 : index
    %c0_111 = arith.constant 0 : index
    %151 = vector.load %arg13[%c0_110, %c0_111] : memref<1x7xf32, #tpu.memory_space<vmem>>, vector<1x7xf32>
    %152 = vector.broadcast %151 : vector<1x7xf32> to vector<64x7xf32>
    %153 = arith.addf %150, %152 : vector<64x7xf32>
    %cst_112 = arith.constant 0.000000e+00 : f32
    %154 = vector.broadcast %cst_112 : f32 to vector<64x7xf32>
    %155 = arith.cmpf ogt, %153, %154 : vector<64x7xf32>
    %cst_113 = arith.constant 0.000000e+00 : f32
    %156 = vector.broadcast %cst_113 : f32 to vector<64x7xf32>
    %157 = arith.minimumf %153, %156 : vector<64x7xf32>
    %158 = math.exp %157 : vector<64x7xf32>
    %cst_114 = arith.constant 1.000000e+00 : f32
    %159 = vector.broadcast %cst_114 : f32 to vector<64x7xf32>
    %160 = arith.subf %158, %159 : vector<64x7xf32>
    %161 = arith.select %155, %153, %160 : vector<64x7xi1>, vector<64x7xf32>
    %cst_115 = arith.constant dense<0xFF800000> : vector<64xf32>
    %162 = vector.multi_reduction <maximumf>, %161, %cst_115 [1] : vector<64x7xf32> to vector<64xf32>
    %163 = vector.shape_cast %162 : vector<64xf32> to vector<64x1xf32>
    %164 = vector.broadcast %163 : vector<64x1xf32> to vector<64x7xf32>
    %165 = arith.subf %161, %164 : vector<64x7xf32>
    %166 = math.exp %165 : vector<64x7xf32>
    %cst_116 = arith.constant dense<0.000000e+00> : vector<64xf32>
    %167 = vector.multi_reduction <add>, %166, %cst_116 [1] : vector<64x7xf32> to vector<64xf32>
    %168 = vector.shape_cast %167 : vector<64xf32> to vector<64x1xf32>
    %169 = math.log %168 : vector<64x1xf32>
    %170 = vector.broadcast %169 : vector<64x1xf32> to vector<64x7xf32>
    %171 = arith.subf %165, %170 : vector<64x7xf32>
    %c0_117 = arith.constant 0 : index
    %c0_118 = arith.constant 0 : index
    %172 = vector.load %arg21[%c0_117, %c0_118] : memref<64x7xf32, #tpu.memory_space<vmem>>, vector<64x7xf32>
    tpu.vector_store %arg21[%c0_117, %c0_118], %171 {strides = array<i32>} : memref<64x7xf32, #tpu.memory_space<vmem>>, vector<64x7xf32>,
    return
  }
}

</mosaic_0001>

<bundles_post_ra>
// kernel: gat_forward.1
= control target key start
LH: loop header
LB: loop body
LE: loop exit
PB: predicated region body
PF: predicated region fallthrough
CT: control target
= control target key end

     0   :  { %vm8947_vm0 = vmmov 0   ;;  %vm1582_vm1 = vcmask 523264   ;;  %vm1867_vm3 = vcmask 1043456   ;;  %vm1842_vm4 = vcmask 31744   ;;  %s11830_s2 = inlined_call_operand.vmem [shape: bf16[1536,64], index: 2, kind: input, shape index: {}]   ;;  %s11831_s0 = inlined_call_operand.vmem [shape: bf16[64,1536], index: 0, kind: input, shape index: {}]   ;;  %s11832_s4 = inlined_call_operand.vmem [shape: f32[64,4], index: 4, kind: input, shape index: {}]   ;;  %s11833_s14 = inlined_call_operand.vmem [shape: f32[4,256], index: 14, kind: input, shape index: {}]   ;;  %s11834_s3 = inlined_call_operand.vmem [shape: f32[4,64], index: 3, kind: input, shape index: {}]   ;;  %s11835_s16 = inlined_call_operand.vmem [shape: f32[4,64], index: 16, kind: input, shape index: {}]   ;;  %s11836_s15 = inlined_call_operand.vmem [shape: f32[256,4], index: 15, kind: input, shape index: {}]   ;;  %s11837_s1 = inlined_call_operand.vmem [shape: f32[64,384], index: 1, kind: input, shape index: {}]   ;;  %s11838_s6 = inlined_call_operand.vmem [shape: f32[64,64], index: 6, kind: input, shape index: {}]   ;;  %s11839_s8 = inlined_call_operand.vmem [shape: f32[64,4], index: 8, kind: input, shape index: {}]   ;;  %s11840_s5 = inlined_call_operand.vmem [shape: f32[1,64], index: 5, kind: input, shape index: {}]   ;;  %s11841_s7 = inlined_call_operand.vmem [shape: f32[4,64], index: 7, kind: input, shape index: {}]   ;;  %s11842_s10 = inlined_call_operand.vmem [shape: f32[64,42], index: 10, kind: input, shape index: {}]   ;;  %s11843_s12 = inlined_call_operand.vmem [shape: f32[42,6], index: 12, kind: input, shape index: {}]   ;;  %s11844_s9 = inlined_call_operand.vmem [shape: f32[1,64], index: 9, kind: input, shape index: {}]   ;;  %s11845_s17 = inlined_call_operand.vmem [shape: f32[6,384], index: 17, kind: input, shape index: {}]   ;;  %s11846_s11 = inlined_call_operand.vmem [shape: f32[6,42], index: 11, kind: input, shape index: {}]   ;;  %s11847_s18 = inlined_call_operand.vmem [shape: f32[384,6], index: 18, kind: input, shape index: {}]   ;;  %s11848_s19 = inlined_call_operand.vmem [shape: f32[6,42], index: 19, kind: input, shape index: {}]   ;;  %s11849_s20 = inlined_call_operand.vmem [shape: f32[42,7], index: 20, kind: input, shape index: {}]   ;;  %s11850_s13 = inlined_call_operand.vmem [shape: f32[1,7], index: 13, kind: input, shape index: {}]   ;;  %s11851_s21 = inlined_call_operand.vmem [shape: f32[64,7], index: 21, kind: output, shape index: {}]  }
   0x1   :  { %11960 = sst [smem:[#allocation55_spill]] %s11830_s2  ;;  %vm9547_vm2 = vmpackc.low %vm1582_vm1, %vm1582_vm1  ;;  %s8950_s2 = smov 64  }
   0x2   :  { %11961 = sst [smem:[#allocation56_spill]] %s11831_s0  ;;  %s11966_s26 = sld [smem:[#allocation55_spill]] }
   0x3   :  { %11962 = sst [smem:[#allocation57_spill]] %s11832_s4  ;;  %s11967_s22 = sld [smem:[#allocation56_spill]] }
   0x4   :  { %11963 = sst [smem:[#allocation58_spill]] %s11833_s14  ;;  %s11968_s0 = sld [smem:[#allocation57_spill]] }
   0x5   :  { %11964 = sst [smem:[#allocation59_spill]] %s11834_s3 }
   0x6   :  { %11965 = sst [smem:[#allocation60_spill]] %s11835_s16  ;;  %s11973_s27 = sld [smem:[#allocation59_spill]] }
   0x7   :  { %s11974_s28 = sld [smem:[#allocation60_spill]] }
   0x8   :  { %v8503_v0 = vld [vmem:[%s11966_s26 + $0x40] sm:$0xff]   ;;  %v8507_v4 = vld [vmem:[%s11966_s26 + $0x48] sm:$0xff]   ;;  %v8511_v8 = vld [vmem:[%s11966_s26 + $0x50] sm:$0xff]  }
   0x9   :  { %v8504_v1 = vld [vmem:[%s11966_s26 + $0xc0] sm:$0xff]   ;;  %6739 = vmatprep.subr.bf16.mxu0 %v8503_v0  ;;  %v8508_v5 = vld [vmem:[%s11966_s26 + $0xc8] sm:$0xff]   ;;  %v8512_v9 = vld [vmem:[%s11966_s26 + $0xd0] sm:$0xff]  }
   0xa   :  { %v8505_v2 = vld [vmem:[%s11966_s26] sm:$0xff]   ;;  %6779 = vmatprep.subr.bf16.mxu1 %v8504_v1  ;;  %v8509_v6 = vld [vmem:[%s11966_s26 + $0x8] sm:$0xff]   ;;  %v8513_v10 = vld [vmem:[%s11966_s26 + $0x10] sm:$0xff]  }
   0xb   :  { %v8506_v3 = vld [vmem:[%s11966_s26 + $0x80] sm:$0xff]   ;;  %6740 = vmatpush3.bf16.msra.mxu0 %v8505_v2  ;;  %v8510_v7 = vld [vmem:[%s11966_s26 + $0x88] sm:$0xff]   ;;  %v8514_v11 = vld [vmem:[%s11966_s26 + $0x90] sm:$0xff]  }
   0xc   :  { %6780 = vmatpush3.bf16.msra.mxu1 %v8506_v3  ;;  %6741 = vmatprep.subr.bf16.mxu0 %v8507_v4  ;;  %v8515_v12 = vld [vmem:[%s11966_s26 + $0x58] sm:$0xff]   ;;  %v8519_v16 = vld [vmem:[%s11966_s26 + $0x60] sm:$0xff]   ;;  %v8523_v20 = vld [vmem:[%s11966_s26 + $0x68] sm:$0xff]  }
   0xd   :  { %6781 = vmatprep.subr.bf16.mxu1 %v8508_v5  ;;  %v8516_v13 = vld [vmem:[%s11966_s26 + $0xd8] sm:$0xff]   ;;  %v8520_v17 = vld [vmem:[%s11966_s26 + $0xe0] sm:$0xff]   ;;  %v8524_v21 = vld [vmem:[%s11966_s26 + $0xe8] sm:$0xff]  }
   0xe   :  { %v8517_v14 = vld [vmem:[%s11966_s26 + $0x18] sm:$0xff]   ;;  %v8521_v18 = vld [vmem:[%s11966_s26 + $0x20] sm:$0xff]   ;;  %v8525_v22 = vld [vmem:[%s11966_s26 + $0x28] sm:$0xff]  }
   0xf   :  { %6742 = vmatpush3.bf16.msra.mxu0 %v8509_v6  ;;  %v8518_v15 = vld [vmem:[%s11966_s26 + $0x98] sm:$0xff]   ;;  %v8522_v19 = vld [vmem:[%s11966_s26 + $0xa0] sm:$0xff]   ;;  %v8526_v23 = vld [vmem:[%s11966_s26 + $0xa8] sm:$0xff]  }
  0x10   :  { %6782 = vmatpush3.bf16.msra.mxu1 %v8510_v7  ;;  %6743 = vmatprep.subr.bf16.mxu0 %v8511_v8  ;;  %v8527_v24 = vld [vmem:[%s11966_s26 + $0x70] sm:$0xff]   ;;  %v8531_v28 = vld [vmem:[%s11966_s26 + $0x78] sm:$0xff]   ;;  %v8541_v36 = vld [vmem:[%s11966_s26 + $0x140] sm:$0xff]  }
  0x11   :  { %6783 = vmatprep.subr.bf16.mxu1 %v8512_v9  ;;  %v8528_v25 = vld [vmem:[%s11966_s26 + $0xf0] sm:$0xff]   ;;  %v8532_v29 = vld [vmem:[%s11966_s26 + $0xf8] sm:$0xff]   ;;  %v8542_v37 = vld [vmem:[%s11966_s26 + $0x1c0] sm:$0xff]  }
  0x12   :  { %v8529_v26 = vld [vmem:[%s11966_s26 + $0x30] sm:$0xff]   ;;  %v8533_v30 = vld [vmem:[%s11966_s26 + $0x38] sm:$0xff]   ;;  %v8543_v38 = vld [vmem:[%s11966_s26 + $0x100] sm:$0xff]  }
  0x13   :  { %6744 = vmatpush3.bf16.msra.mxu0 %v8513_v10  ;;  %v8530_v27 = vld [vmem:[%s11966_s26 + $0xb0] sm:$0xff]   ;;  %v8534_v31 = vld [vmem:[%s11966_s26 + $0xb8] sm:$0xff]   ;;  %v8544_v39 = vld [vmem:[%s11966_s26 + $0x180] sm:$0xff]  }
  0x14   :  { %6784 = vmatpush3.bf16.msra.mxu1 %v8514_v11  ;;  %6745 = vmatprep.subr.bf16.mxu0 %v8515_v12  ;;  %v8535_v32 = vld [vmem:[%s11967_s22] ss:$48 sps:$4 sm:$0xff]   ;;  %v8537_v33 = vld [vmem:[%s11967_s22 + $0x4] ss:$48 sps:$4 sm:$0xff]   ;;  %v8538_v34 = vld [vmem:[%s11967_s22 + $0x8] ss:$48 sps:$4 sm:$0xff]  }
  0x15   :  { %6785 = vmatprep.subr.bf16.mxu1 %v8516_v13  ;;  %v8540_v35 = vld [vmem:[%s11967_s22 + $0xc] ss:$48 sps:$4 sm:$0xff]   ;;  %1224 = vmatprep.mubr.bf16.mxu0 %v8537_v33  ;;  %v8549_v44 = vld [vmem:[%s11967_s22 + $0x64] ss:$48 sps:$4 sm:$0xff]   ;;  %v8553_v46 = vld [vmem:[%s11967_s22 + $0x60] ss:$48 sps:$4 sm:$0xff]  }
  0x16   :  { %1289 = vmatprep.mubr.bf16.mxu1 %v8540_v35  ;;  %v8545_v40 = vld [vmem:[%s11966_s26 + $0x148] sm:$0xff]   ;;  %v8555_v48 = vld [vmem:[%s11966_s26 + $0x150] sm:$0xff]   ;;  %v8559_v52 = vld [vmem:[%s11966_s26 + $0x158] sm:$0xff]  }
  0x17   :  { %6746 = vmatpush3.bf16.msra.mxu0 %v8517_v14  ;;  %v8546_v41 = vld [vmem:[%s11966_s26 + $0x1c8] sm:$0xff]   ;;  %v8556_v49 = vld [vmem:[%s11966_s26 + $0x1d0] sm:$0xff]   ;;  %v8560_v53 = vld [vmem:[%s11966_s26 + $0x1d8] sm:$0xff]  }
  0x18   :  { %6786 = vmatpush3.bf16.msra.mxu1 %v8518_v15  ;;  %6747 = vmatprep.subr.bf16.mxu0 %v8519_v16  ;;  %v8547_v42 = vld [vmem:[%s11966_s26 + $0x108] sm:$0xff]   ;;  %v8557_v50 = vld [vmem:[%s11966_s26 + $0x110] sm:$0xff]   ;;  %v8561_v54 = vld [vmem:[%s11966_s26 + $0x118] sm:$0xff]  }
  0x19   :  { %6787 = vmatprep.subr.bf16.mxu1 %v8520_v17  ;;  %v8548_v43 = vld [vmem:[%s11966_s26 + $0x188] sm:$0xff]   ;;  %v8558_v51 = vld [vmem:[%s11966_s26 + $0x190] sm:$0xff]   ;;  %v8562_v55 = vld [vmem:[%s11966_s26 + $0x198] sm:$0xff]  }
  0x1a   :  { %v8551_v45 = vld [vmem:[%s11967_s22 + $0x6c] ss:$48 sps:$4 sm:$0xff]   ;;  %v8554_v47 = vld [vmem:[%s11967_s22 + $0x68] ss:$48 sps:$4 sm:$0xff]   ;;  %v8563_v56 = vld [vmem:[%s11967_s22 + $0xc4] ss:$48 sps:$4 sm:$0xff]  }
  0x1b   :  { %6748 = vmatpush3.bf16.msra.mxu0 %v8521_v18  ;;  %v8565_v57 = vld [vmem:[%s11967_s22 + $0xcc] ss:$48 sps:$4 sm:$0xff]   ;;  %v8567_v58 = vld [vmem:[%s11967_s22 + $0xc0] ss:$48 sps:$4 sm:$0xff]   ;;  %v8568_v59 = vld [vmem:[%s11967_s22 + $0xc8] ss:$48 sps:$4 sm:$0xff]  }
  0x1c   :  { %6788 = vmatpush3.bf16.msra.mxu1 %v8522_v19  ;;  %6749 = vmatprep.subr.bf16.mxu0 %v8523_v20  ;;  %v8569_v60 = vld [vmem:[%s11966_s26 + $0x160] sm:$0xff]   ;;  %v8573_v0 = vld [vmem:[%s11966_s26 + $0x168] sm:$0xff]   ;;  %v8583_v8 = vld [vmem:[%s11966_s26 + $0x170] sm:$0xff]  }
  0x1d   :  { %6789 = vmatprep.subr.bf16.mxu1 %v8524_v21  ;;  %v8570_v61 = vld [vmem:[%s11966_s26 + $0x1e0] sm:$0xff]   ;;  %v8574_v1 = vld [vmem:[%s11966_s26 + $0x1e8] sm:$0xff]   ;;  %v8584_v9 = vld [vmem:[%s11966_s26 + $0x1f0] sm:$0xff]  }
  0x1e   :  { %v8571_v62 = vld [vmem:[%s11966_s26 + $0x120] sm:$0xff]   ;;  %v8575_v2 = vld [vmem:[%s11966_s26 + $0x128] sm:$0xff]   ;;  %v8585_v10 = vld [vmem:[%s11966_s26 + $0x130] sm:$0xff]  }
  0x1f   :  { %6750 = vmatpush3.bf16.msra.mxu0 %v8525_v22  ;;  %v8572_v63 = vld [vmem:[%s11966_s26 + $0x1a0] sm:$0xff]   ;;  %v8576_v3 = vld [vmem:[%s11966_s26 + $0x1a8] sm:$0xff]   ;;  %v8586_v11 = vld [vmem:[%s11966_s26 + $0x1b0] sm:$0xff]  }
  0x20   :  { %6790 = vmatpush3.bf16.msra.mxu1 %v8526_v23  ;;  %6751 = vmatprep.subr.bf16.mxu0 %v8527_v24  ;;  %v8577_v4 = vld [vmem:[%s11967_s22 + $0x124] ss:$48 sps:$4 sm:$0xff]   ;;  %v8579_v5 = vld [vmem:[%s11967_s22 + $0x12c] ss:$48 sps:$4 sm:$0xff]   ;;  %v8581_v6 = vld [vmem:[%s11967_s22 + $0x120] ss:$48 sps:$4 sm:$0xff]  }
  0x21   :  { %6791 = vmatprep.subr.bf16.mxu1 %v8528_v25  ;;  %v8582_v7 = vld [vmem:[%s11967_s22 + $0x128] ss:$48 sps:$4 sm:$0xff]   ;;  %v8591_v16 = vld [vmem:[%s11967_s22 + $0x10] ss:$48 sps:$4 sm:$0xff]   ;;  %v8593_v17 = vld [vmem:[%s11967_s22 + $0x14] ss:$48 sps:$4 sm:$0xff]  }
  0x22   :  { %v8587_v12 = vld [vmem:[%s11966_s26 + $0x178] sm:$0xff]   ;;  %v8597_v20 = vld [vmem:[%s11966_s26 + $0x240] sm:$0xff]   ;;  %v8601_v24 = vld [vmem:[%s11966_s26 + $0x248] sm:$0xff]  }
  0x23   :  { %6752 = vmatpush3.bf16.msra.mxu0 %v8529_v26  ;;  %v8588_v13 = vld [vmem:[%s11966_s26 + $0x1f8] sm:$0xff]   ;;  %v8598_v21 = vld [vmem:[%s11966_s26 + $0x2c0] sm:$0xff]   ;;  %v8602_v25 = vld [vmem:[%s11966_s26 + $0x2c8] sm:$0xff]  }
  0x24   :  { %6792 = vmatpush3.bf16.msra.mxu1 %v8530_v27  ;;  %6753 = vmatprep.subr.bf16.mxu0 %v8531_v28  ;;  %v8589_v14 = vld [vmem:[%s11966_s26 + $0x138] sm:$0xff]   ;;  %v8599_v22 = vld [vmem:[%s11966_s26 + $0x200] sm:$0xff]   ;;  %v8603_v26 = vld [vmem:[%s11966_s26 + $0x208] sm:$0xff]  }
  0x25   :  { %6793 = vmatprep.subr.bf16.mxu1 %v8532_v29  ;;  %v8590_v15 = vld [vmem:[%s11966_s26 + $0x1b8] sm:$0xff]   ;;  %v8600_v23 = vld [vmem:[%s11966_s26 + $0x280] sm:$0xff]   ;;  %v8604_v27 = vld [vmem:[%s11966_s26 + $0x288] sm:$0xff]  }
  0x26   :  { %v8594_v18 = vld [vmem:[%s11967_s22 + $0x18] ss:$48 sps:$4 sm:$0xff]   ;;  %v8596_v19 = vld [vmem:[%s11967_s22 + $0x1c] ss:$48 sps:$4 sm:$0xff]   ;;  %v8605_v28 = vld [vmem:[%s11967_s22 + $0x74] ss:$48 sps:$4 sm:$0xff]  }
  0x27   :  { %6754 = vmatpush3.bf16.msra.mxu0 %v8533_v30  ;;  %v8607_v29 = vld [vmem:[%s11967_s22 + $0x7c] ss:$48 sps:$4 sm:$0xff]   ;;  %v8609_v30 = vld [vmem:[%s11967_s22 + $0x70] ss:$48 sps:$4 sm:$0xff]  }
  0x28   :  { %6794 = vmatpush3.bf16.msra.mxu1 %v8534_v31  ;;  %6819 = vmatprep.subr.bf16.mxu0 %v8541_v36  ;;  %v8610_v31 = vld [vmem:[%s11967_s22 + $0x78] ss:$48 sps:$4 sm:$0xff]   ;;  %v8612_v33 = vld [vmem:[%s11966_s26 + $0x2d0] sm:$0xff]  }
  0x29   :  { %6859 = vmatprep.subr.bf16.mxu1 %v8542_v37  ;;  %v8614_v35 = vld [vmem:[%s11966_s26 + $0x290] sm:$0xff]   ;;  %v8615_v36 = vld [vmem:[%s11966_s26 + $0x258] sm:$0xff]  }
  0x2a   :  { %1225 = vmatmul.mubr.bf16.vlgmr.msra.gmra.mrb[0].mxu0 %v8535_v32  ;;  %v8611_v32 = vld [vmem:[%s11966_s26 + $0x250] sm:$0xff]   ;;  %v8616_v37 = vld [vmem:[%s11966_s26 + $0x2d8] sm:$0xff]  }
  0x2b   :  { %1290 = vmatmul.mubr.bf16.vlgmr.msra.gmra.mrb[0].mxu1 %v8538_v34  ;;  %6820 = vmatpush3.bf16.msra.mxu0 %v8543_v38  ;;  %v8613_v34 = vld [vmem:[%s11966_s26 + $0x210] sm:$0xff]   ;;  %v8617_v38 = vld [vmem:[%s11966_s26 + $0x218] sm:$0xff]  }
  0x2c   :  { %6860 = vmatpush3.bf16.msra.mxu1 %v8544_v39  ;;  %6821 = vmatprep.subr.bf16.mxu0 %v8545_v40  ;;  %v8618_v39 = vld [vmem:[%s11966_s26 + $0x298] sm:$0xff]   ;;  %v8619_v40 = vld [vmem:[%s11967_s22 + $0xd4] ss:$48 sps:$4 sm:$0xff]  }
  0x2d   :  { %6861 = vmatprep.subr.bf16.mxu1 %v8546_v41  ;;  %1232 = vmatprep.mubr.bf16.mxu0 %v8549_v44  ;;  %v8621_v41 = vld [vmem:[%s11967_s22 + $0xdc] ss:$48 sps:$4 sm:$0xff]   ;;  %v8625_v44 = vld [vmem:[%s11966_s26 + $0x260] sm:$0xff]  }
  0x2e   :  { %1297 = vmatprep.mubr.bf16.mxu1 %v8551_v45  ;;  %v8626_v45 = vld [vmem:[%s11966_s26 + $0x2e0] sm:$0xff]  }
  0x2f   :  { %6822 = vmatpush3.bf16.msra.mxu0 %v8547_v42  ;;  %v8623_v42 = vld [vmem:[%s11967_s22 + $0xd0] ss:$48 sps:$4 sm:$0xff]  }
  0x30   :  { %6862 = vmatpush3.bf16.msra.mxu1 %v8548_v43  ;;  %6823 = vmatprep.subr.bf16.mxu0 %v8555_v48  ;;  %v8624_v43 = vld [vmem:[%s11967_s22 + $0xd8] ss:$48 sps:$4 sm:$0xff]  }
  0x31   :  { %6863 = vmatprep.subr.bf16.mxu1 %v8556_v49  ;;  %v8629_v48 = vld [vmem:[%s11966_s26 + $0x268] sm:$0xff]  }
  0x32   :  { %1233 = vmatmul.mubr.bf16.gmra.mrb[4].mxu0 %v8553_v46  ;;  %v8627_v46 = vld [vmem:[%s11966_s26 + $0x220] sm:$0xff]   ;;  %v8630_v49 = vld [vmem:[%s11966_s26 + $0x2e8] sm:$0xff]  }
  0x33   :  { %1298 = vmatmul.mubr.bf16.gmra.mrb[4].mxu1 %v8554_v47  ;;  %6824 = vmatpush3.bf16.msra.mxu0 %v8557_v50  ;;  %v8628_v47 = vld [vmem:[%s11966_s26 + $0x2a0] sm:$0xff]   ;;  %v8631_v50 = vld [vmem:[%s11966_s26 + $0x228] sm:$0xff]  }
  0x34   :  { %6864 = vmatpush3.bf16.msra.mxu1 %v8558_v51  ;;  %6825 = vmatprep.subr.bf16.mxu0 %v8559_v52  ;;  %v8632_v51 = vld [vmem:[%s11966_s26 + $0x2a8] sm:$0xff]   ;;  %v8633_v52 = vld [vmem:[%s11967_s22 + $0x134] ss:$48 sps:$4 sm:$0xff]  }
  0x35   :  { %6865 = vmatprep.subr.bf16.mxu1 %v8560_v53  ;;  %1240 = vmatprep.mubr.bf16.mxu0 %v8563_v56  ;;  %v8635_v53 = vld [vmem:[%s11967_s22 + $0x13c] ss:$48 sps:$4 sm:$0xff]   ;;  %v8639_v56 = vld [vmem:[%s11966_s26 + $0x270] sm:$0xff]  }
  0x36   :  { %1305 = vmatprep.mubr.bf16.mxu1 %v8565_v57  ;;  %v8640_v57 = vld [vmem:[%s11966_s26 + $0x2f0] sm:$0xff]  }
  0x37   :  { %6826 = vmatpush3.bf16.msra.mxu0 %v8561_v54  ;;  %v8637_v54 = vld [vmem:[%s11967_s22 + $0x130] ss:$48 sps:$4 sm:$0xff]  }
  0x38   :  { %6866 = vmatpush3.bf16.msra.mxu1 %v8562_v55  ;;  %6827 = vmatprep.subr.bf16.mxu0 %v8569_v60  ;;  %v8638_v55 = vld [vmem:[%s11967_s22 + $0x138] ss:$48 sps:$4 sm:$0xff]  }
  0x39   :  { %6867 = vmatprep.subr.bf16.mxu1 %v8570_v61  ;;  %v8643_v60 = vld [vmem:[%s11966_s26 + $0x278] sm:$0xff]  }
  0x3a   :  { %1241 = vmatmul.mubr.bf16.gmra.mrb[8].mxu0 %v8567_v58  ;;  %v8641_v58 = vld [vmem:[%s11966_s26 + $0x230] sm:$0xff]   ;;  %v8644_v61 = vld [vmem:[%s11966_s26 + $0x2f8] sm:$0xff]  }
  0x3b   :  { %1306 = vmatmul.mubr.bf16.gmra.mrb[8].mxu1 %v8568_v59  ;;  %6828 = vmatpush3.bf16.msra.mxu0 %v8571_v62  ;;  %v8642_v59 = vld [vmem:[%s11966_s26 + $0x2b0] sm:$0xff]   ;;  %v8645_v62 = vld [vmem:[%s11966_s26 + $0x238] sm:$0xff]  }
  0x3c   :  { %6868 = vmatpush3.bf16.msra.mxu1 %v8572_v63  ;;  %6829 = vmatprep.subr.bf16.mxu0 %v8573_v0  ;;  %v8646_v63 = vld [vmem:[%s11966_s26 + $0x2b8] sm:$0xff]   ;;  %v8647_v0 = vld [vmem:[%s11967_s22 + $0x20] ss:$48 sps:$4 sm:$0xff]   ;;  %s11972_s26 = sld [smem:[#allocation58_spill]] }
  0x3d   :  { %6869 = vmatprep.subr.bf16.mxu1 %v8574_v1  ;;  %1248 = vmatprep.mubr.bf16.mxu0 %v8577_v4  ;;  %v8649_v1 = vld [vmem:[%s11967_s22 + $0x24] ss:$48 sps:$4 sm:$0xff]  }
  0x3e   :  { %1313 = vmatprep.mubr.bf16.mxu1 %v8579_v5  ;;  %v8653_v4 = vld [vmem:[%s11967_s22 + $0x84] ss:$48 sps:$4 sm:$0xff]   ;;  %v8655_v5 = vld [vmem:[%s11967_s22 + $0x8c] ss:$48 sps:$4 sm:$0xff]  }
  0x3f   :  { %6830 = vmatpush3.bf16.msra.mxu0 %v8575_v2  ;;  %v8650_v2 = vld [vmem:[%s11967_s22 + $0x28] ss:$48 sps:$4 sm:$0xff]  }
  0x40   :  { %6870 = vmatpush3.bf16.msra.mxu1 %v8576_v3  ;;  %6831 = vmatprep.subr.bf16.mxu0 %v8583_v8  ;;  %v8652_v3 = vld [vmem:[%s11967_s22 + $0x2c] ss:$48 sps:$4 sm:$0xff]   ;;  %v8659_v8 = vld [vmem:[%s11967_s22 + $0xe4] ss:$48 sps:$4 sm:$0xff]  }
  0x41   :  { %6871 = vmatprep.subr.bf16.mxu1 %v8584_v9  ;;  %v8661_v9 = vld [vmem:[%s11967_s22 + $0xec] ss:$48 sps:$4 sm:$0xff]  }
  0x42   :  { %1249 = vmatmul.mubr.bf16.gmra.mrb[12].mxu0 %v8581_v6  ;;  %v8657_v6 = vld [vmem:[%s11967_s22 + $0x80] ss:$48 sps:$4 sm:$0xff]  }
  0x43   :  { %1314 = vmatmul.mubr.bf16.gmra.mrb[12].mxu1 %v8582_v7  ;;  %6832 = vmatpush3.bf16.msra.mxu0 %v8585_v10  ;;  %v8658_v7 = vld [vmem:[%s11967_s22 + $0x88] ss:$48 sps:$4 sm:$0xff]   ;;  %v8663_v10 = vld [vmem:[%s11967_s22 + $0xe0] ss:$48 sps:$4 sm:$0xff]  }
  0x44   :  { %6872 = vmatpush3.bf16.msra.mxu1 %v8586_v11  ;;  %6833 = vmatprep.subr.bf16.mxu0 %v8587_v12  ;;  %v8664_v11 = vld [vmem:[%s11967_s22 + $0xe8] ss:$48 sps:$4 sm:$0xff]   ;;  %v8665_v12 = vld [vmem:[%s11967_s22 + $0x144] ss:$48 sps:$4 sm:$0xff]  }
  0x45   :  { %6873 = vmatprep.subr.bf16.mxu1 %v8588_v13  ;;  %1354 = vmatprep.mubr.bf16.mxu0 %v8593_v17  ;;  %v8667_v13 = vld [vmem:[%s11967_s22 + $0x14c] ss:$48 sps:$4 sm:$0xff]  }
  0x46   :  { %1419 = vmatprep.mubr.bf16.mxu1 %v8596_v19  ;;  %v369_v17 = vld [vmem:[%s11968_s0 + $0x8] sm:$0xff]  ;;  %v370_v19 = vld [vmem:[%s11968_s0 + $0x10] sm:$0xff] }
  0x47   :  { %6834 = vmatpush3.bf16.msra.mxu0 %v8589_v14  ;;  %v8669_v14 = vld [vmem:[%s11967_s22 + $0x140] ss:$48 sps:$4 sm:$0xff]  }
  0x48   :  { %6874 = vmatpush3.bf16.msra.mxu1 %v8590_v15  ;;  %6899 = vmatprep.subr.bf16.mxu0 %v8597_v20  ;;  %v8670_v15 = vld [vmem:[%s11967_s22 + $0x148] ss:$48 sps:$4 sm:$0xff]  }
  0x49   :  { %6939 = vmatprep.subr.bf16.mxu1 %v8598_v21  ;;  %v371_v20 = vld [vmem:[%s11968_s0 + $0x18] sm:$0xff] }
  0x4a   :  { %1355 = vmatmul.mubr.bf16.vlgmr.msra.gmra.mrb[16].mxu0 %v8591_v16  ;;  %v368_v16 = vld [vmem:[%s11968_s0] sm:$0xff]  ;;  %v8089_v21 = vpack.c.bf16 %v371_v20, %v370_v19 }
  0x4b   :  { %1420 = vmatmul.mubr.bf16.vlgmr.msra.gmra.mrb[16].mxu1 %v8594_v18  ;;  %6900 = vmatpush3.bf16.msra.mxu0 %v8599_v22  ;;  %v8085_v18 = vpack.c.bf16 %v369_v17, %v368_v16  ;;  %v372_v22 = vld [vmem:[%s11968_s0 + $0x20] sm:$0xff] }
  0x4c   :  { %6940 = vmatpush3.bf16.msra.mxu1 %v8600_v23  ;;  %6901 = vmatprep.subr.bf16.mxu0 %v8601_v24  ;;  %v373_v23 = vld [vmem:[%s11968_s0 + $0x28] sm:$0xff] }
  0x4d   :  { %6941 = vmatprep.subr.bf16.mxu1 %v8602_v25  ;;  %1362 = vmatprep.mubr.bf16.mxu0 %v8605_v28  ;;  %v8093_v24 = vpack.c.bf16 %v373_v23, %v372_v22  ;;  %v374_v25 = vld [vmem:[%s11968_s0 + $0x30] sm:$0xff]  ;;  %v11859_v28 = vmov 0.0|0.0  }
  0x4e   :  { %1427 = vmatprep.mubr.bf16.mxu1 %v8607_v29  ;;  %v11857_v29 = vmov 0.0  }
  0x4f   :  { %6902 = vmatpush3.bf16.msra.mxu0 %v8603_v26  ;;  %v375_v26 = vld [vmem:[%s11968_s0 + $0x38] sm:$0xff] }
  0x50   :  { %6942 = vmatpush3.bf16.msra.mxu1 %v8604_v27  ;;  %6903 = vmatprep.subr.bf16.mxu0 %v8611_v32  ;;  %v8097_v27 = vpack.c.bf16 %v375_v26, %v374_v25 }
  0x51   :  { %6943 = vmatprep.subr.bf16.mxu1 %v8612_v33 }
  0x52   :  { %1363 = vmatmul.mubr.bf16.gmra.mrb[20].mxu0 %v8609_v30 }
  0x53   :  { %1428 = vmatmul.mubr.bf16.gmra.mrb[20].mxu1 %v8610_v31  ;;  %6904 = vmatpush3.bf16.msra.mxu0 %v8613_v34 }
  0x54   :  { %6944 = vmatpush3.bf16.msra.mxu1 %v8614_v35  ;;  %6905 = vmatprep.subr.bf16.mxu0 %v8615_v36 }
  0x55   :  { %6945 = vmatprep.subr.bf16.mxu1 %v8616_v37  ;;  %1370 = vmatprep.mubr.bf16.mxu0 %v8619_v40 }
  0x56   :  { %1435 = vmatprep.mubr.bf16.mxu1 %v8621_v41 }
  0x57   :  { %6906 = vmatpush3.bf16.msra.mxu0 %v8617_v38 }
  0x58   :  { %6946 = vmatpush3.bf16.msra.mxu1 %v8618_v39  ;;  %6907 = vmatprep.subr.bf16.mxu0 %v8625_v44 }
  0x59   :  { %6947 = vmatprep.subr.bf16.mxu1 %v8626_v45 }
  0x5a   :  { %1371 = vmatmul.mubr.bf16.gmra.mrb[24].mxu0 %v8623_v42 }
  0x5b   :  { %1436 = vmatmul.mubr.bf16.gmra.mrb[24].mxu1 %v8624_v43  ;;  %6908 = vmatpush3.bf16.msra.mxu0 %v8627_v46 }
  0x5c   :  { %6948 = vmatpush3.bf16.msra.mxu1 %v8628_v47  ;;  %6909 = vmatprep.subr.bf16.mxu0 %v8629_v48 }
  0x5d   :  { %6949 = vmatprep.subr.bf16.mxu1 %v8630_v49  ;;  %1378 = vmatprep.mubr.bf16.mxu0 %v8633_v52 }
  0x5e   :  { %1443 = vmatprep.mubr.bf16.mxu1 %v8635_v53 }
  0x5f   :  { %6910 = vmatpush3.bf16.msra.mxu0 %v8631_v50 }
  0x60   :  { %6950 = vmatpush3.bf16.msra.mxu1 %v8632_v51  ;;  %6911 = vmatprep.subr.bf16.mxu0 %v8639_v56 }
  0x61   :  { %6951 = vmatprep.subr.bf16.mxu1 %v8640_v57 }
  0x62   :  { %1379 = vmatmul.mubr.bf16.gmra.mrb[28].mxu0 %v8637_v54 }
  0x63   :  { %1444 = vmatmul.mubr.bf16.gmra.mrb[28].mxu1 %v8638_v55  ;;  %6912 = vmatpush3.bf16.msra.mxu0 %v8641_v58 }
  0x64   :  { %6952 = vmatpush3.bf16.msra.mxu1 %v8642_v59  ;;  %6913 = vmatprep.subr.bf16.mxu0 %v8643_v60 }
  0x65   :  { %6953 = vmatprep.subr.bf16.mxu1 %v8644_v61  ;;  %1484 = vmatprep.mubr.bf16.mxu0 %v8649_v1 }
  0x66   :  { %1549 = vmatprep.mubr.bf16.mxu1 %v8652_v3 }
  0x67   :  { %6914 = vmatpush3.bf16.msra.mxu0 %v8645_v62 }
  0x68   :  { %6954 = vmatpush3.bf16.msra.mxu1 %v8646_v63  ;;  %8086 = vmatprep.subr.bf16.mxu0 %v8085_v18 }
  0x69   :  { %8101 = vmatprep.subr.bf16.mxu1 %v11859_v28 }
  0x6a   :  { %1485 = vmatmul.mubr.bf16.vlgmr.msra.gmra.mrb[32].mxu0 %v8647_v0 }
  0x6b   :  { %1550 = vmatmul.mubr.bf16.vlgmr.msra.gmra.mrb[32].mxu1 %v8650_v2  ;;  %1492 = vmatprep.mubr.bf16.mxu0 %v8653_v4 }
  0x6c   :  { %1557 = vmatprep.mubr.bf16.mxu1 %v8655_v5  ;;  %8088 = vmatpush3.bf16.msra.mxu0 %v8085_v18 }
  0x6d   :  { %8090 = vmatprep.subr.bf16.mxu0 %v8089_v21 }
  0x70   :  { %8092 = vmatpush3.bf16.msra.mxu0 %v8089_v21 }
  0x71   :  { %8094 = vmatprep.subr.bf16.mxu0 %v8093_v24 }
  0x72   :  { %1493 = vmatmul.mubr.bf16.gmra.mrb[36].mxu0 %v8657_v6 }
  0x73   :  { %1558 = vmatmul.mubr.bf16.gmra.mrb[36].mxu1 %v8658_v7  ;;  %1500 = vmatprep.mubr.bf16.mxu0 %v8659_v8 }
  0x74   :  { %1565 = vmatprep.mubr.bf16.mxu1 %v8661_v9  ;;  %8096 = vmatpush3.bf16.msra.mxu0 %v8093_v24 }
  0x75   :  { %8098 = vmatprep.subr.bf16.mxu0 %v8097_v27 }
  0x78   :  { %8100 = vmatpush3.bf16.msra.mxu0 %v8097_v27 }
  0x7a   :  { %1501 = vmatmul.mubr.bf16.gmra.mrb[40].mxu0 %v8663_v10 }
  0x7b   :  { %1566 = vmatmul.mubr.bf16.gmra.mrb[40].mxu1 %v8664_v11  ;;  %1508 = vmatprep.mubr.bf16.mxu0 %v8665_v12 }
  0x7c   :  { %1573 = vmatprep.mubr.bf16.mxu1 %v8667_v13 }
  0x82   :  { %1509 = vmatmul.mubr.bf16.gmra.mrb[44].mxu0 %v8669_v14 }
  0x83   :  { %1574 = vmatmul.mubr.bf16.gmra.mrb[44].mxu1 %v8670_v15 }
  0x84   :  { %7644 = vmatprep.mubr.msk.f32.mxu1 %vm8947_vm0, %v11857_v29 }
  0xfd   :  { %v6755_v30 = vpop.f32.mrb[0].mxu0 }
  0xfe   :  { %v6795_v31 = vpop.f32.mrb[0].mxu1  ;;  %v6756_v32 = vpop.f32.mrb[1].mxu0 }
  0xff   :  { %v6757_v33 = vadd.f32 %v6756_v32, %v6755_v30  ;;  %v6796_v34 = vpop.f32.mrb[1].mxu1  ;;  %v6758_v35 = vpop.f32.mrb[2].mxu0 }
 0x100   :  { %v6797_v36 = vadd.f32 %v6796_v34, %v6795_v31  ;;  %v6798_v37 = vpop.f32.mrb[2].mxu1  ;;  %v6759_v38 = vpop.f32.mrb[3].mxu0 }
 0x101   :  { %v6760_v39 = vadd.f32 %v6759_v38, %v6758_v35  ;;  %v6799_v40 = vpop.f32.mrb[3].mxu1 }
 0x102   :  { %v1292_v41 = vadd.f32 %v6797_v36, %v6757_v33  ;;  %v6800_v42 = vadd.f32 %v6799_v40, %v6798_v37 }
 0x104   :  { %v1295_v43 = vadd.f32 %v6800_v42, %v6760_v39 }
 0x105   :  { %v6761_v44 = vpop.f32.mrb[4].mxu0 }
 0x106   :  { %v6801_v45 = vpop.f32.mrb[4].mxu1  ;;  %v6762_v46 = vpop.f32.mrb[5].mxu0 }
 0x107   :  { %v6763_v47 = vadd.f32 %v6762_v46, %v6761_v44  ;;  %v6802_v48 = vpop.f32.mrb[5].mxu1  ;;  %v6764_v49 = vpop.f32.mrb[6].mxu0 }
 0x108   :  { %v6803_v50 = vadd.f32 %v6802_v48, %v6801_v45  ;;  %v6804_v51 = vpop.f32.mrb[6].mxu1  ;;  %v6765_v52 = vpop.f32.mrb[7].mxu0 }
 0x109   :  { %v6766_v53 = vadd.f32 %v6765_v52, %v6764_v49  ;;  %v6805_v54 = vpop.f32.mrb[7].mxu1 }
 0x10a   :  { %v1300_v55 = vadd.f32 %v6803_v50, %v6763_v47  ;;  %v6806_v56 = vadd.f32 %v6805_v54, %v6804_v51 }
 0x10c   :  { %v1303_v57 = vadd.f32 %v6806_v56, %v6766_v53 }
 0x10d   :  { %v6767_v58 = vpop.f32.mrb[8].mxu0 }
 0x10e   :  { %v6807_v59 = vpop.f32.mrb[8].mxu1  ;;  %v6768_v60 = vpop.f32.mrb[9].mxu0 }
 0x10f   :  { %v6769_v61 = vadd.f32 %v6768_v60, %v6767_v58  ;;  %v6808_v62 = vpop.f32.mrb[9].mxu1  ;;  %v6770_v63 = vpop.f32.mrb[10].mxu0 }
 0x110   :  { %v6809_v0 = vadd.f32 %v6808_v62, %v6807_v59  ;;  %v6810_v1 = vpop.f32.mrb[10].mxu1  ;;  %v6771_v2 = vpop.f32.mrb[11].mxu0 }
 0x111   :  { %v6772_v3 = vadd.f32 %v6771_v2, %v6770_v63  ;;  %v6811_v4 = vpop.f32.mrb[11].mxu1 }
 0x112   :  { %v1308_v5 = vadd.f32 %v6809_v0, %v6769_v61  ;;  %v6812_v6 = vadd.f32 %v6811_v4, %v6810_v1 }
 0x114   :  { %v1311_v7 = vadd.f32 %v6812_v6, %v6772_v3 }
 0x115   :  { %v6773_v8 = vpop.f32.mrb[12].mxu0 }
 0x116   :  { %v6813_v9 = vpop.f32.mrb[12].mxu1  ;;  %v6774_v10 = vpop.f32.mrb[13].mxu0 }
 0x117   :  { %v6814_v11 = vpop.f32.mrb[13].mxu1  ;;  %v6775_v12 = vadd.f32 %v6774_v10, %v6773_v8  ;;  %v6776_v14 = vpop.f32.mrb[14].mxu0 }
 0x118   :  { %v6815_v13 = vadd.f32 %v6814_v11, %v6813_v9  ;;  %v6816_v15 = vpop.f32.mrb[14].mxu1  ;;  %v6777_v16 = vpop.f32.mrb[15].mxu0 }
 0x119   :  { %v6817_v17 = vpop.f32.mrb[15].mxu1  ;;  %v6778_v19 = vadd.f32 %v6777_v16, %v6776_v14 }
 0x11a   :  { %v1316_v18 = vadd.f32 %v6815_v13, %v6775_v12  ;;  %v6818_v20 = vadd.f32 %v6817_v17, %v6816_v15 }
 0x11c   :  { %v9521_v21 = vadd.f32 %v6818_v20, %v6778_v19 }
 0x11d   :  { %v6835_v22 = vpop.f32.mrb[16].mxu0 }
 0x11e   :  { %v6836_v23 = vpop.f32.mrb[17].mxu0  ;;  %v6875_v24 = vpop.f32.mrb[16].mxu1 }
 0x11f   :  { %v6837_v25 = vadd.f32 %v6836_v23, %v6835_v22  ;;  %v6838_v26 = vpop.f32.mrb[18].mxu0  ;;  %v6876_v27 = vpop.f32.mrb[17].mxu1 }
 0x120   :  { %v6839_v30 = vpop.f32.mrb[19].mxu0  ;;  %v6877_v32 = vadd.f32 %v6876_v27, %v6875_v24  ;;  %v6878_v33 = vpop.f32.mrb[18].mxu1 }
 0x121   :  { %v1357_v31 = vadd.f32 %v6837_v25, %v1292_v41  ;;  %v6840_v34 = vadd.f32 %v6839_v30, %v6838_v26  ;;  %v6879_v35 = vpop.f32.mrb[19].mxu1 }
 0x122   :  { %v6880_v38 = vadd.f32 %v6879_v35, %v6878_v33 }
 0x123   :  { %v1422_v36 = vadd.f32 %v6877_v32, %v1357_v31  ;;  %v1360_v37 = vadd.f32 %v6840_v34, %v1295_v43 }
 0x125   :  { %v9523_v39 = vadd.f32 %v6880_v38, %v1360_v37  ;;  %v6841_v40 = vpop.f32.mrb[20].mxu0 }
 0x126   :  { %v6881_v42 = vpop.f32.mrb[20].mxu1  ;;  %v6842_v44 = vpop.f32.mrb[21].mxu0 }
 0x127   :  { %v6843_v45 = vadd.f32 %v6842_v44, %v6841_v40  ;;  %v6882_v46 = vpop.f32.mrb[21].mxu1  ;;  %v6844_v47 = vpop.f32.mrb[22].mxu0 }
 0x128   :  { %v6883_v48 = vadd.f32 %v6882_v46, %v6881_v42  ;;  %v6884_v49 = vpop.f32.mrb[22].mxu1  ;;  %v6845_v50 = vpop.f32.mrb[23].mxu0 }
 0x129   :  { %v1365_v51 = vadd.f32 %v6843_v45, %v1300_v55  ;;  %v6846_v41 = vadd.f32 %v6845_v50, %v6844_v47  ;;  %v6885_v52 = vpop.f32.mrb[23].mxu1 }
 0x12a   :  { %v6886_v53 = vadd.f32 %v6885_v52, %v6884_v49 }
 0x12b   :  { %v9525_v54 = vadd.f32 %v6883_v48, %v1365_v51  ;;  %v1368_v56 = vadd.f32 %v6846_v41, %v1303_v57 }
 0x12d   :  { %v9527_v43 = vadd.f32 %v6886_v53, %v1368_v56  ;;  %v6847_v58 = vpop.f32.mrb[24].mxu0 }
 0x12e   :  { %v6887_v59 = vpop.f32.mrb[24].mxu1  ;;  %v6848_v60 = vpop.f32.mrb[25].mxu0 }
 0x12f   :  { %v6888_v61 = vpop.f32.mrb[25].mxu1  ;;  %v6849_v62 = vadd.f32 %v6848_v60, %v6847_v58  ;;  %v6850_v0 = vpop.f32.mrb[26].mxu0 }
 0x130   :  { %v6889_v63 = vadd.f32 %v6888_v61, %v6887_v59  ;;  %v6890_v1 = vpop.f32.mrb[26].mxu1  ;;  %v6851_v2 = vpop.f32.mrb[27].mxu0 }
 0x131   :  { %v6891_v3 = vpop.f32.mrb[27].mxu1  ;;  %v1373_v4 = vadd.f32 %v6849_v62, %v1308_v5  ;;  %v6852_v55 = vadd.f32 %v6851_v2, %v6850_v0 }
 0x132   :  { %v6892_v6 = vadd.f32 %v6891_v3, %v6890_v1 }
 0x133   :  { %v9529_v8 = vadd.f32 %v6889_v63, %v1373_v4  ;;  %v1376_v9 = vadd.f32 %v6852_v55, %v1311_v7 }
 0x135   :  { %v9531_v10 = vadd.f32 %v6892_v6, %v1376_v9  ;;  %v6853_v57 = vpop.f32.mrb[28].mxu0 }
 0x136   :  { %v6893_v11 = vpop.f32.mrb[28].mxu1  ;;  %v6854_v12 = vpop.f32.mrb[29].mxu0 }
 0x137   :  { %v6855_v13 = vadd.f32 %v6854_v12, %v6853_v57  ;;  %v6894_v14 = vpop.f32.mrb[29].mxu1  ;;  %v6856_v15 = vpop.f32.mrb[30].mxu0 }
 0x138   :  { %v6895_v16 = vadd.f32 %v6894_v14, %v6893_v11  ;;  %v6896_v17 = vpop.f32.mrb[30].mxu1  ;;  %v6857_v19 = vpop.f32.mrb[31].mxu0 }
 0x139   :  { %v1381_v20 = vadd.f32 %v6855_v13, %v1316_v18  ;;  %v6858_v22 = vadd.f32 %v6857_v19, %v6856_v15  ;;  %v6897_v23 = vpop.f32.mrb[31].mxu1 }
 0x13a   :  { %v6898_v5 = vadd.f32 %v6897_v23, %v6896_v17 }
 0x13b   :  { %v9533_v24 = vadd.f32 %v6895_v16, %v1381_v20  ;;  %v1384_v25 = vadd.f32 %v6858_v22, %v9521_v21 }
 0x13d   :  { %v9536_v7 = vadd.f32 %v6898_v5, %v1384_v25  ;;  %v6915_v26 = vpop.f32.mrb[32].mxu0 }
 0x13e   :  { %v6955_v27 = vpop.f32.mrb[32].mxu1  ;;  %v6916_v30 = vpop.f32.mrb[33].mxu0 }
 0x13f   :  { %v6917_v31 = vadd.f32 %v6916_v30, %v6915_v26  ;;  %v6956_v32 = vpop.f32.mrb[33].mxu1  ;;  %v6918_v33 = vpop.f32.mrb[34].mxu0 }
 0x140   :  { %v6957_v34 = vadd.f32 %v6956_v32, %v6955_v27  ;;  %v6958_v35 = vpop.f32.mrb[34].mxu1  ;;  %v6919_v37 = vpop.f32.mrb[35].mxu0 }
 0x141   :  { %v1487_v38 = vadd.f32 %v6917_v31, %v1422_v36  ;;  %v6920_v18 = vadd.f32 %v6919_v37, %v6918_v33  ;;  %v6959_v40 = vpop.f32.mrb[35].mxu1  ;;  %v11969_v36 = vmov 0 }
 0x142   :  { %v6960_v42 = vadd.f32 %v6959_v40, %v6958_v35  ;;  %v11970_v36 = vsel %vm9547_vm2, 4294967295, %v11969_v36  ;;  %v93_v35 = vld [vmem:[%s11972_s26] sm:$0xff] }
 0x143   :  { %v9538_v44 = vadd.f32 %v6957_v34, %v1487_v38  ;;  %v1490_v21 = vadd.f32 %v6920_v18, %v9523_v39  ;;  %11971 = vst [vmem:[#allocation3_spill] sm:$0xff] %v11970_v36  ;;  %v9618_v18 = vld [vmem:[%s11974_s28] sm:$0xf] }
 0x145   :  { %v9541_v45 = vadd.f32 %v6960_v42, %v1490_v21  ;;  %v6921_v46 = vpop.f32.mrb[36].mxu0  ;;  %7616 = vmatprep.mubr.msk.f32.mxu0 %vm1582_vm1, %v9538_v44 }
 0x146   :  { %v6961_v47 = vpop.f32.mrb[36].mxu1  ;;  %v6922_v48 = vpop.f32.mrb[37].mxu0 }
 0x147   :  { %v6923_v49 = vadd.f32 %v6922_v48, %v6921_v46  ;;  %v6962_v50 = vpop.f32.mrb[37].mxu1  ;;  %v6924_v51 = vpop.f32.mrb[38].mxu0  ;;  %7617 = vmatmul.mubr.msk.f32.vlgmr.msra.gmra.mrb[48].mxu0 %vm1582_vm1, %v9541_v45  ;;  %v8102_v39 = vpack.c.bf16 %v9541_v45, %v9538_v44 }
 0x148   :  { %v6963_v41 = vadd.f32 %v6962_v50, %v6961_v47  ;;  %v6964_v52 = vpop.f32.mrb[38].mxu1  ;;  %v6925_v53 = vpop.f32.mrb[39].mxu0  ;;  %v8949_v50 = vmov 1966171168  }
 0x149   :  { %v1495_v56 = vadd.f32 %v6923_v49, %v9525_v54  ;;  %v6926_v58 = vadd.f32 %v6925_v53, %v6924_v51  ;;  %v6965_v59 = vpop.f32.mrb[39].mxu1  ;;  %8104 = vmatpush3.bf16.xpose.msk.msra.mxu1 %vm9547_vm2, %v8102_v39  ;;  %v1785_v49 = vlaneseq  ;;  %v1792_v51 = vunpack.c.l.s4 %v8949_v50 }
 0x14a   :  { %v6966_v60 = vadd.f32 %v6965_v59, %v6964_v52  ;;  %8105 = vmatprep.subr.bf16.mxu1 %v11859_v28  ;;  %v9653_v59 = vld [vmem:[%s11836_s15 + $0x8] sm:$0xff] }
 0x14b   :  { %v9559_v61 = vadd.f32 %v6963_v41, %v1495_v56  ;;  %v1498_v62 = vadd.f32 %v6926_v58, %v9527_v43  ;;  %v1793_v52 = vunpack.c.0.s8 %v1792_v51  ;;  %v9638_v53 = vshrl.u32 %v1785_v49, 7  ;;  %v9644_v56 = vld [vmem:[%s11836_s15] sm:$0xff] }
 0x14c   :  { %vm9658_vm5 = vcmp.lt.s32.totalorder %v1785_v49, 64  ;;  %vm1816_vm6 = vcmp.ge.s32.totalorder %v1785_v49, 64  ;;  %vm1817_vm7 = vcmp.lt.s32.totalorder %v1785_v49, 128 }
 0x14d   :  { %v9562_v63 = vadd.f32 %v6966_v60, %v1498_v62  ;;  %v6927_v0 = vpop.f32.mrb[40].mxu0  ;;  %7619 = vmatprep.mubr.msk.f32.mxu0 %vm1582_vm1, %v9559_v61  ;;  %11975 = vst [vmem:[#allocation4_spill] sm:$0xff] %v9638_v53  ;;  %v9648_v58 = vsub.s32 %v1793_v52, %v9638_v53  ;;  %v11977_v60 = vmov 0  ;;  %v9665_v62 = vld [vmem:[%s11836_s15 + $0x10] sm:$0xff]  ;;  %vm9881_vm8 = vmand %vm1816_vm6, %vm1817_vm7 }
 0x14e   :  { %v6967_v1 = vpop.f32.mrb[40].mxu1  ;;  %v6928_v54 = vpop.f32.mrb[41].mxu0  ;;  %v11978_v60 = vsel %vm9658_vm5, 4294967295, %v11977_v60 }
 0x14f   :  { %v6929_v2 = vadd.f32 %v6928_v54, %v6927_v0  ;;  %v6968_v3 = vpop.f32.mrb[41].mxu1  ;;  %v6930_v4 = vpop.f32.mrb[42].mxu0  ;;  %7620 = vmatmul.mubr.msk.f32.gmra.mrb[50].mxu0 %vm1582_vm1, %v9562_v63  ;;  %v8106_v55 = vpack.c.bf16 %v9562_v63, %v9559_v61  ;;  %11976 = vst [vmem:[#allocation5_spill] sm:$0xff] %v9648_v58  ;;  %11979 = vst [vmem:[#allocation6_spill] sm:$0xff] %v11978_v60 }
 0x150   :  { %v6969_v6 = vadd.f32 %v6968_v3, %v6967_v1  ;;  %v6970_v9 = vpop.f32.mrb[42].mxu1  ;;  %v6931_v43 = vpop.f32.mrb[43].mxu0  ;;  %v9682_v3 = vld [vmem:[%s11836_s15 + $0x20] sm:$0xff] }
 0x151   :  { %v1503_v57 = vadd.f32 %v6929_v2, %v9529_v8  ;;  %v6932_v11 = vadd.f32 %v6931_v43, %v6930_v4  ;;  %v6971_v12 = vpop.f32.mrb[43].mxu1  ;;  %8108 = vmatpush3.bf16.xpose.msk.msra.mxu1 %vm9547_vm2, %v8106_v55  ;;  %v9677_v2 = vld [vmem:[%s11836_s15 + $0x18] sm:$0xff]  ;;  %v9693_v43 = vld [vmem:[%s11836_s15 + $0x28] sm:$0xff] }
 0x152   :  { %v6972_v13 = vadd.f32 %v6971_v12, %v6970_v9  ;;  %8109 = vmatprep.subr.bf16.mxu1 %v11859_v28  ;;  %v101_v12 = vld [vmem:[%s11836_s15 + $0x38] sm:$0xff]  ;;  %v9832_v50 = vpack.c.bf16 %v9677_v2, %v9665_v62 }
 0x153   :  { %v9574_v14 = vadd.f32 %v6969_v6, %v1503_v57  ;;  %v1506_v15 = vadd.f32 %v6932_v11, %v9531_v10  ;;  %v9698_v57 = vld [vmem:[%s11836_s15 + $0x30] sm:$0xff] }
 0x154   :  { %11982 = vst [vmem:[#allocation9_spill] sm:$0xff] %v9832_v50  ;;  %v9847_v52 = vpack.c.bf16 %v101_v12, %v9698_v57 }
 0x155   :  { %v9577_v16 = vadd.f32 %v6972_v13, %v1506_v15  ;;  %v6933_v17 = vpop.f32.mrb[44].mxu0  ;;  %7622 = vmatprep.mubr.msk.f32.mxu0 %vm1582_vm1, %v9574_v14  ;;  %v9713_v13 = vld [vmem:[%s11836_s15 + $0x40] sm:$0xff]  ;;  %v103_v15 = vld [vmem:[%s11836_s15 + $0x48] sm:$0xff] }
 0x156   :  { %v6973_v19 = vpop.f32.mrb[44].mxu1  ;;  %v6934_v8 = vpop.f32.mrb[45].mxu0  ;;  %11986 = vst [vmem:[#allocation13_spill] sm:$0xff] %v9847_v52 }
 0x157   :  { %v6935_v20 = vadd.f32 %v6934_v8, %v6933_v17  ;;  %v6974_v22 = vpop.f32.mrb[45].mxu1  ;;  %v6936_v23 = vpop.f32.mrb[46].mxu0  ;;  %7623 = vmatmul.mubr.msk.f32.gmra.mrb[52].mxu0 %vm1582_vm1, %v9577_v16  ;;  %v8110_v5 = vpack.c.bf16 %v9577_v16, %v9574_v14  ;;  %v9725_v17 = vld [vmem:[%s11836_s15 + $0x50] sm:$0xff]  ;;  %v9736_v8 = vld [vmem:[%s11836_s15 + $0x60] sm:$0xff] }
 0x158   :  { %v6975_v25 = vadd.f32 %v6974_v22, %v6973_v19  ;;  %v6976_v26 = vpop.f32.mrb[46].mxu1  ;;  %v6937_v10 = vpop.f32.mrb[47].mxu0  ;;  %v105_v19 = vld [vmem:[%s11836_s15 + $0x58] sm:$0xff]  ;;  %v9747_v22 = vld [vmem:[%s11836_s15 + $0x70] sm:$0xff] }
 0x159   :  { %v1511_v27 = vadd.f32 %v6935_v20, %v9533_v24  ;;  %v6938_v30 = vadd.f32 %v6937_v10, %v6936_v23  ;;  %v6977_v31 = vpop.f32.mrb[47].mxu1  ;;  %8112 = vmatpush3.bf16.xpose.msk.msra.mxu1 %vm9547_vm2, %v8110_v5  ;;  %v9599_v24 = vcombine.high %v93_v35, %v93_v35  ;;  %v107_v20 = vld [vmem:[%s11836_s15 + $0x68] sm:$0xff]  ;;  %v9755_v23 = vld [vmem:[%s11836_s15 + $0x78] sm:$0xff]  ;;  %v110_v5 = vld [vmem:[%s11836_s15 + $0x80] sm:$0xff] }
 0x15a   :  { %v6978_v32 = vadd.f32 %v6977_v31, %v6976_v26  ;;  %8113 = vmatprep.subr.bf16.mxu1 %v11859_v28  ;;  %v112_v26 = vld [vmem:[%s11836_s15 + $0x90] sm:$0xff]  ;;  %v113_v10 = vld [vmem:[%s11836_s15 + $0x98] sm:$0xff]  ;;  %v90_v28 = vld [vmem:[%s11837_s1 + $0xa8] sm:$0xff] }
 0x15b   :  { %v9589_v33 = vadd.f32 %v6975_v25, %v1511_v27  ;;  %v1514_v34 = vadd.f32 %v6938_v30, %v9536_v7  ;;  %v367_v7 = vld [vmem:[%s11973_s27] sm:$0xf]  ;;  %v111_v25 = vld [vmem:[%s11836_s15 + $0x88] sm:$0xff]  ;;  %v116_v31 = vld [vmem:[%s11836_s15 + $0xb0] sm:$0xff]  ;;  %v9835_v51 = vpack.c.bf16 %v113_v10, %v112_v26 }
 0x15c   :  { %v114_v27 = vld [vmem:[%s11836_s15 + $0xa0] sm:$0xff]  ;;  %v115_v30 = vld [vmem:[%s11836_s15 + $0xa8] sm:$0xff] }
 0x15d   :  { %v9595_v37 = vadd.f32 %v6978_v32, %v1514_v34  ;;  %7625 = vmatprep.mubr.msk.f32.mxu0 %vm1582_vm1, %v9589_v33  ;;  %v117_v32 = vld [vmem:[%s11836_s15 + $0xb8] sm:$0xff]  ;;  %v118_v34 = vld [vmem:[%s11836_s15 + $0xc0] sm:$0xff]  ;;  %11983 = vst [vmem:[#allocation10_spill] sm:$0xff] %v9835_v51 }
 0x15f   :  { %7626 = vmatmul.mubr.msk.f32.gmra.mrb[54].mxu0 %vm1582_vm1, %v9595_v37  ;;  %v8114_v38 = vpack.c.bf16 %v9595_v37, %v9589_v33 }
 0x161   :  { %8116 = vmatpush3.bf16.xpose.msk.msra.mxu1 %vm9547_vm2, %v8114_v38  ;;  %v120_v38 = vld [vmem:[%s11836_s15 + $0xd0] sm:$0xff] }
 0x162   :  { %6504 = vmatprep.subr.msk.mxu1 %vm1867_vm3, %v9599_v24 }
 0x168   :  { %7645 = vmatmul.mubr.msk.f32.vlgmr.msra.gmra.mrb[48].mxu1 %vm1582_vm1, %v367_v7  ;;  %v121_v7 = vld [vmem:[%s11836_s15 + $0xd8] sm:$0xff] }
 0x169   :  { %6505 = vmatpush1.msk.msra.mxu1 %vm1867_vm3, %v93_v35  ;;  %1936 = vmatprep.mubr.f32.mxu1 %v11857_v29  ;;  %v119_v35 = vld [vmem:[%s11836_s15 + $0xc8] sm:$0xff] }
 0x16a   :  { %7647 = vmatprep.subr.msk.mxu1 %vm1867_vm3, %v9618_v18 }
 0x21a   :  { %v7618_v40 = vpop.f32.mrb[48].mxu0 }
 0x21b   :  { %v1673_v42 = vpop.f32.mrb[49].mxu0 }
 0x21c   :  { %6506 = vmatmul.mubr.msk.f32.vlgmr.msra.gmra.mrb[50].mxu1 %vm1842_vm4, %v1673_v42  ;;  %v123_v42 = vld [vmem:[%s11836_s15 + $0xe8] sm:$0xff] }
 0x21d   :  { %1942 = vmatprep.mubr.f32.mxu1 %v11857_v29  ;;  %7648 = vmatpush3.msk.msra.mxu1 %vm1867_vm3, %v9618_v18 }
 0x220   :  { %6507 = vmatmul.mubr.msk.f32.gmra.mrb[52].mxu1 %vm1842_vm4, %v7618_v40  ;;  %v122_v40 = vld [vmem:[%s11836_s15 + $0xe0] sm:$0xff] }
 0x221   :  { %1948 = vmatprep.mubr.f32.mxu1 %v11857_v29 }
 0x222   :  { %v7621_v21 = vpop.f32.mrb[50].mxu0 }
 0x223   :  { %v1683_v46 = vpop.f32.mrb[51].mxu0 }
 0x224   :  { %6508 = vmatmul.mubr.msk.f32.gmra.mrb[54].mxu1 %vm1842_vm4, %v1683_v46  ;;  %v125_v46 = vld [vmem:[%s11836_s15 + $0xf8] sm:$0xff] }
 0x225   :  { %1954 = vmatprep.mubr.f32.mxu1 %v11857_v29 }
 0x228   :  { %6509 = vmatmul.mubr.msk.f32.gmra.mrb[56].mxu1 %vm1842_vm4, %v7621_v21  ;;  %v124_v21 = vld [vmem:[%s11836_s15 + $0xf0] sm:$0xff] }
 0x229   :  { %1960 = vmatprep.mubr.f32.mxu1 %v11857_v29 }
 0x22a   :  { %v7624_v47 = vpop.f32.mrb[52].mxu0 }
 0x22b   :  { %v1693_v48 = vpop.f32.mrb[53].mxu0 }
 0x22c   :  { %6510 = vmatmul.mubr.msk.f32.gmra.mrb[58].mxu1 %vm1842_vm4, %v1693_v48  ;;  %v9827_v48 = vpack.c.bf16 %v111_v25, %v110_v5 }
 0x22d   :  { %1966 = vmatprep.mubr.f32.mxu1 %v11857_v29 }
 0x22e   :  { %11981 = vst [vmem:[#allocation8_spill] sm:$0xff] %v9827_v48  ;;  %8118 = vmatprep.subr.bf16.mxu0 %v9827_v48 }
 0x230   :  { %6511 = vmatmul.mubr.msk.f32.gmra.mrb[60].mxu1 %vm1842_vm4, %v7624_v47  ;;  %v9825_v47 = vpack.c.bf16 %v9653_v59, %v9644_v56 }
 0x231   :  { %1972 = vmatprep.mubr.f32.mxu1 %v11857_v29 }
 0x232   :  { %v7627_v39 = vpop.f32.mrb[54].mxu0  ;;  %11980 = vst [vmem:[#allocation7_spill] sm:$0xff] %v9825_v47  ;;  %8120 = vmatpush3.bf16.msra.mxu0 %v9825_v47 }
 0x233   :  { %v1703_v41 = vpop.f32.mrb[55].mxu0  ;;  %8122 = vmatprep.subr.bf16.mxu0 %v9835_v51 }
 0x234   :  { %6512 = vmatmul.mubr.msk.f32.gmra.mrb[62].mxu1 %vm1842_vm4, %v1703_v41  ;;  %v9843_v41 = vpack.c.bf16 %v115_v30, %v114_v27 }
 0x235   :  { %1978 = vmatprep.mubr.f32.mxu1 %v11857_v29 }
 0x236   :  { %8124 = vmatpush3.bf16.msra.mxu0 %v9832_v50  ;;  %11985 = vst [vmem:[#allocation12_spill] sm:$0xff] %v9843_v41 }
 0x237   :  { %8126 = vmatprep.subr.bf16.mxu0 %v9843_v41 }
 0x238   :  { %6513 = vmatmul.mubr.msk.f32.gmra.mrb[64].mxu1 %vm1842_vm4, %v7627_v39  ;;  %v9840_v39 = vpack.c.bf16 %v9693_v43, %v9682_v3 }
 0x239   :  { %7649 = vmatprep.mubr.msk.f32.mxu1 %vm1842_vm4, %v9644_v56  ;;  %v9850_v56 = vpack.c.bf16 %v117_v32, %v116_v31 }
 0x23a   :  { %11984 = vst [vmem:[#allocation11_spill] sm:$0xff] %v9840_v39  ;;  %8128 = vmatpush3.bf16.msra.mxu0 %v9840_v39 }
 0x23b   :  { %v1781_v0 = vpop.f32.mrb[48].mxu1  ;;  %11987 = vst [vmem:[#allocation14_spill] sm:$0xff] %v9850_v56  ;;  %8130 = vmatprep.subr.bf16.mxu0 %v9850_v56 }
 0x23c   :  { %7650 = vmatmul.mubr.msk.f32.vlgmr.msra.gmra.mrb[66].mxu1 %vm1842_vm4, %v9653_v59  ;;  %1789 = vst.msk [vmem:[#allocation2] sm:$0x1] %vm9658_vm5, %v1781_v0  ;;  %v1797_v1 = vrot.slane %v1781_v0, %v9648_v58  ;;  %v7646_v54 = vpop.f32.mrb[49].mxu1  ;;  %v9854_v59 = vpack.c.bf16 %v103_v15, %v9713_v13  ;;  %v9861_v0 = vpack.c.bf16 %v105_v19, %v9725_v17 }
 0x23d   :  { %7652 = vmatprep.mubr.msk.f32.mxu1 %vm1842_vm4, %v9665_v62  ;;  %v9857_v62 = vpack.c.bf16 %v119_v35, %v118_v34  ;;  %v9868_v54 = vpack.c.bf16 %v107_v20, %v9736_v8 }
 0x23e   :  { %v1805_v4 = vrot.slane %v1797_v1, %v9648_v58  ;;  %v1798_v55 = vcombine.high %v1797_v1, %v1797_v1  ;;  %11988 = vst [vmem:[#allocation15_spill] sm:$0xff] %v9854_v59  ;;  %8132 = vmatpush3.bf16.msra.mxu0 %v9847_v52  ;;  %11990 = vst [vmem:[#allocation17_spill] sm:$0xff] %v9861_v0  ;;  %v9864_v1 = vpack.c.bf16 %v121_v7, %v120_v38 }
 0x23f   :  { %11989 = vst [vmem:[#allocation16_spill] sm:$0xff] %v9857_v62  ;;  %8134 = vmatprep.subr.bf16.mxu0 %v9857_v62  ;;  %11992 = vst [vmem:[#allocation19_spill] sm:$0xff] %v9868_v54 }
 0x240   :  { %7653 = vmatmul.mubr.msk.f32.gmra.mrb[68].mxu1 %vm1842_vm4, %v9677_v2  ;;  %v1820_v6 = vcombine.high %v1805_v4, %v1805_v4  ;;  %v1812_v9 = vrot.slane %v1798_v55, %v9648_v58  ;;  %11991 = vst [vmem:[#allocation18_spill] sm:$0xff] %v9864_v1  ;;  %v9871_v2 = vpack.c.bf16 %v123_v42, %v122_v40  ;;  %v11995_v4 = vmov 0 }
 0x241   :  { %7655 = vmatprep.mubr.msk.f32.mxu1 %vm1842_vm4, %v9682_v3  ;;  %v9878_v3 = vpack.c.bf16 %v9755_v23, %v9747_v22  ;;  %v11996_v4 = vsel %vm9881_vm8, 4294967295, %v11995_v4  ;;  %v9885_v55 = vpack.c.bf16 %v125_v46, %v124_v21 }
 0x242   :  { %1822 = vst.msk [vmem:[#allocation2 + $0x1] sm:$0x1] %vm9658_vm5, %v1820_v6  ;;  %1813 = vrot.lane.b32.xlu0 %v1812_v9, %s8950_s2  ;;  %v1823_v11 = vcombine.high %v1812_v9, %v1812_v9  ;;  %8136 = vmatpush3.bf16.msra.mxu0 %v9854_v59  ;;  %11993 = vst [vmem:[#allocation20_spill] sm:$0xff] %v9871_v2  ;;  %v9894_v9 = vsub.s32 0, %v9638_v53 }
 0x243   :  { %8138 = vmatprep.subr.bf16.mxu0 %v9864_v1  ;;  %11994 = vst [vmem:[#allocation21_spill] sm:$0xff] %v9878_v3  ;;  %11997 = vst [vmem:[#allocation22_spill] sm:$0xff] %v11996_v4 }
 0x244   :  { %7656 = vmatmul.mubr.msk.f32.gmra.mrb[70].mxu1 %vm1842_vm4, %v9693_v43  ;;  %11998 = vst [vmem:[#allocation23_spill] sm:$0xff] %v9885_v55  ;;  %11999 = vst [vmem:[#allocation24_spill] sm:$0xff] %v9894_v9 }
 0x245   :  { %7658 = vmatprep.mubr.msk.f32.mxu1 %vm1842_vm4, %v9698_v57  ;;  %v9897_v57 = vsub.s32 1, %v9638_v53 }
 0x246   :  { %1824 = vrot.lane.b32.xlu0 %v1823_v11, %s8950_s2  ;;  %8140 = vmatpush3.bf16.msra.mxu0 %v9861_v0 }
 0x247   :  { %8142 = vmatprep.subr.bf16.mxu0 %v9871_v2  ;;  %12000 = vst [vmem:[#allocation25_spill] sm:$0xff] %v9897_v57 }
 0x248   :  { %7659 = vmatmul.mubr.msk.f32.gmra.mrb[72].mxu1 %vm1842_vm4, %v101_v12 }
 0x249   :  { %7661 = vmatprep.mubr.msk.f32.mxu1 %vm1842_vm4, %v9713_v13 }
 0x24a   :  { %8144 = vmatpush3.bf16.msra.mxu0 %v9868_v54 }
 0x24b   :  { %8146 = vmatprep.subr.bf16.mxu0 %v9885_v55 }
 0x24c   :  { %7662 = vmatmul.mubr.msk.f32.gmra.mrb[74].mxu1 %vm1842_vm4, %v103_v15 }
 0x24d   :  { %7664 = vmatprep.mubr.msk.f32.mxu1 %vm1842_vm4, %v9725_v17 }
 0x24e   :  { %8148 = vmatpush3.bf16.msra.mxu0 %v9878_v3 }
 0x250   :  { %7665 = vmatmul.mubr.msk.f32.gmra.mrb[76].mxu1 %vm1842_vm4, %v105_v19 }
 0x251   :  { %7667 = vmatprep.mubr.msk.f32.mxu1 %vm1842_vm4, %v9736_v8 }
 0x254   :  { %7668 = vmatmul.mubr.msk.f32.gmra.mrb[78].mxu1 %vm1842_vm4, %v107_v20  ;;  %v69_v20 = vld [vmem:[%s11837_s1] sm:$0xff] }
 0x255   :  { %7670 = vmatprep.mubr.msk.f32.mxu1 %vm1842_vm4, %v9747_v22 }
 0x258   :  { %7671 = vmatmul.mubr.msk.f32.gmra.mrb[80].mxu1 %vm1842_vm4, %v9755_v23 }
 0x259   :  { %7673 = vmatprep.mubr.msk.f32.mxu1 %vm1842_vm4, %v110_v5  ;;  %v70_v5 = vld [vmem:[%s11837_s1 + $0x8] sm:$0xff] }
 0x25c   :  { %7674 = vmatmul.mubr.msk.f32.gmra.mrb[82].mxu1 %vm1842_vm4, %v111_v25 }
 0x25d   :  { %7676 = vmatprep.mubr.msk.f32.mxu1 %vm1842_vm4, %v112_v26 }
 0x260   :  { %7677 = vmatmul.mubr.msk.f32.gmra.mrb[84].mxu1 %vm1842_vm4, %v113_v10 }
 0x261   :  { %7679 = vmatprep.mubr.msk.f32.mxu1 %vm1842_vm4, %v114_v27 }
 0x264   :  { %7680 = vmatmul.mubr.msk.f32.gmra.mrb[86].mxu1 %vm1842_vm4, %v115_v30 }
 0x265   :  { %7682 = vmatprep.mubr.msk.f32.mxu1 %vm1842_vm4, %v116_v31 }
 0x268   :  { %7683 = vmatmul.mubr.msk.f32.gmra.mrb[88].mxu1 %vm1842_vm4, %v117_v32 }
 0x269   :  { %7685 = vmatprep.mubr.msk.f32.mxu1 %vm1842_vm4, %v118_v34 }
 0x26c   :  { %7686 = vmatmul.mubr.msk.f32.gmra.mrb[90].mxu1 %vm1842_vm4, %v119_v35  ;;  %v72_v35 = vld [vmem:[%s11837_s1 + $0x18] sm:$0xff] }
 0x26d   :  { %7688 = vmatprep.mubr.msk.f32.mxu1 %vm1842_vm4, %v120_v38 }
 0x270   :  { %7689 = vmatmul.mubr.msk.f32.gmra.mrb[92].mxu1 %vm1842_vm4, %v121_v7 }
 0x271   :  { %7691 = vmatprep.mubr.msk.f32.mxu1 %vm1842_vm4, %v122_v40  ;;  %v73_v40 = vld [vmem:[%s11837_s1 + $0x20] sm:$0xff] }
 0x274   :  { %7692 = vmatmul.mubr.msk.f32.gmra.mrb[94].mxu1 %vm1842_vm4, %v123_v42 }
 0x275   :  { %7694 = vmatprep.mubr.msk.f32.mxu1 %vm1842_vm4, %v124_v21 }
 0x278   :  { %7695 = vmatmul.mubr.msk.f32.gmra.mrb[96].mxu1 %vm1842_vm4, %v125_v46 }
 0x2b4   :  { %v1814_v6 = vpop.permute.xlu0 %1813 }
 0x2b5   :  { %1819 = vst.msk [vmem:[#allocation2] sm:$0x1] %vm9881_vm8, %v1814_v6 }
 0x2b8   :  { %v1825_v49 = vpop.permute.xlu0 %1824 }
 0x2b9   :  { %1827 = vst.msk [vmem:[#allocation2 + $0x1] sm:$0x1] %vm9881_vm8, %v1825_v49 }
 0x2c0   :  { %v1828_v43 = vld [vmem:[#allocation2] sm:$0x3] }
 0x2c1   :  { %v9900_v11 = vrot.slane %v1828_v43, %v9894_v9  ;;  %v9903_v13 = vrot.slane %v1828_v43, %v9897_v57 }
 0x2ef   :  { %v1938_v12 = vpop.f32.mrb[50].mxu1 }
 0x2f0   :  { %v1939_v15 = vadd.f32 %v1938_v12, %v9900_v11  ;;  %v1940_v17 = vpop.f32.mrb[51].mxu1 }
 0x2f1   :  { %v1941_v19 = vadd.f32 %v1940_v17, %v9903_v13 }
 0x2f2   :  { %vm1985_vm9 = vcmp.gt.f32.partialorder %v1939_v15, 0.0  ;;  %v2001_v8 = vmul.f32 0.2, %v1939_v15 }
 0x2f3   :  { %vm1986_vm10 = vcmp.gt.f32.partialorder %v1941_v19, 0.0  ;;  %v2002_v22 = vmul.f32 0.2, %v1941_v19  ;;  %v1944_v23 = vpop.f32.mrb[52].mxu1 }
 0x2f4   :  { %v1945_v25 = vadd.f32 %v1944_v23, %v9900_v11  ;;  %v1946_v26 = vpop.f32.mrb[53].mxu1  ;;  %v2017_v10 = vsel %vm1985_vm9, %v1939_v15, %v2001_v8 }
 0x2f5   :  { %v1947_v27 = vadd.f32 %v1946_v26, %v9903_v13  ;;  %v2018_v30 = vsel %vm1986_vm10, %v1941_v19, %v2002_v22  ;;  %v9915_v31 = vadd.f32 %v2017_v10, %v69_v20  ;;  %v75_v19 = vld [vmem:[%s11837_s1 + $0x30] sm:$0xff]  ;;  %v76_v22 = vld [vmem:[%s11837_s1 + $0x38] sm:$0xff] }
 0x2f6   :  { %vm1987_vm11 = vcmp.gt.f32.partialorder %v1945_v25, 0.0  ;;  %v2003_v32 = vmul.f32 0.2, %v1945_v25  ;;  %v9917_v34 = vadd.f32 %v2018_v30, %v70_v5 }
 0x2f7   :  { %vm1988_vm12 = vcmp.gt.f32.partialorder %v1947_v27, 0.0  ;;  %v2004_v38 = vmul.f32 0.2, %v1947_v27  ;;  %v1950_v7 = vpop.f32.mrb[54].mxu1 }
 0x2f8   :  { %v1951_v42 = vadd.f32 %v1950_v7, %v9900_v11  ;;  %v1952_v21 = vpop.f32.mrb[55].mxu1  ;;  %v2049_v46 = vmax.f32 %v9915_v31, %v9917_v34  ;;  %v2019_v6 = vsel %vm1987_vm11, %v1945_v25, %v2003_v32 }
 0x2f9   :  { %v1953_v49 = vadd.f32 %v1952_v21, %v9903_v13  ;;  %v2020_v43 = vsel %vm1988_vm12, %v1947_v27, %v2004_v38  ;;  %v9929_v12 = vadd.f32 %v2019_v6, %v72_v35  ;;  %v78_v38 = vld [vmem:[%s11837_s1 + $0x48] sm:$0xff] }
 0x2fa   :  { %vm1989_vm13 = vcmp.gt.f32.partialorder %v1951_v42, 0.0  ;;  %v2005_v15 = vmul.f32 0.2, %v1951_v42  ;;  %2050 = vmax.xlane.f32.xlu1 %v2049_v46  ;;  %v9931_v17 = vadd.f32 %v2020_v43, %v73_v40 }
 0x2fb   :  { %vm1990_vm14 = vcmp.gt.f32.partialorder %v1953_v49, 0.0  ;;  %v2006_v8 = vmul.f32 0.2, %v1953_v49  ;;  %v1956_v20 = vpop.f32.mrb[56].mxu1 }
 0x2fc   :  { %v1957_v23 = vadd.f32 %v1956_v20, %v9900_v11  ;;  %v1958_v5 = vpop.f32.mrb[57].mxu1  ;;  %v2052_v25 = vmax.f32 %v9929_v12, %v9931_v17  ;;  %v2021_v26 = vsel %vm1989_vm13, %v1951_v42, %v2005_v15  ;;  %v79_v42 = vld [vmem:[%s11837_s1 + $0x50] sm:$0xff] }
 0x2fd   :  { %v1959_v10 = vadd.f32 %v1958_v5, %v9903_v13  ;;  %v2022_v27 = vsel %vm1990_vm14, %v1953_v49, %v2006_v8  ;;  %v9943_v30 = vadd.f32 %v2021_v26, %v75_v19 }
 0x2fe   :  { %vm1991_vm15 = vcmp.gt.f32.partialorder %v1957_v23, 0.0  ;;  %v2007_v32 = vmul.f32 0.2, %v1957_v23  ;;  %2053 = vmax.xlane.f32.xlu1 %v2052_v25  ;;  %v9945_v35 = vadd.f32 %v2022_v27, %v76_v22  ;;  %v81_v22 = vld [vmem:[%s11837_s1 + $0x60] sm:$0xff] }
 0x2ff   :  { %vm1992_vm6 = vcmp.gt.f32.partialorder %v1959_v10, 0.0  ;;  %v2008_v7 = vmul.f32 0.2, %v1959_v10  ;;  %v1962_v40 = vpop.f32.mrb[58].mxu1 }
 0x300   :  { %v1963_v21 = vadd.f32 %v1962_v40, %v9900_v11  ;;  %v1964_v46 = vpop.f32.mrb[59].mxu1  ;;  %v2055_v6 = vmax.f32 %v9943_v30, %v9945_v35  ;;  %v2023_v49 = vsel %vm1991_vm15, %v1957_v23, %v2007_v32  ;;  %v82_v23 = vld [vmem:[%s11837_s1 + $0x68] sm:$0xff] }
 0x301   :  { %v1965_v43 = vadd.f32 %v1964_v46, %v9903_v13  ;;  %v2024_v15 = vsel %vm1992_vm6, %v1959_v10, %v2008_v7  ;;  %v9957_v19 = vadd.f32 %v2023_v49, %v78_v38 }
 0x302   :  { %vm1993_vm7 = vcmp.gt.f32.partialorder %v1963_v21, 0.0  ;;  %v2009_v8 = vmul.f32 0.2, %v1963_v21  ;;  %2056 = vmax.xlane.f32.xlu0 %v2055_v6  ;;  %v9959_v20 = vadd.f32 %v2024_v15, %v79_v42  ;;  %v84_v6 = vld [vmem:[%s11837_s1 + $0x78] sm:$0xff] }
 0x303   :  { %vm1994_vm9 = vcmp.gt.f32.partialorder %v1965_v43, 0.0  ;;  %v2010_v5 = vmul.f32 0.2, %v1965_v43  ;;  %v1968_v25 = vpop.f32.mrb[60].mxu1 }
 0x304   :  { %v1969_v26 = vadd.f32 %v1968_v25, %v9900_v11  ;;  %v1970_v10 = vpop.f32.mrb[61].mxu1  ;;  %v2058_v27 = vmax.f32 %v9957_v19, %v9959_v20  ;;  %v2025_v32 = vsel %vm1993_vm7, %v1963_v21, %v2009_v8  ;;  %v85_v21 = vld [vmem:[%s11837_s1 + $0x80] sm:$0xff] }
 0x305   :  { %v1971_v38 = vadd.f32 %v1970_v10, %v9903_v13  ;;  %v2026_v7 = vsel %vm1994_vm9, %v1965_v43, %v2010_v5  ;;  %v9971_v40 = vadd.f32 %v2025_v32, %v81_v22 }
 0x306   :  { %vm1995_vm10 = vcmp.gt.f32.partialorder %v1969_v26, 0.0  ;;  %v2011_v42 = vmul.f32 0.2, %v1969_v26  ;;  %2059 = vmax.xlane.f32.xlu1 %v2058_v27  ;;  %v9973_v46 = vadd.f32 %v2026_v7, %v82_v23  ;;  %v87_v7 = vld [vmem:[%s11837_s1 + $0x90] sm:$0xff] }
 0x307   :  { %vm1996_vm11 = vcmp.gt.f32.partialorder %v1971_v38, 0.0  ;;  %v2012_v49 = vmul.f32 0.2, %v1971_v38  ;;  %v1974_v15 = vpop.f32.mrb[62].mxu1 }
 0x308   :  { %v1975_v43 = vadd.f32 %v1974_v15, %v9900_v11  ;;  %v1976_v8 = vpop.f32.mrb[63].mxu1  ;;  %v2061_v22 = vmax.f32 %v9971_v40, %v9973_v46  ;;  %v2027_v5 = vsel %vm1995_vm10, %v1969_v26, %v2011_v42  ;;  %v88_v26 = vld [vmem:[%s11837_s1 + $0x98] sm:$0xff] }
 0x309   :  { %v1977_v25 = vadd.f32 %v1976_v8, %v9903_v13  ;;  %v2028_v23 = vsel %vm1996_vm11, %v1971_v38, %v2012_v49  ;;  %v9985_v10 = vadd.f32 %v2027_v5, %v84_v6 }
 0x30a   :  { %vm1997_vm12 = vcmp.gt.f32.partialorder %v1975_v43, 0.0  ;;  %v2013_v27 = vmul.f32 0.2, %v1975_v43  ;;  %2062 = vmax.xlane.f32.xlu1 %v2061_v22  ;;  %v9987_v32 = vadd.f32 %v2028_v23, %v85_v21 }
 0x30b   :  { %vm1998_vm13 = vcmp.gt.f32.partialorder %v1977_v25, 0.0  ;;  %v2014_v15 = vmul.f32 0.2, %v1977_v25  ;;  %v1980_v29 = vpop.f32.mrb[64].mxu1 }
 0x30c   :  { %v1981_v38 = vadd.f32 %v1980_v29, %v9900_v11  ;;  %v1982_v42 = vpop.f32.mrb[65].mxu1  ;;  %v2064_v6 = vmax.f32 %v9985_v10, %v9987_v32  ;;  %v2029_v49 = vsel %vm1997_vm12, %v1975_v43, %v2013_v27 }
 0x30d   :  { %v1983_v21 = vadd.f32 %v1982_v42, %v9903_v13  ;;  %v2030_v8 = vsel %vm1998_vm13, %v1977_v25, %v2014_v15  ;;  %v9999_v22 = vadd.f32 %v2029_v49, %v87_v7  ;;  %v91_v13 = vld [vmem:[%s11837_s1 + $0xb0] sm:$0xff] }
 0x30e   :  { %vm1999_vm14 = vcmp.gt.f32.partialorder %v1981_v38, 0.0  ;;  %v2015_v5 = vmul.f32 0.2, %v1981_v38  ;;  %2065 = vmax.xlane.f32.xlu1 %v2064_v6  ;;  %v10001_v23 = vadd.f32 %v2030_v8, %v88_v26 }
 0x30f   :  { %vm2000_vm15 = vcmp.gt.f32.partialorder %v1983_v21, 0.0  ;;  %v2016_v29 = vmul.f32 0.2, %v1983_v21  ;;  %v10006_v11 = vpop.f32.mrb[66].mxu1 }
 0x310   :  { %v10013_v43 = vmul.f32 %v10006_v11, %v9541_v45  ;;  %v10015_v25 = vpop.f32.mrb[67].mxu1  ;;  %v2067_v27 = vmax.f32 %v9999_v22, %v10001_v23  ;;  %v2031_v7 = vsel %vm1999_vm14, %v1981_v38, %v2015_v5 }
 0x311   :  { %12001 = vst [vmem:[#allocation26_spill] sm:$0xff] %v10015_v25  ;;  %v10021_v15 = vmul.f32 %v10015_v25, %v9538_v44  ;;  %v2032_v26 = vsel %vm2000_vm15, %v1983_v21, %v2016_v29  ;;  %v10023_v42 = vadd.f32 %v2031_v7, %v90_v28 }
 0x312   :  { %2068 = vmax.xlane.f32.xlu1 %v2067_v27  ;;  %v10025_v6 = vadd.f32 %v2032_v26, %v91_v13 }
 0x313   :  { %v10029_v8 = vpop.f32.mrb[68].mxu1 }
 0x314   :  { %12002 = vst [vmem:[#allocation27_spill] sm:$0xff] %v10029_v8  ;;  %v10033_v53 = vmul.f32 %v10029_v8, %v9562_v63  ;;  %v10035_v38 = vpop.f32.mrb[69].mxu1  ;;  %v2070_v5 = vmax.f32 %v10023_v42, %v10025_v6 }
 0x315   :  { %12003 = vst [vmem:[#allocation28_spill] sm:$0xff] %v10035_v38  ;;  %v10041_v28 = vmul.f32 %v10035_v38, %v9559_v61 }
 0x316   :  { %2071 = vmax.xlane.f32.xlu1 %v2070_v5 }
 0x317   :  { %v10045_v29 = vpop.f32.mrb[70].mxu1 }
 0x318   :  { %12004 = vst [vmem:[#allocation29_spill] sm:$0xff] %v10045_v29  ;;  %v10049_v13 = vmul.f32 %v10045_v29, %v9577_v16  ;;  %v10051_v27 = vpop.f32.mrb[71].mxu1 }
 0x319   :  { %12005 = vst [vmem:[#allocation30_spill] sm:$0xff] %v10051_v27  ;;  %v10055_v7 = vmul.f32 %v10051_v27, %v9574_v14 }
 0x31b   :  { %v10059_v49 = vpop.f32.mrb[72].mxu1 }
 0x31c   :  { %12006 = vst [vmem:[#allocation31_spill] sm:$0xff] %v10059_v49  ;;  %v10063_v5 = vmul.f32 %v10059_v49, %v9595_v37  ;;  %v10065_v21 = vpop.f32.mrb[73].mxu1 }
 0x31d   :  { %12007 = vst [vmem:[#allocation32_spill] sm:$0xff] %v10065_v21  ;;  %v10069_v57 = vmul.f32 %v10065_v21, %v9589_v33 }
 0x31f   :  { %v10073_v4 = vpop.f32.mrb[74].mxu1 }
 0x320   :  { %12008 = vst [vmem:[#allocation33_spill] sm:$0xff] %v10073_v4  ;;  %v10077_v26 = vmul.f32 %v10073_v4, %v9541_v45  ;;  %v10079_v58 = vpop.f32.mrb[75].mxu1 }
 0x321   :  { %12009 = vst [vmem:[#allocation34_spill] sm:$0xff] %v10079_v58  ;;  %v10083_v60 = vmul.f32 %v10079_v58, %v9538_v44 }
 0x323   :  { %v10087_v55 = vpop.f32.mrb[76].mxu1 }
 0x324   :  { %12010 = vst [vmem:[#allocation35_spill] sm:$0xff] %v10087_v55  ;;  %v10091_v9 = vmul.f32 %v10087_v55, %v9562_v63  ;;  %v10093_v54 = vpop.f32.mrb[77].mxu1 }
 0x325   :  { %12011 = vst [vmem:[#allocation36_spill] sm:$0xff] %v10093_v54  ;;  %v10097_v2 = vmul.f32 %v10093_v54, %v9559_v61 }
 0x327   :  { %v10101_v1 = vpop.f32.mrb[78].mxu1 }
 0x328   :  { %12012 = vst [vmem:[#allocation37_spill] sm:$0xff] %v10101_v1  ;;  %v10105_v3 = vmul.f32 %v10101_v1, %v9577_v16  ;;  %v10107_v59 = vpop.f32.mrb[79].mxu1 }
 0x329   :  { %12013 = vst [vmem:[#allocation38_spill] sm:$0xff] %v10107_v59  ;;  %v10111_v62 = vmul.f32 %v10107_v59, %v9574_v14 }
 0x32b   :  { %v10115_v56 = vpop.f32.mrb[80].mxu1 }
 0x32c   :  { %12014 = vst [vmem:[#allocation39_spill] sm:$0xff] %v10115_v56  ;;  %v10119_v0 = vmul.f32 %v10115_v56, %v9595_v37  ;;  %v10121_v39 = vpop.f32.mrb[81].mxu1 }
 0x32d   :  { %12015 = vst [vmem:[#allocation40_spill] sm:$0xff] %v10121_v39  ;;  %v10125_v41 = vmul.f32 %v10121_v39, %v9589_v33 }
 0x32f   :  { %v10129_v51 = vpop.f32.mrb[82].mxu1 }
 0x330   :  { %v2567_v52 = vmul.f32 %v10129_v51, %v9541_v45  ;;  %v10133_v47 = vpop.f32.mrb[83].mxu1 }
 0x331   :  { %12016 = vst [vmem:[#allocation41_spill] sm:$0xff] %v10133_v47  ;;  %v2566_v21 = vmul.f32 %v10133_v47, %v9538_v44 }
 0x333   :  { %v8149_v56 = vpack.c.bf16 %v2567_v52, %v2566_v21  ;;  %v10137_v49 = vpop.f32.mrb[84].mxu1 }
 0x334   :  { %12017 = vst [vmem:[#allocation42_spill] sm:$0xff] %v10137_v49  ;;  %v10141_v39 = vmul.f32 %v10137_v49, %v9562_v63  ;;  %v10143_v59 = vpop.f32.mrb[85].mxu1 }
 0x335   :  { %12018 = vst [vmem:[#allocation43_spill] sm:$0xff] %v10143_v59  ;;  %v10147_v50 = vmul.f32 %v10143_v59, %v9559_v61  ;;  %8150 = vmatprep.subr.bf16.mxu0 %v8149_v56 }
 0x337   :  { %v10151_v1 = vpop.f32.mrb[86].mxu1 }
 0x338   :  { %12019 = vst [vmem:[#allocation44_spill] sm:$0xff] %v10151_v1  ;;  %v10155_v52 = vmul.f32 %v10151_v1, %v9577_v16  ;;  %v10157_v21 = vpop.f32.mrb[87].mxu1 }
 0x339   :  { %12020 = vst [vmem:[#allocation45_spill] sm:$0xff] %v10157_v21  ;;  %v10161_v29 = vmul.f32 %v10157_v21, %v9574_v14 }
 0x33b   :  { %v10165_v38 = vpop.f32.mrb[88].mxu1 }
 0x33c   :  { %12021 = vst [vmem:[#allocation46_spill] sm:$0xff] %v10165_v38  ;;  %v10169_v56 = vmul.f32 %v10165_v38, %v9595_v37  ;;  %v10171_v27 = vpop.f32.mrb[89].mxu1 }
 0x33d   :  { %12022 = vst [vmem:[#allocation47_spill] sm:$0xff] %v10171_v27  ;;  %v10175_v1 = vmul.f32 %v10171_v27, %v9589_v33 }
 0x33f   :  { %v10179_v21 = vpop.f32.mrb[90].mxu1 }
 0x340   :  { %v10183_v54 = vmul.f32 %v10179_v21, %v9541_v45  ;;  %v10185_v55 = vpop.f32.mrb[91].mxu1 }
 0x341   :  { %12023 = vst [vmem:[#allocation48_spill] sm:$0xff] %v10185_v55  ;;  %v10189_v38 = vmul.f32 %v10185_v55, %v9538_v44 }
 0x343   :  { %v10193_v27 = vpop.f32.mrb[92].mxu1 }
 0x344   :  { %12024 = vst [vmem:[#allocation49_spill] sm:$0xff] %v10193_v27  ;;  %v10197_v59 = vmul.f32 %v10193_v27, %v9562_v63  ;;  %v10199_v49 = vpop.f32.mrb[93].mxu1 }
 0x345   :  { %12025 = vst [vmem:[#allocation50_spill] sm:$0xff] %v10199_v49  ;;  %v10203_v45 = vmul.f32 %v10199_v49, %v9559_v61 }
 0x347   :  { %v10207_v44 = vpop.f32.mrb[94].mxu1 }
 0x348   :  { %12026 = vst [vmem:[#allocation51_spill] sm:$0xff] %v10207_v44  ;;  %v10211_v8 = vmul.f32 %v10207_v44, %v9577_v16  ;;  %v10213_v36 = vpop.f32.mrb[95].mxu1 }
 0x349   :  { %12027 = vst [vmem:[#allocation52_spill] sm:$0xff] %v10213_v36  ;;  %v10217_v63 = vmul.f32 %v10213_v36, %v9574_v14 }
 0x34b   :  { %v10221_v61 = vpop.f32.mrb[96].mxu1 }
 0x34c   :  { %12028 = vst [vmem:[#allocation53_spill] sm:$0xff] %v10221_v61  ;;  %v10225_v48 = vmul.f32 %v10221_v61, %v9595_v37  ;;  %v10227_v49 = vpop.f32.mrb[97].mxu1 }
 0x34d   :  { %12029 = vst [vmem:[#allocation54_spill] sm:$0xff] %v10227_v49  ;;  %v10231_v16 = vmul.f32 %v10227_v49, %v9589_v33 }
 0x387   :  { %v2051_v14 = vpop.xlane.xlu1 %2050 }
 0x388   :  { %v2073_v36 = vsub.f32 %v9915_v31, %v2051_v14  ;;  %v2074_v27 = vsub.f32 %v9917_v34, %v2051_v14 }
 0x38a   :  { %v2089_v58 = vmul.f32 1.442695, %v2073_v36  ;;  %v2091_v55 = vmul.f32 1.442695, %v2074_v27 }
 0x38b   :  { %v2054_v25 = vpop.xlane.xlu1 %2053 }
 0x38c   :  { %8672 = vpow2.f32 %v2089_v58  ;;  %v2075_v37 = vsub.f32 %v9929_v12, %v2054_v25  ;;  %v2076_v61 = vsub.f32 %v9931_v17, %v2054_v25 }
 0x38d   :  { %8674 = vpow2.f32 %v2091_v55 }
 0x38e   :  { %v2093_v47 = vmul.f32 1.442695, %v2075_v37  ;;  %v2095_v33 = vmul.f32 1.442695, %v2076_v61  ;;  %v12031_v61 = vpack.c.bf16 %v10141_v39, %v10147_v50  ;;  %v12033_v39 = vpack.c.bf16 %v10155_v52, %v10161_v29 }
 0x38f   :  { %v2057_v49 = vpop.xlane.xlu0 %2056  ;;  %v12035_v29 = vpack.c.bf16 %v10169_v56, %v10175_v1  ;;  %v12037_v1 = vpack.c.bf16 %v10183_v54, %v10189_v38  ;;  %v12040_v54 = vpack.c.bf16 %v10091_v9, %v10097_v2  ;;  %v12044_v2 = vpack.c.bf16 %v10119_v0, %v10125_v41  ;;  %v2905_v41 = vld [vmem:[%s11838_s6 + $0x10] sm:$0xff]  ;;  %v2906_v0 = vld [vmem:[%s11838_s6 + $0x18] sm:$0xff]  ;;  %v2907_v9 = vld [vmem:[%s11838_s6 + $0x20] sm:$0xff] }
 0x390   :  { %8676 = vpow2.f32 %v2093_v47  ;;  %v2077_v44 = vsub.f32 %v9943_v30, %v2057_v49  ;;  %v2078_v4 = vsub.f32 %v9945_v35, %v2057_v49  ;;  %v12030_v49 = vpack.c.bf16 %v10013_v43, %v10021_v15 }
 0x391   :  { %8678 = vpow2.f32 %v2095_v33  ;;  %v12032_v33 = vpack.c.bf16 %v10033_v53, %v10041_v28  ;;  %v12034_v53 = vpack.c.bf16 %v10049_v13, %v10055_v7  ;;  %v12036_v13 = vpack.c.bf16 %v10063_v5, %v10069_v57 }
 0x392   :  { %v2097_v31 = vmul.f32 1.442695, %v2077_v44  ;;  %v2099_v34 = vmul.f32 1.442695, %v2078_v4  ;;  %v12041_v5 = vpack.c.bf16 %v10211_v8, %v10217_v63  ;;  %v2908_v8 = vld [vmem:[%s11838_s6 + $0x28] sm:$0xff] }
 0x393   :  { %v2060_v36 = vpop.xlane.xlu1 %2059  ;;  %v8189_v63 = vpack.c.bf16 %v2908_v8, %v2907_v9  ;;  %v2910_v9 = vld [vmem:[%s11838_s6 + $0x38] sm:$0xff] }
 0x394   :  { %8680 = vpow2.f32 %v2097_v31  ;;  %v2079_v58 = vsub.f32 %v9957_v19, %v2060_v36  ;;  %v2080_v12 = vsub.f32 %v9959_v20, %v2060_v36 }
 0x395   :  { %8682 = vpow2.f32 %v2099_v34 }
 0x396   :  { %v10243_v17 = vpop.eup %8672  ;;  %v2101_v55 = vmul.f32 1.442695, %v2079_v58  ;;  %v2103_v25 = vmul.f32 1.442695, %v2080_v12 }
 0x397   :  { %v10245_v27 = vpop.eup %8674  ;;  %v2063_v47 = vpop.xlane.xlu1 %2062 }
 0x398   :  { %8684 = vpow2.f32 %v2101_v55  ;;  %2185 = vmatprep.mubr.f32.mxu0 %v10245_v27  ;;  %v2081_v30 = vsub.f32 %v9971_v40, %v2063_v47  ;;  %v2082_v4 = vsub.f32 %v9973_v46, %v2063_v47  ;;  %v12039_v47 = vpack.c.bf16 %v10197_v59, %v10203_v45 }
 0x399   :  { %8686 = vpow2.f32 %v2103_v25  ;;  %2186 = vmatmul.mubr.f32.vlgmr.msra.gmra.mrb[56].mxu0 %v10243_v17  ;;  %v12043_v45 = vpack.c.bf16 %v10225_v48, %v10231_v16  ;;  %v2903_v48 = vld [vmem:[%s11838_s6] sm:$0xff] }
 0x39a   :  { %v10251_v35 = vpop.eup %8676  ;;  %v2105_v19 = vmul.f32 1.442695, %v2081_v30  ;;  %v2107_v20 = vmul.f32 1.442695, %v2082_v4  ;;  %8152 = vmatpush3.bf16.msra.mxu0 %v12030_v49 }
 0x39b   :  { %v10256_v44 = vpop.eup %8678  ;;  %8154 = vmatprep.subr.bf16.mxu0 %v12031_v61  ;;  %v2066_v40 = vpop.xlane.xlu1 %2065 }
 0x39c   :  { %8688 = vpow2.f32 %v2105_v19  ;;  %2190 = vmatprep.mubr.f32.mxu0 %v10256_v44  ;;  %v2083_v46 = vsub.f32 %v9985_v10, %v2066_v40  ;;  %v2084_v14 = vsub.f32 %v9987_v32, %v2066_v40 }
 0x39d   :  { %8690 = vpow2.f32 %v2107_v20  ;;  %2191 = vmatmul.mubr.f32.gmra.mrb[58].mxu0 %v10251_v35 }
 0x39e   :  { %v8681_v37 = vpop.eup %8680  ;;  %v2109_v43 = vmul.f32 1.442695, %v2083_v46  ;;  %v2111_v15 = vmul.f32 1.442695, %v2084_v14  ;;  %8156 = vmatpush3.bf16.msra.mxu0 %v12032_v33 }
 0x39f   :  { %v8683_v50 = vpop.eup %8682  ;;  %8158 = vmatprep.subr.bf16.mxu0 %v12033_v39  ;;  %v2069_v31 = vpop.xlane.xlu1 %2068 }
 0x3a0   :  { %8692 = vpow2.f32 %v2109_v43  ;;  %2195 = vmatprep.mubr.f32.mxu0 %v8683_v50  ;;  %v2085_v10 = vsub.f32 %v9999_v22, %v2069_v31  ;;  %v2086_v32 = vsub.f32 %v10001_v23, %v2069_v31 }
 0x3a1   :  { %8694 = vpow2.f32 %v2111_v15  ;;  %2196 = vmatmul.mubr.f32.gmra.mrb[60].mxu0 %v8681_v37 }
 0x3a2   :  { %v8685_v34 = vpop.eup %8684  ;;  %v2113_v36 = vmul.f32 1.442695, %v2085_v10  ;;  %v2115_v58 = vmul.f32 1.442695, %v2086_v32  ;;  %8160 = vmatpush3.bf16.msra.mxu0 %v12034_v53 }
 0x3a3   :  { %v8687_v28 = vpop.eup %8686  ;;  %8162 = vmatprep.subr.bf16.mxu0 %v12035_v29  ;;  %v2072_v52 = vpop.xlane.xlu1 %2071 }
 0x3a4   :  { %8696 = vpow2.f32 %v2113_v36  ;;  %2200 = vmatprep.mubr.f32.mxu0 %v8687_v28  ;;  %v2087_v22 = vsub.f32 %v10023_v42, %v2072_v52  ;;  %v2088_v23 = vsub.f32 %v10025_v6, %v2072_v52  ;;  %v12038_v6 = vpack.c.bf16 %v10077_v26, %v10083_v60 }
 0x3a5   :  { %8698 = vpow2.f32 %v2115_v58  ;;  %2201 = vmatmul.mubr.f32.gmra.mrb[62].mxu0 %v8685_v34  ;;  %v12042_v26 = vpack.c.bf16 %v10105_v3, %v10111_v62  ;;  %v8185_v3 = vpack.c.bf16 %v2906_v0, %v2905_v41 }
 0x3a6   :  { %v8689_v12 = vpop.eup %8688  ;;  %v2117_v55 = vmul.f32 1.442695, %v2087_v22  ;;  %v2119_v25 = vmul.f32 1.442695, %v2088_v23  ;;  %8164 = vmatpush3.bf16.msra.mxu0 %v12036_v13 }
 0x3a7   :  { %v8691_v7 = vpop.eup %8690  ;;  %8166 = vmatprep.subr.bf16.mxu0 %v12037_v1 }
 0x3a8   :  { %8700 = vpow2.f32 %v2117_v55  ;;  %2205 = vmatprep.mubr.f32.mxu0 %v8691_v7 }
 0x3a9   :  { %8702 = vpow2.f32 %v2119_v25  ;;  %2206 = vmatmul.mubr.f32.gmra.mrb[64].mxu0 %v8689_v12 }
 0x3aa   :  { %v8693_v42 = vpop.eup %8692  ;;  %8168 = vmatpush3.bf16.msra.mxu0 %v12038_v6 }
 0x3ab   :  { %v8695_v56 = vpop.eup %8694  ;;  %8170 = vmatprep.subr.bf16.mxu0 %v12039_v47 }
 0x3ac   :  { %2210 = vmatprep.mubr.f32.mxu0 %v8695_v56 }
 0x3ad   :  { %2211 = vmatmul.mubr.f32.gmra.mrb[66].mxu0 %v8693_v42 }
 0x3ae   :  { %v8697_v57 = vpop.eup %8696  ;;  %8172 = vmatpush3.bf16.msra.mxu0 %v12040_v54 }
 0x3af   :  { %v8699_v38 = vpop.eup %8698  ;;  %8174 = vmatprep.subr.bf16.mxu0 %v12041_v5 }
 0x3b0   :  { %2215 = vmatprep.mubr.f32.mxu0 %v8699_v38 }
 0x3b1   :  { %2216 = vmatmul.mubr.f32.gmra.mrb[68].mxu0 %v8697_v57 }
 0x3b2   :  { %v8701_v60 = vpop.eup %8700  ;;  %8176 = vmatpush3.bf16.msra.mxu0 %v12042_v26 }
 0x3b3   :  { %v8703_v59 = vpop.eup %8702  ;;  %8178 = vmatprep.subr.bf16.mxu0 %v12043_v45 }
 0x3b4   :  { %2220 = vmatprep.mubr.f32.mxu0 %v8703_v59 }
 0x3b5   :  { %2221 = vmatmul.mubr.f32.gmra.mrb[70].mxu0 %v8701_v60 }
 0x3b6   :  { %8180 = vmatpush3.bf16.msra.mxu0 %v12044_v2  ;;  %2646 = vmatprep.mubr.f32.mxu0 %v10245_v27 }
 0x3b7   :  { %7697 = vmatprep.subr.msk.mxu0 %vm1867_vm3, %v9618_v18 }
 0x3b9   :  { %2647 = vmatmul.mubr.f32.vlgmr.msra.gmra.mrb[72].mxu0 %v10243_v17 }
 0x3ba   :  { %2651 = vmatprep.mubr.f32.mxu0 %v10256_v44  ;;  %7698 = vmatpush3.msk.msra.mxu0 %vm1867_vm3, %v9618_v18  ;;  %v2904_v18 = vld [vmem:[%s11838_s6 + $0x8] sm:$0xff] }
 0x3bb   :  { %v8181_v62 = vpack.c.bf16 %v2904_v18, %v2903_v48 }
 0x3bd   :  { %2652 = vmatmul.mubr.f32.gmra.mrb[74].mxu0 %v10251_v35  ;;  %8182 = vmatprep.subr.bf16.mxu1 %v8181_v62 }
 0x3be   :  { %2656 = vmatprep.mubr.f32.mxu0 %v8683_v50  ;;  %8184 = vmatpush3.bf16.msra.mxu1 %v8181_v62 }
 0x3bf   :  { %8186 = vmatprep.subr.bf16.mxu1 %v8185_v3 }
 0x3c1   :  { %2657 = vmatmul.mubr.f32.gmra.mrb[76].mxu0 %v8681_v37 }
 0x3c2   :  { %2661 = vmatprep.mubr.f32.mxu0 %v8687_v28  ;;  %8188 = vmatpush3.bf16.msra.mxu1 %v8185_v3  ;;  %v2909_v3 = vld [vmem:[%s11838_s6 + $0x30] sm:$0xff] }
 0x3c3   :  { %8190 = vmatprep.subr.bf16.mxu1 %v8189_v63  ;;  %v8193_v8 = vpack.c.bf16 %v2910_v9, %v2909_v3 }
 0x3c5   :  { %2662 = vmatmul.mubr.f32.gmra.mrb[78].mxu0 %v8685_v34 }
 0x3c6   :  { %2666 = vmatprep.mubr.f32.mxu0 %v8691_v7  ;;  %8192 = vmatpush3.bf16.msra.mxu1 %v8189_v63  ;;  %v12045_v63 = vmov 0.0|0.0  }
 0x3c7   :  { %8194 = vmatprep.subr.bf16.mxu1 %v8193_v8 }
 0x3c9   :  { %2667 = vmatmul.mubr.f32.gmra.mrb[80].mxu0 %v8689_v12 }
 0x3ca   :  { %2671 = vmatprep.mubr.f32.mxu0 %v8695_v56  ;;  %8196 = vmatpush3.bf16.msra.mxu1 %v8193_v8 }
 0x3cb   :  { %8213 = vmatprep.subr.bf16.mxu1 %v12045_v63 }
 0x3cd   :  { %2672 = vmatmul.mubr.f32.gmra.mrb[82].mxu0 %v8693_v42 }
 0x3ce   :  { %2676 = vmatprep.mubr.f32.mxu0 %v8699_v38 }
 0x3d1   :  { %2677 = vmatmul.mubr.f32.gmra.mrb[84].mxu0 %v8697_v57 }
 0x3d2   :  { %2681 = vmatprep.mubr.f32.mxu0 %v8703_v59 }
 0x3d5   :  { %2682 = vmatmul.mubr.f32.gmra.mrb[86].mxu0 %v8701_v60 }
 0x46c   :  { %v7036_v16 = vpop.f32.mrb[56].mxu0 }
 0x46d   :  { %v7037_v17 = vpop.f32.mrb[57].mxu0 }
 0x46e   :  { %v7038_v27 = vadd.f32 %v7037_v17, %v7036_v16  ;;  %v2912_v16 = vld [vmem:[%s11839_s8] sm:$0xff]  ;;  %v2913_v17 = vld [vmem:[%s11839_s8 + $0x8] sm:$0xff] }
 0x470   :  { %8704 = vrcp.f32 %v7038_v27  ;;  %v7039_v30 = vpop.f32.mrb[58].mxu0  ;;  %v2914_v27 = vld [vmem:[%s11839_s8 + $0x10] sm:$0xff] }
 0x471   :  { %v7040_v4 = vpop.f32.mrb[59].mxu0 }
 0x472   :  { %v7041_v35 = vadd.f32 %v7040_v4, %v7039_v30  ;;  %v8197_v30 = vpack.c.bf16 %v2913_v17, %v2912_v16  ;;  %v2915_v4 = vld [vmem:[%s11839_s8 + $0x18] sm:$0xff] }
 0x474   :  { %8706 = vrcp.f32 %v7041_v35  ;;  %v7042_v19 = vpop.f32.mrb[60].mxu0  ;;  %v8201_v35 = vpack.c.bf16 %v2915_v4, %v2914_v27  ;;  %8198 = vmatprep.subr.bf16.mxu0 %v8197_v30 }
 0x475   :  { %v7043_v20 = vpop.f32.mrb[61].mxu0 }
 0x476   :  { %v7044_v49 = vadd.f32 %v7043_v20, %v7042_v19  ;;  %v2916_v19 = vld [vmem:[%s11839_s8 + $0x20] sm:$0xff]  ;;  %v2917_v20 = vld [vmem:[%s11839_s8 + $0x28] sm:$0xff] }
 0x478   :  { %8708 = vrcp.f32 %v7044_v49  ;;  %v7045_v44 = vpop.f32.mrb[62].mxu0  ;;  %v8205_v49 = vpack.c.bf16 %v2917_v20, %v2916_v19 }
 0x479   :  { %v7046_v61 = vpop.f32.mrb[63].mxu0 }
 0x47a   :  { %v8705_v40 = vpop.eup %8704  ;;  %v7047_v46 = vadd.f32 %v7046_v61, %v7045_v44  ;;  %v2918_v44 = vld [vmem:[%s11839_s8 + $0x30] sm:$0xff]  ;;  %v2919_v61 = vld [vmem:[%s11839_s8 + $0x38] sm:$0xff] }
 0x47b   :  { %7699 = vmatprep.mubr.msk.f32.mxu0 %vm1842_vm4, %v8705_v40  ;;  %v8209_v40 = vpack.c.bf16 %v2919_v61, %v2918_v44 }
 0x47c   :  { %8710 = vrcp.f32 %v7047_v46  ;;  %v7048_v14 = vpop.f32.mrb[64].mxu0 }
 0x47d   :  { %v7049_v37 = vpop.f32.mrb[65].mxu0 }
 0x47e   :  { %v8707_v43 = vpop.eup %8706  ;;  %v7050_v15 = vadd.f32 %v7049_v37, %v7048_v14  ;;  %v6556_v14 = vld [vmem:[%s11840_s5] ss:$0 sm:$0xff] }
 0x47f   :  { %7700 = vmatmul.mubr.msk.f32.vlgmr.msra.gmra.mrb[88].mxu0 %vm1842_vm4, %v8707_v43 }
 0x480   :  { %8712 = vrcp.f32 %v7050_v15  ;;  %v7051_v33 = vpop.f32.mrb[66].mxu0  ;;  %8200 = vmatpush3.bf16.msra.mxu0 %v8197_v30 }
 0x481   :  { %v7052_v50 = vpop.f32.mrb[67].mxu0  ;;  %8202 = vmatprep.subr.bf16.mxu0 %v8201_v35 }
 0x482   :  { %v8709_v39 = vpop.eup %8708  ;;  %v7053_v31 = vadd.f32 %v7052_v50, %v7051_v33 }
 0x483   :  { %7702 = vmatprep.mubr.msk.f32.mxu0 %vm1842_vm4, %v8709_v39 }
 0x484   :  { %8714 = vrcp.f32 %v7053_v31  ;;  %v7054_v10 = vpop.f32.mrb[68].mxu0  ;;  %8204 = vmatpush3.bf16.msra.mxu0 %v8201_v35 }
 0x485   :  { %v7055_v32 = vpop.f32.mrb[69].mxu0  ;;  %8206 = vmatprep.subr.bf16.mxu0 %v8205_v49 }
 0x486   :  { %v8711_v34 = vpop.eup %8710  ;;  %v7056_v36 = vadd.f32 %v7055_v32, %v7054_v10 }
 0x487   :  { %7703 = vmatmul.mubr.msk.f32.gmra.mrb[90].mxu0 %vm1842_vm4, %v8711_v34 }
 0x488   :  { %8716 = vrcp.f32 %v7056_v36  ;;  %v7057_v58 = vpop.f32.mrb[70].mxu0  ;;  %8208 = vmatpush3.bf16.msra.mxu0 %v8205_v49 }
 0x489   :  { %v7058_v53 = vpop.f32.mrb[71].mxu0  ;;  %8210 = vmatprep.subr.bf16.mxu0 %v8209_v40 }
 0x48a   :  { %v8713_v28 = vpop.eup %8712  ;;  %v7059_v29 = vadd.f32 %v7058_v53, %v7057_v58 }
 0x48b   :  { %7705 = vmatprep.mubr.msk.f32.mxu0 %vm1842_vm4, %v8713_v28 }
 0x48c   :  { %8718 = vrcp.f32 %v7059_v29  ;;  %v7125_v52 = vpop.f32.mrb[72].mxu0  ;;  %8212 = vmatpush3.bf16.msra.mxu0 %v8209_v40 }
 0x48d   :  { %v7126_v22 = vpop.f32.mrb[73].mxu0  ;;  %6590 = vmatprep.subr.msk.mxu0 %vm1867_vm3, %v9599_v24 }
 0x48e   :  { %v8715_v23 = vpop.eup %8714  ;;  %v7127_v12 = vadd.f32 %v7126_v22, %v7125_v52 }
 0x48f   :  { %7706 = vmatmul.mubr.msk.f32.gmra.mrb[92].mxu0 %vm1842_vm4, %v8715_v23 }
 0x490   :  { %v7128_v55 = vpop.f32.mrb[74].mxu0 }
 0x491   :  { %v7129_v25 = vpop.f32.mrb[75].mxu0 }
 0x492   :  { %v8717_v13 = vpop.eup %8716  ;;  %v7130_v7 = vadd.f32 %v7129_v25, %v7128_v55 }
 0x493   :  { %7708 = vmatprep.mubr.msk.f32.mxu0 %vm1842_vm4, %v8717_v13 }
 0x494   :  { %v7131_v1 = vpop.f32.mrb[76].mxu0 }
 0x495   :  { %v7132_v42 = vpop.f32.mrb[77].mxu0 }
 0x496   :  { %v8719_v6 = vpop.eup %8718  ;;  %v7133_v56 = vadd.f32 %v7132_v42, %v7131_v1 }
 0x497   :  { %7709 = vmatmul.mubr.msk.f32.gmra.mrb[94].mxu0 %vm1842_vm4, %v8719_v6 }
 0x498   :  { %v7134_v47 = vpop.f32.mrb[78].mxu0 }
 0x499   :  { %v7135_v57 = vpop.f32.mrb[79].mxu0 }
 0x49a   :  { %v7136_v54 = vadd.f32 %v7135_v57, %v7134_v47 }
 0x49c   :  { %v7137_v38 = vpop.f32.mrb[80].mxu0 }
 0x49d   :  { %v7138_v5 = vpop.f32.mrb[81].mxu0 }
 0x49e   :  { %v10342_v60 = vadd.f32 %v7138_v5, %v7137_v38 }
 0x4a0   :  { %v7140_v26 = vpop.f32.mrb[82].mxu0 }
 0x4a1   :  { %v7141_v59 = vpop.f32.mrb[83].mxu0 }
 0x4a2   :  { %v7142_v45 = vadd.f32 %v7141_v59, %v7140_v26 }
 0x4a4   :  { %v7143_v2 = vpop.f32.mrb[84].mxu0 }
 0x4a5   :  { %v7144_v48 = vpop.f32.mrb[85].mxu0 }
 0x4a6   :  { %v10344_v18 = vadd.f32 %v7144_v48, %v7143_v2 }
 0x4a8   :  { %v7146_v41 = vpop.f32.mrb[86].mxu0 }
 0x4a9   :  { %v7147_v62 = vpop.f32.mrb[87].mxu0 }
 0x4aa   :  { %v10346_v0 = vadd.f32 %v7147_v62, %v7146_v41 }
 0x552   :  { %v7701_v46 = vpop.f32.mrb[88].mxu0 }
 0x553   :  { %v2833_v37 = vmul.f32 %v7701_v46, %v7130_v7  ;;  %v2793_v43 = vpop.f32.mrb[89].mxu0 }
 0x554   :  { %v2832_v15 = vmul.f32 %v7127_v12, %v2793_v43 }
 0x555   :  { %v2848_v33 = vadd.f32 %v6556_v14, %v2833_v37 }
 0x556   :  { %v2847_v50 = vadd.f32 %v6556_v14, %v2832_v15 }
 0x557   :  { %v2864_v39 = vmin.f32 %v2848_v33, 0.0  ;;  %vm2856_vm7 = vcmp.gt.f32.partialorder %v2848_v33, 0.0 }
 0x558   :  { %v2863_v31 = vmin.f32 %v2847_v50, 0.0  ;;  %vm2855_vm6 = vcmp.gt.f32.partialorder %v2847_v50, 0.0 }
 0x559   :  { %v2873_v10 = vmul.f32 1.442695, %v2864_v39 }
 0x55a   :  { %v2871_v32 = vmul.f32 1.442695, %v2863_v31  ;;  %v7704_v34 = vpop.f32.mrb[90].mxu0 }
 0x55b   :  { %8720 = vpow2.f32 %v2873_v10  ;;  %v2835_v36 = vmul.f32 %v7704_v34, %v7136_v54  ;;  %v2803_v58 = vpop.f32.mrb[91].mxu0  ;;  %v12047_v34 = vld [vmem:[#allocation33_spill] sm:$0xff] }
 0x55c   :  { %8722 = vpow2.f32 %v2871_v32  ;;  %v2834_v24 = vmul.f32 %v7133_v56, %v2803_v58 }
 0x55d   :  { %v2850_v53 = vadd.f32 %v6556_v14, %v2835_v36 }
 0x55e   :  { %v2849_v28 = vadd.f32 %v6556_v14, %v2834_v24  ;;  %v12048_v24 = vld [vmem:[#allocation41_spill] sm:$0xff] }
 0x55f   :  { %v2866_v29 = vmin.f32 %v2850_v53, 0.0  ;;  %vm2858_vm10 = vcmp.gt.f32.partialorder %v2850_v53, 0.0 }
 0x560   :  { %v2865_v52 = vmin.f32 %v2849_v28, 0.0  ;;  %vm2857_vm9 = vcmp.gt.f32.partialorder %v2849_v28, 0.0 }
 0x561   :  { %v2877_v22 = vmul.f32 1.442695, %v2866_v29 }
 0x562   :  { %v2875_v23 = vmul.f32 1.442695, %v2865_v52  ;;  %v7707_v55 = vpop.f32.mrb[92].mxu0  ;;  %v12050_v52 = vld [vmem:[#allocation48_spill] sm:$0xff] }
 0x563   :  { %8724 = vpow2.f32 %v2877_v22  ;;  %v2837_v12 = vmul.f32 %v7707_v55, %v7142_v45  ;;  %v2813_v25 = vpop.f32.mrb[93].mxu0 }
 0x564   :  { %8726 = vpow2.f32 %v2875_v23  ;;  %v2836_v13 = vmul.f32 %v10342_v60, %v2813_v25  ;;  %v12051_v23 = vld [vmem:[#allocation34_spill] sm:$0xff] }
 0x565   :  { %v8721_v7 = vpop.eup %8720  ;;  %v2852_v1 = vadd.f32 %v6556_v14, %v2837_v12  ;;  %v8912_v25 = vld [vmem:[%s11972_s26] sm:$0xff] }
 0x566   :  { %v8723_v42 = vpop.eup %8722  ;;  %v6558_v6 = vadd.f32 -1.0, %v8721_v7  ;;  %v2851_v47 = vadd.f32 %v6556_v14, %v2836_v13  ;;  %v12053_v7 = vld [vmem:[#allocation8_spill] sm:$0xff] }
 0x567   :  { %v2868_v57 = vmin.f32 %v2852_v1, 0.0  ;;  %v6557_v56 = vadd.f32 -1.0, %v8723_v42  ;;  %vm2860_vm12 = vcmp.gt.f32.partialorder %v2852_v1, 0.0 }
 0x568   :  { %v2867_v54 = vmin.f32 %v2851_v47, 0.0  ;;  %v2896_v26 = vsel %vm2856_vm7, %v2848_v33, %v6558_v6  ;;  %vm2859_vm11 = vcmp.gt.f32.partialorder %v2851_v47, 0.0  ;;  %v12046_v33 = vmov 0.0   ;;  %v12054_v6 = vld [vmem:[#allocation42_spill] sm:$0xff] }
 0x569   :  { %v2881_v38 = vmul.f32 1.442695, %v2868_v57  ;;  %v2895_v5 = vsel %vm2855_vm6, %v2847_v50, %v6557_v56  ;;  %v12055_v57 = vld [vmem:[#allocation27_spill] sm:$0xff] }
 0x56a   :  { %v2879_v59 = vmul.f32 1.442695, %v2867_v54  ;;  %v7710_v2 = vpop.f32.mrb[94].mxu0  ;;  %7727 = vmatprep.mubr.msk.f32.mxu1 %vm1582_vm1, %v2895_v5  ;;  %v12056_v54 = vld [vmem:[#allocation49_spill] sm:$0xff]  ;;  %v12057_v5 = vld [vmem:[#allocation35_spill] sm:$0xff] }
 0x56b   :  { %8728 = vpow2.f32 %v2881_v38  ;;  %v2839_v60 = vmul.f32 %v7710_v2, %v10346_v0  ;;  %v2823_v45 = vpop.f32.mrb[95].mxu0  ;;  %7728 = vmatmul.mubr.msk.f32.vlgmr.msra.gmra.mrb[98].mxu1 %vm1582_vm1, %v2896_v26  ;;  %v12058_v2 = vld [vmem:[#allocation43_spill] sm:$0xff] }
 0x56c   :  { %8730 = vpow2.f32 %v2879_v59  ;;  %v2838_v48 = vmul.f32 %v10344_v18, %v2823_v45  ;;  %v12059_v45 = vld [vmem:[#allocation28_spill] sm:$0xff] }
 0x56d   :  { %v8725_v41 = vpop.eup %8724  ;;  %v2854_v62 = vadd.f32 %v6556_v14, %v2839_v60 }
 0x56e   :  { %v8727_v3 = vpop.eup %8726  ;;  %v2853_v9 = vadd.f32 %v6556_v14, %v2838_v48  ;;  %v6560_v8 = vadd.f32 -1.0, %v8725_v41  ;;  %v12060_v41 = vld [vmem:[#allocation50_spill] sm:$0xff] }
 0x56f   :  { %v2870_v16 = vmin.f32 %v2854_v62, 0.0  ;;  %v6559_v17 = vadd.f32 -1.0, %v8727_v3  ;;  %vm2862_vm14 = vcmp.gt.f32.partialorder %v2854_v62, 0.0  ;;  %v12061_v3 = vld [vmem:[#allocation36_spill] sm:$0xff] }
 0x570   :  { %v2869_v27 = vmin.f32 %v2853_v9, 0.0  ;;  %v2898_v0 = vsel %vm2858_vm10, %v2850_v53, %v6560_v8  ;;  %vm2861_vm13 = vcmp.gt.f32.partialorder %v2853_v9, 0.0 }
 0x571   :  { %v2885_v30 = vmul.f32 1.442695, %v2870_v16  ;;  %v2897_v4 = vsel %vm2857_vm9, %v2849_v28, %v6559_v17  ;;  %v12049_v28 = vld [vmem:[#allocation26_spill] sm:$0xff] }
 0x572   :  { %v2883_v35 = vmul.f32 1.442695, %v2869_v27  ;;  %7730 = vmatprep.mubr.msk.f32.mxu1 %vm1582_vm1, %v2897_v4 }
 0x573   :  { %8732 = vpow2.f32 %v2885_v30  ;;  %7731 = vmatmul.mubr.msk.f32.gmra.mrb[100].mxu1 %vm1582_vm1, %v2898_v0 }
 0x574   :  { %8734 = vpow2.f32 %v2883_v35  ;;  %v12062_v35 = vld [vmem:[#allocation44_spill] sm:$0xff] }
 0x575   :  { %v8729_v18 = vpop.eup %8728 }
 0x576   :  { %v8731_v19 = vpop.eup %8730  ;;  %v6562_v20 = vadd.f32 -1.0, %v8729_v18  ;;  %v12063_v18 = vld [vmem:[#allocation29_spill] sm:$0xff] }
 0x577   :  { %v6561_v49 = vadd.f32 -1.0, %v8731_v19 }
 0x578   :  { %v2900_v61 = vsel %vm2860_vm12, %v2852_v1, %v6562_v20  ;;  %v12064_v20 = vld [vmem:[#allocation51_spill] sm:$0xff] }
 0x579   :  { %v2899_v44 = vsel %vm2859_vm11, %v2851_v47, %v6561_v49 }
 0x57a   :  { %7733 = vmatprep.mubr.msk.f32.mxu1 %vm1582_vm1, %v2899_v44  ;;  %v12065_v44 = vld [vmem:[#allocation37_spill] sm:$0xff] }
 0x57b   :  { %7734 = vmatmul.mubr.msk.f32.gmra.mrb[102].mxu1 %vm1582_vm1, %v2900_v61 }
 0x57d   :  { %v8733_v40 = vpop.eup %8732 }
 0x57e   :  { %v8735_v46 = vpop.eup %8734  ;;  %v6564_v14 = vadd.f32 -1.0, %v8733_v40 }
 0x57f   :  { %v6563_v37 = vadd.f32 -1.0, %v8735_v46  ;;  %v12066_v46 = vld [vmem:[#allocation45_spill] sm:$0xff] }
 0x580   :  { %v2902_v15 = vsel %vm2862_vm14, %v2854_v62, %v6564_v14 }
 0x581   :  { %v2901_v43 = vsel %vm2861_vm13, %v2853_v9, %v6563_v37  ;;  %v12067_v37 = vld [vmem:[#allocation30_spill] sm:$0xff] }
 0x582   :  { %7736 = vmatprep.mubr.msk.f32.mxu1 %vm1582_vm1, %v2901_v43 }
 0x583   :  { %7737 = vmatmul.mubr.msk.f32.gmra.mrb[104].mxu1 %vm1582_vm1, %v2902_v15  ;;  %v12068_v15 = vld [vmem:[#allocation52_spill] sm:$0xff] }
 0x584   :  { %7783 = vmatprep.mubr.msk.f32.mxu1 %vm8947_vm0, %v12046_v33 }
 0x63e   :  { %v7729_v50 = vpop.f32.mrb[98].mxu1 }
 0x63f   :  { %v3010_v39 = vpop.f32.mrb[99].mxu1  ;;  %v3694_v31 = vmul.f32 %v7729_v50, %v10129_v51  ;;  %v3678_v10 = vmul.f32 %v7729_v50, %v10006_v11  ;;  %v3702_v32 = vmul.f32 %v7729_v50, %v10179_v21  ;;  %v3686_v36 = vmul.f32 %v7729_v50, %v12047_v34 }
 0x640   :  { %v8214_v58 = vpack.c.bf16 %v7729_v50, %v3010_v39  ;;  %7755 = vmatprep.mubr.msk.f32.mxu0 %vm1582_vm1, %v3010_v39  ;;  %v3693_v53 = vmul.f32 %v3010_v39, %v12048_v24  ;;  %v3677_v29 = vmul.f32 %v3010_v39, %v12049_v28  ;;  %v3701_v22 = vmul.f32 %v3010_v39, %v12050_v52 }
 0x641   :  { %7756 = vmatmul.mubr.msk.f32.vlgmr.msra.gmra.mrb[96].mxu0 %vm1582_vm1, %v7729_v50  ;;  %v3685_v55 = vmul.f32 %v3010_v39, %v12051_v23  ;;  %v12069_v39 = vld [vmem:[#allocation38_spill] sm:$0xff] }
 0x642   :  { %8216 = vmatpush3.bf16.xpose.msk.msra.mxu1 %vm9547_vm2, %v8214_v58  ;;  %v10409_v11 = vpack.c.bf16 %v3694_v31, %v3693_v53  ;;  %v10411_v21 = vpack.c.bf16 %v3678_v10, %v3677_v29  ;;  %v10413_v12 = vpack.c.bf16 %v3702_v32, %v3701_v22  ;;  %6591 = vmatpush1.msk.msra.mxu0 %vm1867_vm3, %v8912_v25  ;;  %v12070_v53 = vld [vmem:[#allocation46_spill] sm:$0xff]  ;;  %v12071_v29 = vld [vmem:[#allocation31_spill] sm:$0xff]  ;;  %v12072_v22 = vld [vmem:[#allocation53_spill] sm:$0xff] }
 0x643   :  { %8217 = vmatprep.subr.bf16.mxu1 %v12045_v63  ;;  %v10420_v13 = vpack.c.bf16 %v3686_v36, %v3685_v55  ;;  %8230 = vmatprep.subr.bf16.mxu0 %v12053_v7  ;;  %v12073_v55 = vld [vmem:[#allocation39_spill] sm:$0xff] }
 0x646   :  { %v7732_v1 = vpop.f32.mrb[100].mxu1 }
 0x647   :  { %v3020_v42 = vpop.f32.mrb[101].mxu1  ;;  %v3696_v47 = vmul.f32 %v7732_v1, %v12054_v6  ;;  %v3680_v56 = vmul.f32 %v7732_v1, %v12055_v57  ;;  %v3704_v38 = vmul.f32 %v7732_v1, %v12056_v54  ;;  %v3688_v26 = vmul.f32 %v7732_v1, %v12057_v5  ;;  %v12075_v6 = vld [vmem:[#allocation32_spill] sm:$0xff]  ;;  %v12076_v57 = vld [vmem:[#allocation54_spill] sm:$0xff] }
 0x648   :  { %v8218_v59 = vpack.c.bf16 %v7732_v1, %v3020_v42  ;;  %7758 = vmatprep.mubr.msk.f32.mxu0 %vm1582_vm1, %v3020_v42  ;;  %v3695_v60 = vmul.f32 %v3020_v42, %v12058_v2  ;;  %v3679_v48 = vmul.f32 %v3020_v42, %v12059_v45  ;;  %v3703_v62 = vmul.f32 %v3020_v42, %v12060_v41  ;;  %v12077_v54 = vld [vmem:[#allocation40_spill] sm:$0xff]  ;;  %v12079_v41 = vld [vmem:[#allocation10_spill] sm:$0xff] }
 0x649   :  { %7759 = vmatmul.mubr.msk.f32.gmra.mrb[98].mxu0 %vm1582_vm1, %v7732_v1  ;;  %v3687_v9 = vmul.f32 %v3020_v42, %v12061_v3  ;;  %v12074_v1 = vld [vmem:[#allocation47_spill] sm:$0xff] }
 0x64a   :  { %8220 = vmatpush3.bf16.xpose.msk.msra.mxu1 %vm9547_vm2, %v8218_v59  ;;  %v10435_v8 = vpack.c.bf16 %v3696_v47, %v3695_v60  ;;  %v10437_v16 = vpack.c.bf16 %v3680_v56, %v3679_v48  ;;  %v10439_v17 = vpack.c.bf16 %v3704_v38, %v3703_v62  ;;  %v2911_v60 = vld [vmem:[%s11841_s7] sm:$0xf]  ;;  %v12080_v62 = vld [vmem:[#allocation9_spill] sm:$0xff] }
 0x64b   :  { %8221 = vmatprep.subr.bf16.mxu1 %v12045_v63  ;;  %v10442_v27 = vpack.c.bf16 %v3688_v26, %v3687_v9  ;;  %v12078_v48 = vld [vmem:[#allocation7_spill] sm:$0xff]  ;;  %v12081_v9 = vld [vmem:[#allocation12_spill] sm:$0xff] }
 0x64e   :  { %v7735_v30 = vpop.f32.mrb[102].mxu1 }
 0x64f   :  { %v3030_v4 = vpop.f32.mrb[103].mxu1  ;;  %v3698_v0 = vmul.f32 %v7735_v30, %v12062_v35  ;;  %v3682_v19 = vmul.f32 %v7735_v30, %v12063_v18  ;;  %v3706_v49 = vmul.f32 %v7735_v30, %v12064_v20  ;;  %v3690_v61 = vmul.f32 %v7735_v30, %v12065_v44  ;;  %v12083_v35 = vld [vmem:[#allocation14_spill] sm:$0xff] }
 0x650   :  { %v8222_v40 = vpack.c.bf16 %v7735_v30, %v3030_v4  ;;  %7761 = vmatprep.mubr.msk.f32.mxu0 %vm1582_vm1, %v3030_v4  ;;  %v3697_v14 = vmul.f32 %v3030_v4, %v12066_v46  ;;  %v3681_v43 = vmul.f32 %v3030_v4, %v12067_v37  ;;  %v3705_v50 = vmul.f32 %v3030_v4, %v12068_v15  ;;  %v12087_v44 = vld [vmem:[#allocation18_spill] sm:$0xff]  ;;  %v12089_v46 = vld [vmem:[#allocation20_spill] sm:$0xff]  ;;  %v12090_v37 = vld [vmem:[#allocation19_spill] sm:$0xff] }
 0x651   :  { %7762 = vmatmul.mubr.msk.f32.gmra.mrb[100].mxu0 %vm1582_vm1, %v7735_v30  ;;  %v3689_v31 = vmul.f32 %v3030_v4, %v12069_v39  ;;  %v12082_v4 = vld [vmem:[#allocation11_spill] sm:$0xff]  ;;  %v12092_v15 = vld [vmem:[#allocation21_spill] sm:$0xff] }
 0x652   :  { %8224 = vmatpush3.bf16.xpose.msk.msra.mxu1 %vm9547_vm2, %v8222_v40  ;;  %v10456_v10 = vpack.c.bf16 %v3698_v0, %v3697_v14  ;;  %v10458_v32 = vpack.c.bf16 %v3682_v19, %v3681_v43  ;;  %v10460_v34 = vpack.c.bf16 %v3706_v49, %v3705_v50  ;;  %v12084_v0 = vld [vmem:[#allocation13_spill] sm:$0xff]  ;;  %v12085_v19 = vld [vmem:[#allocation16_spill] sm:$0xff]  ;;  %v12086_v49 = vld [vmem:[#allocation15_spill] sm:$0xff] }
 0x653   :  { %8225 = vmatprep.subr.bf16.mxu1 %v12045_v63  ;;  %v10463_v36 = vpack.c.bf16 %v3690_v61, %v3689_v31  ;;  %v12088_v61 = vld [vmem:[#allocation17_spill] sm:$0xff]  ;;  %v12091_v43 = vld [vmem:[#allocation23_spill] sm:$0xff] }
 0x654   :  { %v12094_v31 = vld [vmem:[#allocation5_spill] sm:$0xff] }
 0x656   :  { %v7738_v58 = vpop.f32.mrb[104].mxu1 }
 0x657   :  { %v3040_v24 = vpop.f32.mrb[105].mxu1  ;;  %v3700_v28 = vmul.f32 %v7738_v58, %v12070_v53  ;;  %v3684_v52 = vmul.f32 %v7738_v58, %v12071_v29  ;;  %v3708_v23 = vmul.f32 %v7738_v58, %v12072_v22  ;;  %v3692_v25 = vmul.f32 %v7738_v58, %v12073_v55 }
 0x658   :  { %v8226_v7 = vpack.c.bf16 %v7738_v58, %v3040_v24  ;;  %7764 = vmatprep.mubr.msk.f32.mxu0 %vm1582_vm1, %v3040_v24  ;;  %v3699_v42 = vmul.f32 %v3040_v24, %v12074_v1  ;;  %v3683_v47 = vmul.f32 %v3040_v24, %v12075_v6  ;;  %v3707_v56 = vmul.f32 %v3040_v24, %v12076_v57  ;;  %v12097_v6 = vld [vmem:[#allocation25_spill] sm:$0xff] }
 0x659   :  { %7765 = vmatmul.mubr.msk.f32.gmra.mrb[102].mxu0 %vm1582_vm1, %v7738_v58  ;;  %v3691_v38 = vmul.f32 %v3040_v24, %v12077_v54 }
 0x65a   :  { %8228 = vmatpush3.bf16.xpose.msk.msra.mxu1 %vm9547_vm2, %v8226_v7  ;;  %v10477_v5 = vpack.c.bf16 %v3700_v28, %v3699_v42  ;;  %v10479_v26 = vpack.c.bf16 %v3684_v52, %v3683_v47  ;;  %v10481_v59 = vpack.c.bf16 %v3708_v23, %v3707_v56  ;;  %3387 = vmatprep.mubr.f32.mxu0 %v12046_v33  ;;  %v12096_v7 = vld [vmem:[#allocation24_spill] sm:$0xff] }
 0x65b   :  { %8481 = vmatprep.subr.bf16.mxu1 %v10409_v11  ;;  %v10485_v2 = vpack.c.bf16 %v3692_v25, %v3691_v38 }
 0x661   :  { %7784 = vmatmul.mubr.msk.f32.vlgmr.msra.gmra.mrb[106].mxu1 %vm1582_vm1, %v2911_v60 }
 0x662   :  { %8489 = vmatpush3.bf16.msra.mxu1 %v10411_v21 }
 0x663   :  { %8482 = vmatprep.subr.bf16.mxu1 %v10435_v8 }
 0x666   :  { %8490 = vmatpush3.bf16.msra.mxu1 %v10437_v16 }
 0x667   :  { %8483 = vmatprep.subr.bf16.mxu1 %v10456_v10 }
 0x66a   :  { %8491 = vmatpush3.bf16.msra.mxu1 %v10458_v32 }
 0x66b   :  { %8484 = vmatprep.subr.bf16.mxu1 %v10477_v5 }
 0x66e   :  { %8492 = vmatpush3.bf16.msra.mxu1 %v10479_v26 }
 0x66f   :  { %8485 = vmatprep.subr.bf16.mxu1 %v10413_v12 }
 0x672   :  { %8493 = vmatpush3.bf16.msra.mxu1 %v10420_v13 }
 0x673   :  { %8486 = vmatprep.subr.bf16.mxu1 %v10439_v17 }
 0x676   :  { %8494 = vmatpush3.bf16.msra.mxu1 %v10442_v27 }
 0x677   :  { %8487 = vmatprep.subr.bf16.mxu1 %v10460_v34 }
 0x67a   :  { %8495 = vmatpush3.bf16.msra.mxu1 %v10463_v36 }
 0x67b   :  { %8488 = vmatprep.subr.bf16.mxu1 %v10481_v59 }
 0x67e   :  { %8496 = vmatpush3.bf16.msra.mxu1 %v10485_v2 }
 0x714   :  { %v7757_v51 = vpop.f32.mrb[96].mxu0 }
 0x715   :  { %v3139_v45 = vpop.f32.mrb[97].mxu0 }
 0x716   :  { %6592 = vmatmul.mubr.msk.f32.vlgmr.msra.gmra.mrb[104].mxu0 %vm1842_vm4, %v3139_v45 }
 0x717   :  { %8232 = vmatpush3.bf16.msra.mxu0 %v12078_v48  ;;  %3393 = vmatprep.mubr.f32.mxu0 %v12046_v33 }
 0x718   :  { %8234 = vmatprep.subr.bf16.mxu0 %v12079_v41 }
 0x71a   :  { %6593 = vmatmul.mubr.msk.f32.gmra.mrb[106].mxu0 %vm1842_vm4, %v7757_v51 }
 0x71b   :  { %8236 = vmatpush3.bf16.msra.mxu0 %v12080_v62  ;;  %3399 = vmatprep.mubr.f32.mxu0 %v12046_v33 }
 0x71c   :  { %v7760_v3 = vpop.f32.mrb[98].mxu0  ;;  %8238 = vmatprep.subr.bf16.mxu0 %v12081_v9  ;;  %v8913_v9 = vld [vmem:[%s11837_s1] sm:$0xff] }
 0x71d   :  { %v3149_v30 = vpop.f32.mrb[99].mxu0 }
 0x71e   :  { %6594 = vmatmul.mubr.msk.f32.gmra.mrb[108].mxu0 %vm1842_vm4, %v3149_v30 }
 0x71f   :  { %8240 = vmatpush3.bf16.msra.mxu0 %v12082_v4  ;;  %3405 = vmatprep.mubr.f32.mxu0 %v12046_v33 }
 0x720   :  { %8242 = vmatprep.subr.bf16.mxu0 %v12083_v35  ;;  %v8914_v35 = vld [vmem:[%s11837_s1 + $0x8] sm:$0xff] }
 0x722   :  { %6595 = vmatmul.mubr.msk.f32.gmra.mrb[110].mxu0 %vm1842_vm4, %v7760_v3 }
 0x723   :  { %8244 = vmatpush3.bf16.msra.mxu0 %v12084_v0  ;;  %3411 = vmatprep.mubr.f32.mxu0 %v12046_v33 }
 0x724   :  { %v7763_v18 = vpop.f32.mrb[100].mxu0  ;;  %8246 = vmatprep.subr.bf16.mxu0 %v12085_v19 }
 0x725   :  { %v3159_v20 = vpop.f32.mrb[101].mxu0 }
 0x726   :  { %6596 = vmatmul.mubr.msk.f32.gmra.mrb[112].mxu0 %vm1842_vm4, %v3159_v20 }
 0x727   :  { %8248 = vmatpush3.bf16.msra.mxu0 %v12086_v49  ;;  %3417 = vmatprep.mubr.f32.mxu0 %v12046_v33 }
 0x728   :  { %8250 = vmatprep.subr.bf16.mxu0 %v12087_v44 }
 0x72a   :  { %6597 = vmatmul.mubr.msk.f32.gmra.mrb[114].mxu0 %vm1842_vm4, %v7763_v18 }
 0x72b   :  { %8252 = vmatpush3.bf16.msra.mxu0 %v12088_v61  ;;  %3423 = vmatprep.mubr.f32.mxu0 %v12046_v33 }
 0x72c   :  { %v7766_v40 = vpop.f32.mrb[102].mxu0  ;;  %8254 = vmatprep.subr.bf16.mxu0 %v12089_v46 }
 0x72d   :  { %v3169_v14 = vpop.f32.mrb[103].mxu0 }
 0x72e   :  { %6598 = vmatmul.mubr.msk.f32.gmra.mrb[116].mxu0 %vm1842_vm4, %v3169_v14  ;;  %v8915_v14 = vld [vmem:[%s11837_s1 + $0x18] sm:$0xff] }
 0x72f   :  { %8256 = vmatpush3.bf16.msra.mxu0 %v12090_v37  ;;  %3429 = vmatprep.mubr.f32.mxu0 %v12046_v33 }
 0x730   :  { %8258 = vmatprep.subr.bf16.mxu0 %v12091_v43 }
 0x732   :  { %6599 = vmatmul.mubr.msk.f32.gmra.mrb[118].mxu0 %vm1842_vm4, %v7766_v40 }
 0x733   :  { %8260 = vmatpush3.bf16.msra.mxu0 %v12092_v15  ;;  %v8916_v15 = vld [vmem:[%s11837_s1 + $0x20] sm:$0xff] }
 0x734   :  { %8262 = vmatprep.subr.bf16.mxu0 %v10409_v11  ;;  %v3247_v50 = vpop.f32.mrb[106].mxu1 }
 0x735   :  { %3251 = vst.msk [vmem:[#allocation2] sm:$0x1] %vm9658_vm5, %v3247_v50  ;;  %v3259_v58 = vrot.slane %v3247_v50, %v12094_v31  ;;  %v7785_v24 = vpop.f32.mrb[107].mxu1 }
 0x737   :  { %v3260_v53 = vcombine.high %v3259_v58, %v3259_v58  ;;  %v3267_v28 = vrot.slane %v3259_v58, %v12094_v31 }
 0x739   :  { %v3279_v29 = vcombine.high %v3267_v28, %v3267_v28  ;;  %v3274_v52 = vrot.slane %v3260_v53, %v12094_v31 }
 0x73b   :  { %3281 = vst.msk [vmem:[#allocation2 + $0x1] sm:$0x1] %vm9658_vm5, %v3279_v29  ;;  %3275 = vrot.lane.b32.xlu1 %v3274_v52, %s8950_s2  ;;  %v3282_v22 = vcombine.high %v3274_v52, %v3274_v52 }
 0x73d   :  { %3283 = vrot.lane.b32.xlu0 %v3282_v22, %s8950_s2 }
 0x7ad   :  { %v3276_v11 = vpop.permute.xlu1 %3275 }
 0x7ae   :  { %3278 = vst.msk [vmem:[#allocation2] sm:$0x1] %vm9881_vm8, %v3276_v11 }
 0x7af   :  { %v3284_v55 = vpop.permute.xlu0 %3283 }
 0x7b0   :  { %3286 = vst.msk [vmem:[#allocation2 + $0x1] sm:$0x1] %vm9881_vm8, %v3284_v55  ;;  %v8917_v55 = vld [vmem:[%s11837_s1 + $0x30] sm:$0xff] }
 0x7b7   :  { %v3287_v25 = vld [vmem:[#allocation2] sm:$0x3] }
 0x7b8   :  { %v10551_v1 = vrot.slane %v3287_v25, %v12096_v7  ;;  %v10554_v47 = vrot.slane %v3287_v25, %v12097_v6 }
 0x7e9   :  { %v3389_v42 = vpop.f32.mrb[104].mxu0 }
 0x7ea   :  { %v3390_v57 = vadd.f32 %v3389_v42, %v10551_v1  ;;  %v3391_v56 = vpop.f32.mrb[105].mxu0 }
 0x7eb   :  { %v3392_v54 = vadd.f32 %v3391_v56, %v10554_v47 }
 0x7ec   :  { %vm3436_vm2 = vcmp.gt.f32.partialorder %v3390_v57, 0.0  ;;  %v3452_v38 = vmul.f32 0.2, %v3390_v57 }
 0x7ed   :  { %vm3437_vm15 = vcmp.gt.f32.partialorder %v3392_v54, 0.0  ;;  %v3453_v60 = vmul.f32 0.2, %v3392_v54  ;;  %v3395_v51 = vpop.f32.mrb[106].mxu0 }
 0x7ee   :  { %v3396_v45 = vadd.f32 %v3395_v51, %v10551_v1  ;;  %v3397_v48 = vpop.f32.mrb[107].mxu0  ;;  %v3468_v41 = vsel %vm3436_vm2, %v3390_v57, %v3452_v38  ;;  %v8918_v57 = vld [vmem:[%s11837_s1 + $0x38] sm:$0xff] }
 0x7ef   :  { %v3398_v62 = vadd.f32 %v3397_v48, %v10554_v47  ;;  %v3469_v3 = vsel %vm3437_vm15, %v3392_v54, %v3453_v60  ;;  %v10563_v30 = vadd.f32 %v8913_v9, %v3468_v41 }
 0x7f0   :  { %vm3438_vm6 = vcmp.gt.f32.partialorder %v3396_v45, 0.0  ;;  %v3454_v4 = vmul.f32 0.2, %v3396_v45  ;;  %v10568_v0 = vadd.f32 %v8914_v35, %v3469_v3  ;;  %v8919_v3 = vld [vmem:[%s11837_s1 + $0x48] sm:$0xff]  ;;  %v8920_v35 = vld [vmem:[%s11837_s1 + $0x50] sm:$0xff] }
 0x7f1   :  { %vm3439_vm7 = vcmp.gt.f32.partialorder %v3398_v62, 0.0  ;;  %v3455_v18 = vmul.f32 0.2, %v3398_v62  ;;  %v3401_v19 = vpop.f32.mrb[108].mxu0 }
 0x7f2   :  { %v3402_v20 = vadd.f32 %v3401_v19, %v10551_v1  ;;  %v3403_v49 = vpop.f32.mrb[109].mxu0  ;;  %v3500_v44 = vmax.f32 %v10563_v30, %v10568_v0  ;;  %v3470_v61 = vsel %vm3438_vm6, %v3396_v45, %v3454_v4 }
 0x7f3   :  { %v3404_v40 = vadd.f32 %v3403_v49, %v10554_v47  ;;  %v3471_v46 = vsel %vm3439_vm7, %v3398_v62, %v3455_v18  ;;  %v10577_v37 = vadd.f32 %v8915_v14, %v3470_v61 }
 0x7f4   :  { %vm3440_vm9 = vcmp.gt.f32.partialorder %v3402_v20, 0.0  ;;  %v3456_v43 = vmul.f32 0.2, %v3402_v20  ;;  %3501 = vmax.xlane.f32.xlu1 %v3500_v44  ;;  %v10582_v50 = vadd.f32 %v8916_v15, %v3471_v46 }
 0x7f5   :  { %vm3441_vm10 = vcmp.gt.f32.partialorder %v3404_v40, 0.0  ;;  %v3457_v58 = vmul.f32 0.2, %v3404_v40  ;;  %v3407_v24 = vpop.f32.mrb[110].mxu0 }
 0x7f6   :  { %v3408_v53 = vadd.f32 %v3407_v24, %v10551_v1  ;;  %v3409_v28 = vpop.f32.mrb[111].mxu0  ;;  %v3503_v29 = vmax.f32 %v10577_v37, %v10582_v50  ;;  %v3472_v52 = vsel %vm3440_vm9, %v3402_v20, %v3456_v43  ;;  %v8921_v43 = vld [vmem:[%s11837_s1 + $0x60] sm:$0xff]  ;;  %v8922_v24 = vld [vmem:[%s11837_s1 + $0x68] sm:$0xff] }
 0x7f7   :  { %v3410_v22 = vadd.f32 %v3409_v28, %v10554_v47  ;;  %v3473_v11 = vsel %vm3441_vm10, %v3404_v40, %v3457_v58  ;;  %v10591_v25 = vadd.f32 %v8917_v55, %v3472_v52 }
 0x7f8   :  { %vm3442_vm11 = vcmp.gt.f32.partialorder %v3408_v53, 0.0  ;;  %v3458_v42 = vmul.f32 0.2, %v3408_v53  ;;  %3504 = vmax.xlane.f32.xlu0 %v3503_v29  ;;  %v10596_v56 = vadd.f32 %v8918_v57, %v3473_v11 }
 0x7f9   :  { %vm3443_vm12 = vcmp.gt.f32.partialorder %v3410_v22, 0.0  ;;  %v3459_v54 = vmul.f32 0.2, %v3410_v22  ;;  %v3413_v38 = vpop.f32.mrb[112].mxu0 }
 0x7fa   :  { %v3414_v60 = vadd.f32 %v3413_v38, %v10551_v1  ;;  %v3415_v51 = vpop.f32.mrb[113].mxu0  ;;  %v3506_v45 = vmax.f32 %v10591_v25, %v10596_v56  ;;  %v3474_v48 = vsel %vm3442_vm11, %v3408_v53, %v3458_v42 }
 0x7fb   :  { %v3416_v41 = vadd.f32 %v3415_v51, %v10554_v47  ;;  %v3475_v62 = vsel %vm3443_vm12, %v3410_v22, %v3459_v54  ;;  %v10605_v9 = vadd.f32 %v8919_v3, %v3474_v48  ;;  %v8923_v54 = vld [vmem:[%s11837_s1 + $0x78] sm:$0xff]  ;;  %v8924_v51 = vld [vmem:[%s11837_s1 + $0x80] sm:$0xff] }
 0x7fc   :  { %vm3444_vm13 = vcmp.gt.f32.partialorder %v3414_v60, 0.0  ;;  %v3460_v4 = vmul.f32 0.2, %v3414_v60  ;;  %3507 = vmax.xlane.f32.xlu1 %v3506_v45  ;;  %v10610_v18 = vadd.f32 %v8920_v35, %v3475_v62 }
 0x7fd   :  { %vm3445_vm14 = vcmp.gt.f32.partialorder %v3416_v41, 0.0  ;;  %v3461_v19 = vmul.f32 0.2, %v3416_v41  ;;  %v3419_v20 = vpop.f32.mrb[114].mxu0 }
 0x7fe   :  { %v3420_v49 = vadd.f32 %v3419_v20, %v10551_v1  ;;  %v3421_v44 = vpop.f32.mrb[115].mxu0  ;;  %v3509_v61 = vmax.f32 %v10605_v9, %v10610_v18  ;;  %v3476_v40 = vsel %vm3444_vm13, %v3414_v60, %v3460_v4 }
 0x7ff   :  { %v3422_v46 = vadd.f32 %v3421_v44, %v10554_v47  ;;  %v3477_v14 = vsel %vm3445_vm14, %v3416_v41, %v3461_v19  ;;  %v10619_v15 = vadd.f32 %v8921_v43, %v3476_v40 }
 0x800   :  { %vm3446_vm2 = vcmp.gt.f32.partialorder %v3420_v49, 0.0  ;;  %v3462_v58 = vmul.f32 0.2, %v3420_v49  ;;  %3510 = vmax.xlane.f32.xlu1 %v3509_v61  ;;  %v10624_v53 = vadd.f32 %v8922_v24, %v3477_v14 }
 0x801   :  { %vm3447_vm15 = vcmp.gt.f32.partialorder %v3422_v46, 0.0  ;;  %v3463_v28 = vmul.f32 0.2, %v3422_v46  ;;  %v3425_v29 = vpop.f32.mrb[116].mxu0 }
 0x802   :  { %v3426_v52 = vadd.f32 %v3425_v29, %v10551_v1  ;;  %v3427_v22 = vpop.f32.mrb[117].mxu0  ;;  %v3512_v11 = vmax.f32 %v10619_v15, %v10624_v53  ;;  %v3478_v55 = vsel %vm3446_vm2, %v3420_v49, %v3462_v58  ;;  %v8925_v49 = vld [vmem:[%s11837_s1 + $0x90] sm:$0xff]  ;;  %v8927_v58 = vld [vmem:[%s11837_s1 + $0xa8] sm:$0xff] }
 0x803   :  { %v3428_v42 = vadd.f32 %v3427_v22, %v10554_v47  ;;  %v3479_v57 = vsel %vm3447_vm15, %v3422_v46, %v3463_v28  ;;  %v10633_v38 = vadd.f32 %v8923_v54, %v3478_v55  ;;  %v8928_v28 = vld [vmem:[%s11837_s1 + $0xb0] sm:$0xff] }
 0x804   :  { %vm3448_vm6 = vcmp.gt.f32.partialorder %v3426_v52, 0.0  ;;  %v3464_v60 = vmul.f32 0.2, %v3426_v52  ;;  %3513 = vmax.xlane.f32.xlu1 %v3512_v11  ;;  %v10638_v45 = vadd.f32 %v8924_v51, %v3479_v57 }
 0x805   :  { %vm3449_vm7 = vcmp.gt.f32.partialorder %v3428_v42, 0.0  ;;  %v3465_v48 = vmul.f32 0.2, %v3428_v42  ;;  %v3431_v41 = vpop.f32.mrb[118].mxu0 }
 0x806   :  { %v3432_v62 = vadd.f32 %v3431_v41, %v10551_v1  ;;  %v3433_v3 = vpop.f32.mrb[119].mxu0  ;;  %v3515_v4 = vmax.f32 %v10633_v38, %v10638_v45  ;;  %v3480_v35 = vsel %vm3448_vm6, %v3426_v52, %v3464_v60  ;;  %v8926_v1 = vld [vmem:[%s11837_s1 + $0x98] sm:$0xff] }
 0x807   :  { %v3434_v19 = vadd.f32 %v3433_v3, %v10554_v47  ;;  %v3481_v20 = vsel %vm3449_vm7, %v3428_v42, %v3465_v48  ;;  %v10647_v44 = vadd.f32 %v8925_v49, %v3480_v35 }
 0x808   :  { %vm3450_vm9 = vcmp.gt.f32.partialorder %v3432_v62, 0.0  ;;  %v3466_v61 = vmul.f32 0.2, %v3432_v62  ;;  %3516 = vmax.xlane.f32.xlu0 %v3515_v4  ;;  %v10652_v40 = vadd.f32 %v8926_v1, %v3481_v20 }
 0x809   :  { %vm3451_vm10 = vcmp.gt.f32.partialorder %v3434_v19, 0.0  ;;  %v3467_v46 = vmul.f32 0.2, %v3434_v19 }
 0x80a   :  { %v3518_v47 = vmax.f32 %v10647_v44, %v10652_v40  ;;  %v3482_v14 = vsel %vm3450_vm9, %v3432_v62, %v3466_v61 }
 0x80b   :  { %v3483_v43 = vsel %vm3451_vm10, %v3434_v19, %v3467_v46  ;;  %v10659_v24 = vadd.f32 %v8927_v58, %v3482_v14  ;;  %vm4540_vm10 = vcmask 1045504  }
 0x80c   :  { %3519 = vmax.xlane.f32.xlu1 %v3518_v47  ;;  %v10664_v29 = vadd.f32 %v8928_v28, %v3483_v43 }
 0x80e   :  { %v3521_v52 = vmax.f32 %v10659_v24, %v10664_v29 }
 0x810   :  { %3522 = vmax.xlane.f32.xlu0 %v3521_v52 }
 0x881   :  { %v3502_v22 = vpop.xlane.xlu1 %3501 }
 0x882   :  { %v3524_v11 = vsub.f32 %v10563_v30, %v3502_v22  ;;  %v3525_v55 = vsub.f32 %v10568_v0, %v3502_v22 }
 0x884   :  { %v3540_v42 = vmul.f32 1.442695, %v3524_v11  ;;  %v3542_v57 = vmul.f32 1.442695, %v3525_v55 }
 0x885   :  { %v3505_v54 = vpop.xlane.xlu0 %3504 }
 0x886   :  { %8736 = vpow2.f32 %v3540_v42  ;;  %v3526_v60 = vsub.f32 %v10577_v37, %v3505_v54  ;;  %v3527_v51 = vsub.f32 %v10582_v50, %v3505_v54 }
 0x887   :  { %8738 = vpow2.f32 %v3542_v57 }
 0x888   :  { %v3544_v48 = vmul.f32 1.442695, %v3526_v60  ;;  %v3546_v41 = vmul.f32 1.442695, %v3527_v51 }
 0x889   :  { %v3508_v62 = vpop.xlane.xlu1 %3507 }
 0x88a   :  { %8740 = vpow2.f32 %v3544_v48  ;;  %v3528_v3 = vsub.f32 %v10591_v25, %v3508_v62  ;;  %v3529_v4 = vsub.f32 %v10596_v56, %v3508_v62 }
 0x88b   :  { %8742 = vpow2.f32 %v3546_v41 }
 0x88c   :  { %v3548_v30 = vmul.f32 1.442695, %v3528_v3  ;;  %v3550_v0 = vmul.f32 1.442695, %v3529_v4 }
 0x88d   :  { %v3511_v35 = vpop.xlane.xlu1 %3510 }
 0x88e   :  { %8744 = vpow2.f32 %v3548_v30  ;;  %v3530_v19 = vsub.f32 %v10605_v9, %v3511_v35  ;;  %v3531_v37 = vsub.f32 %v10610_v18, %v3511_v35 }
 0x88f   :  { %8746 = vpow2.f32 %v3550_v0 }
 0x890   :  { %v10676_v50 = vpop.eup %8736  ;;  %v3552_v20 = vmul.f32 1.442695, %v3530_v19  ;;  %v3554_v49 = vmul.f32 1.442695, %v3531_v37 }
 0x891   :  { %v10678_v61 = vpop.eup %8738  ;;  %v3514_v1 = vpop.xlane.xlu1 %3513 }
 0x892   :  { %8748 = vpow2.f32 %v3552_v20  ;;  %3636 = vmatprep.mubr.f32.mxu0 %v10678_v61  ;;  %v3532_v25 = vsub.f32 %v10619_v15, %v3514_v1  ;;  %v3533_v56 = vsub.f32 %v10624_v53, %v3514_v1 }
 0x893   :  { %8750 = vpow2.f32 %v3554_v49  ;;  %3637 = vmatmul.mubr.f32.vlgmr.msra.gmra.mrb[120].mxu0 %v10676_v50 }
 0x894   :  { %v8741_v9 = vpop.eup %8740  ;;  %v3556_v18 = vmul.f32 1.442695, %v3532_v25  ;;  %v3558_v46 = vmul.f32 1.442695, %v3533_v56  ;;  %8264 = vmatpush3.bf16.msra.mxu0 %v10411_v21 }
 0x895   :  { %v8743_v47 = vpop.eup %8742  ;;  %8266 = vmatprep.subr.bf16.mxu0 %v10435_v8  ;;  %v3517_v14 = vpop.xlane.xlu0 %3516 }
 0x896   :  { %8752 = vpow2.f32 %v3556_v18  ;;  %3778 = vmatprep.mubr.f32.mxu1 %v8743_v47  ;;  %v3534_v43 = vsub.f32 %v10633_v38, %v3517_v14  ;;  %v3535_v15 = vsub.f32 %v10638_v45, %v3517_v14  ;;  %3641 = vmatprep.mubr.f32.mxu0 %v8743_v47 }
 0x897   :  { %8754 = vpow2.f32 %v3558_v46  ;;  %3642 = vmatmul.mubr.f32.gmra.mrb[122].mxu0 %v8741_v9  ;;  %3779 = vmatmul.mubr.f32.vlgmr.msra.gmra.mrb[108].mxu1 %v8741_v9 }
 0x898   :  { %v8745_v53 = vpop.eup %8744  ;;  %v3560_v58 = vmul.f32 1.442695, %v3534_v43  ;;  %v3562_v28 = vmul.f32 1.442695, %v3535_v15  ;;  %8268 = vmatpush3.bf16.msra.mxu0 %v10437_v16 }
 0x899   :  { %v8747_v21 = vpop.eup %8746  ;;  %8270 = vmatprep.subr.bf16.mxu0 %v10456_v10  ;;  %v3520_v8 = vpop.xlane.xlu1 %3519 }
 0x89a   :  { %8756 = vpow2.f32 %v3560_v58  ;;  %3646 = vmatprep.mubr.f32.mxu0 %v8747_v21  ;;  %3783 = vmatprep.mubr.f32.mxu1 %v8747_v21  ;;  %v3536_v38 = vsub.f32 %v10647_v44, %v3520_v8  ;;  %v3537_v45 = vsub.f32 %v10652_v40, %v3520_v8 }
 0x89b   :  { %8758 = vpow2.f32 %v3562_v28  ;;  %3647 = vmatmul.mubr.f32.gmra.mrb[124].mxu0 %v8745_v53  ;;  %3784 = vmatmul.mubr.f32.gmra.mrb[110].mxu1 %v8745_v53 }
 0x89c   :  { %v8749_v52 = vpop.eup %8748  ;;  %v3564_v22 = vmul.f32 1.442695, %v3536_v38  ;;  %v3566_v11 = vmul.f32 1.442695, %v3537_v45  ;;  %8272 = vmatpush3.bf16.msra.mxu0 %v10458_v32 }
 0x89d   :  { %v8751_v16 = vpop.eup %8750  ;;  %8274 = vmatprep.subr.bf16.mxu0 %v10477_v5  ;;  %v3523_v10 = vpop.xlane.xlu0 %3522 }
 0x89e   :  { %8760 = vpow2.f32 %v3564_v22  ;;  %v3538_v55 = vsub.f32 %v10659_v24, %v3523_v10  ;;  %v3539_v42 = vsub.f32 %v10664_v29, %v3523_v10  ;;  %3651 = vmatprep.mubr.f32.mxu0 %v8751_v16  ;;  %3788 = vmatprep.mubr.f32.mxu1 %v8751_v16 }
 0x89f   :  { %8762 = vpow2.f32 %v3566_v11  ;;  %3652 = vmatmul.mubr.f32.gmra.mrb[126].mxu0 %v8749_v52  ;;  %3789 = vmatmul.mubr.f32.gmra.mrb[112].mxu1 %v8749_v52 }
 0x8a0   :  { %v8753_v44 = vpop.eup %8752  ;;  %v3568_v40 = vmul.f32 1.442695, %v3538_v55  ;;  %v3570_v57 = vmul.f32 1.442695, %v3539_v42  ;;  %8276 = vmatpush3.bf16.msra.mxu0 %v10479_v26 }
 0x8a1   :  { %v8755_v32 = vpop.eup %8754  ;;  %8278 = vmatprep.subr.bf16.mxu0 %v10413_v12 }
 0x8a2   :  { %8764 = vpow2.f32 %v3568_v40  ;;  %3656 = vmatprep.mubr.f32.mxu0 %v8755_v32  ;;  %3793 = vmatprep.mubr.f32.mxu1 %v8755_v32 }
 0x8a3   :  { %8766 = vpow2.f32 %v3570_v57  ;;  %3657 = vmatmul.mubr.f32.gmra.mrb[128].mxu0 %v8753_v44  ;;  %3794 = vmatmul.mubr.f32.gmra.mrb[114].mxu1 %v8753_v44 }
 0x8a4   :  { %v8757_v5 = vpop.eup %8756  ;;  %8280 = vmatpush3.bf16.msra.mxu0 %v10420_v13 }
 0x8a5   :  { %v8759_v24 = vpop.eup %8758  ;;  %8282 = vmatprep.subr.bf16.mxu0 %v10439_v17  ;;  %v8929_v17 = vld [vmem:[%s11974_s28] sm:$0xf] }
 0x8a6   :  { %3661 = vmatprep.mubr.f32.mxu0 %v8759_v24  ;;  %3798 = vmatprep.mubr.f32.mxu1 %v8759_v24 }
 0x8a7   :  { %3662 = vmatmul.mubr.f32.gmra.mrb[130].mxu0 %v8757_v5  ;;  %3799 = vmatmul.mubr.f32.gmra.mrb[116].mxu1 %v8757_v5 }
 0x8a8   :  { %v8761_v26 = vpop.eup %8760  ;;  %8284 = vmatpush3.bf16.msra.mxu0 %v10442_v27  ;;  %v4030_v27 = vld [vmem:[%s11842_s10] sm:$0xff] }
 0x8a9   :  { %v8763_v12 = vpop.eup %8762  ;;  %8286 = vmatprep.subr.bf16.mxu0 %v10460_v34  ;;  %v4031_v34 = vld [vmem:[%s11842_s10 + $0x8] sm:$0xff] }
 0x8aa   :  { %3666 = vmatprep.mubr.f32.mxu0 %v8763_v12  ;;  %3803 = vmatprep.mubr.f32.mxu1 %v8763_v12 }
 0x8ab   :  { %3667 = vmatmul.mubr.f32.gmra.mrb[132].mxu0 %v8761_v26  ;;  %3804 = vmatmul.mubr.f32.gmra.mrb[118].mxu1 %v8761_v26 }
 0x8ac   :  { %v8765_v29 = vpop.eup %8764  ;;  %8288 = vmatpush3.bf16.msra.mxu0 %v10463_v36  ;;  %v8293_v36 = vpack.c.bf16 %v4031_v34, %v4030_v27 }
 0x8ad   :  { %v8767_v13 = vpop.eup %8766  ;;  %8290 = vmatprep.subr.bf16.mxu0 %v10481_v59 }
 0x8ae   :  { %3671 = vmatprep.mubr.f32.mxu0 %v8767_v13  ;;  %3808 = vmatprep.mubr.f32.mxu1 %v8767_v13 }
 0x8af   :  { %3672 = vmatmul.mubr.f32.gmra.mrb[134].mxu0 %v8765_v29  ;;  %3809 = vmatmul.mubr.f32.gmra.mrb[120].mxu1 %v8765_v29 }
 0x8b0   :  { %8292 = vmatpush3.bf16.msra.mxu0 %v10485_v2  ;;  %3773 = vmatprep.mubr.f32.mxu0 %v10678_v61 }
 0x8b1   :  { %7786 = vmatprep.subr.msk.mxu0 %vm1867_vm3, %v8929_v17  ;;  %8294 = vmatprep.subr.bf16.mxu1 %v8293_v36 }
 0x8b2   :  { %8296 = vmatpush3.bf16.msra.mxu1 %v8293_v36  ;;  %v4032_v36 = vld [vmem:[%s11842_s10 + $0x10] sm:$0xff] }
 0x8b3   :  { %3774 = vmatmul.mubr.f32.vlgmr.msra.gmra.mrb[136].mxu0 %v10676_v50 }
 0x8b4   :  { %7787 = vmatpush3.msk.msra.mxu0 %vm1867_vm3, %v8929_v17  ;;  %vm4251_vm3 = vcmask 1041408  }
 0x966   :  { %v7231_v59 = vpop.f32.mrb[120].mxu0 }
 0x967   :  { %v7232_v2 = vpop.f32.mrb[121].mxu0 }
 0x968   :  { %v7233_v54 = vadd.f32 %v7232_v2, %v7231_v59  ;;  %v4033_v59 = vld [vmem:[%s11842_s10 + $0x18] sm:$0xff] }
 0x969   :  { %v8297_v2 = vpack.c.bf16 %v4033_v59, %v4032_v36 }
 0x96a   :  { %8768 = vrcp.f32 %v7233_v54  ;;  %v7234_v60 = vpop.f32.mrb[122].mxu0  ;;  %v7290_v51 = vpop.f32.mrb[108].mxu1  ;;  %v4034_v54 = vld [vmem:[%s11842_s10 + $0x20] sm:$0xff] }
 0x96b   :  { %v7235_v48 = vpop.f32.mrb[123].mxu0  ;;  %v7291_v41 = vpop.f32.mrb[109].mxu1  ;;  %8298 = vmatprep.subr.bf16.mxu1 %v8297_v2 }
 0x96c   :  { %v7236_v62 = vadd.f32 %v7235_v48, %v7234_v60  ;;  %v10718_v3 = vadd.f32 %v7291_v41, %v7290_v51  ;;  %8300 = vmatpush3.bf16.msra.mxu1 %v8297_v2  ;;  %v4035_v60 = vld [vmem:[%s11842_s10 + $0x28] sm:$0xff]  ;;  %v4036_v48 = vld [vmem:[%s11842_s10 + $0x30] sm:$0xff]  ;;  %v4037_v41 = vld [vmem:[%s11842_s10 + $0x38] sm:$0xff] }
 0x96d   :  { %v8301_v51 = vpack.c.bf16 %v4035_v60, %v4034_v54 }
 0x96e   :  { %8770 = vrcp.f32 %v7236_v62  ;;  %v7237_v4 = vpop.f32.mrb[124].mxu0  ;;  %v7293_v30 = vpop.f32.mrb[110].mxu1  ;;  %v8305_v62 = vpack.c.bf16 %v4037_v41, %v4036_v48 }
 0x96f   :  { %v7238_v0 = vpop.f32.mrb[125].mxu0  ;;  %v7294_v35 = vpop.f32.mrb[111].mxu1  ;;  %8302 = vmatprep.subr.bf16.mxu1 %v8301_v51 }
 0x970   :  { %v7239_v19 = vadd.f32 %v7238_v0, %v7237_v4  ;;  %v10720_v37 = vadd.f32 %v7294_v35, %v7293_v30  ;;  %8304 = vmatpush3.bf16.msra.mxu1 %v8301_v51  ;;  %v4039_v4 = vld [vmem:[%s11843_s12] sm:$0xff]  ;;  %v4040_v30 = vld [vmem:[%s11843_s12 + $0x8] sm:$0xff]  ;;  %v4041_v0 = vld [vmem:[%s11843_s12 + $0x10] sm:$0xff] }
 0x971   :  { %8306 = vmatprep.subr.bf16.mxu1 %v8305_v62  ;;  %v8309_v35 = vpack.c.bf16 %v4040_v30, %v4039_v4 }
 0x972   :  { %8772 = vrcp.f32 %v7239_v19  ;;  %v7240_v50 = vpop.f32.mrb[126].mxu0  ;;  %v7296_v20 = vpop.f32.mrb[112].mxu1  ;;  %v4042_v19 = vld [vmem:[%s11843_s12 + $0x18] sm:$0xff] }
 0x973   :  { %v7241_v49 = vpop.f32.mrb[127].mxu0  ;;  %v7297_v61 = vpop.f32.mrb[113].mxu1  ;;  %8310 = vmatprep.subr.bf16.mxu0 %v8309_v35 }
 0x974   :  { %v8769_v1 = vpop.eup %8768  ;;  %v7242_v25 = vadd.f32 %v7241_v49, %v7240_v50  ;;  %v10722_v56 = vadd.f32 %v7297_v61, %v7296_v20  ;;  %8308 = vmatpush3.bf16.msra.mxu1 %v8305_v62  ;;  %v8313_v50 = vpack.c.bf16 %v4042_v19, %v4041_v0  ;;  %v4043_v20 = vld [vmem:[%s11843_s12 + $0x20] sm:$0xff]  ;;  %v4044_v49 = vld [vmem:[%s11843_s12 + $0x28] sm:$0x3] }
 0x975   :  { %7788 = vmatprep.mubr.msk.f32.mxu0 %vm1842_vm4, %v8769_v1  ;;  %8323 = vmatprep.subr.bf16.mxu1 %v12045_v63  ;;  %v8317_v61 = vpack.c.bf16 %v4044_v49, %v4043_v20  ;;  %v12098_v1 = vmov 0 }
 0x976   :  { %8774 = vrcp.f32 %v7242_v25  ;;  %v7243_v9 = vpop.f32.mrb[128].mxu0  ;;  %v7299_v18 = vpop.f32.mrb[114].mxu1 }
 0x977   :  { %v7244_v46 = vpop.f32.mrb[129].mxu0  ;;  %v7300_v47 = vpop.f32.mrb[115].mxu1 }
 0x978   :  { %v8771_v14 = vpop.eup %8770  ;;  %v7245_v43 = vadd.f32 %v7244_v46, %v7243_v9  ;;  %v10725_v15 = vadd.f32 %v7300_v47, %v7299_v18  ;;  %v6609_v9 = vld [vmem:[%s11844_s9] ss:$0 sm:$0xff] }
 0x979   :  { %7789 = vmatmul.mubr.msk.f32.vlgmr.msra.gmra.mrb[138].mxu0 %vm1842_vm4, %v8771_v14 }
 0x97a   :  { %8776 = vrcp.f32 %v7245_v43  ;;  %v7246_v53 = vpop.f32.mrb[130].mxu0  ;;  %v7302_v58 = vpop.f32.mrb[116].mxu1  ;;  %8312 = vmatpush3.bf16.msra.mxu0 %v8309_v35 }
 0x97b   :  { %v7247_v28 = vpop.f32.mrb[131].mxu0  ;;  %v7303_v21 = vpop.f32.mrb[117].mxu1  ;;  %8314 = vmatprep.subr.bf16.mxu0 %v8313_v50 }
 0x97c   :  { %v8773_v8 = vpop.eup %8772  ;;  %v7248_v38 = vadd.f32 %v7247_v28, %v7246_v53  ;;  %v10728_v45 = vadd.f32 %v7303_v21, %v7302_v58 }
 0x97d   :  { %7791 = vmatprep.mubr.msk.f32.mxu0 %vm1842_vm4, %v8773_v8 }
 0x97e   :  { %8778 = vrcp.f32 %v7248_v38  ;;  %v7249_v52 = vpop.f32.mrb[132].mxu0  ;;  %v7305_v22 = vpop.f32.mrb[118].mxu1  ;;  %8316 = vmatpush3.bf16.msra.mxu0 %v8313_v50 }
 0x97f   :  { %v7250_v11 = vpop.f32.mrb[133].mxu0  ;;  %v7306_v16 = vpop.f32.mrb[119].mxu1 }
 0x980   :  { %v8775_v10 = vpop.eup %8774  ;;  %v7251_v55 = vadd.f32 %v7250_v11, %v7249_v52  ;;  %v10731_v42 = vadd.f32 %v7306_v16, %v7305_v22 }
 0x981   :  { %7792 = vmatmul.mubr.msk.f32.gmra.mrb[140].mxu0 %vm1842_vm4, %v8775_v10 }
 0x982   :  { %8780 = vrcp.f32 %v7251_v55  ;;  %v7252_v44 = vpop.f32.mrb[134].mxu0  ;;  %v7308_v40 = vpop.f32.mrb[120].mxu1 }
 0x983   :  { %v7253_v57 = vpop.f32.mrb[135].mxu0  ;;  %v7309_v32 = vpop.f32.mrb[121].mxu1 }
 0x984   :  { %v8777_v5 = vpop.eup %8776  ;;  %v7254_v24 = vadd.f32 %v7253_v57, %v7252_v44  ;;  %v10734_v26 = vadd.f32 %v7309_v32, %v7308_v40 }
 0x985   :  { %7794 = vmatprep.mubr.msk.f32.mxu0 %vm1842_vm4, %v8777_v5 }
 0x986   :  { %8782 = vrcp.f32 %v7254_v24  ;;  %v7287_v12 = vpop.f32.mrb[136].mxu0 }
 0x987   :  { %v7288_v29 = vpop.f32.mrb[137].mxu0 }
 0x988   :  { %v8779_v13 = vpop.eup %8778  ;;  %v7289_v17 = vadd.f32 %v7288_v29, %v7287_v12 }
 0x989   :  { %7795 = vmatmul.mubr.msk.f32.gmra.mrb[142].mxu0 %vm1842_vm4, %v8779_v13 }
 0x98c   :  { %v8781_v27 = vpop.eup %8780 }
 0x98d   :  { %7797 = vmatprep.mubr.msk.f32.mxu0 %vm1842_vm4, %v8781_v27 }
 0x990   :  { %v8783_v34 = vpop.eup %8782 }
 0x991   :  { %7798 = vmatmul.mubr.msk.f32.gmra.mrb[144].mxu0 %vm1842_vm4, %v8783_v34  ;;  %vm8951_vm4 = vmmov 1  }
 0x992   :  { %vm10777_vm11 = vmpackc.low %vm4251_vm3, %vm8951_vm4  ;;  %vm4226_vm3 = vcmask 343040  }
 0x993   :  { %v12099_v1 = vsel %vm10777_vm11, 4294967295, %v12098_v1  ;;  %8319 = vmatprep.subr.msk.bf16.mxu0 %vm10777_vm11, %v8317_v61  ;;  %vm10815_vm4 = vmpackc.low %vm4226_vm3, %vm4226_vm3 }
 0x994   :  { %12100 = vst [vmem:[#allocation33_spill] sm:$0xff] %v12099_v1  ;;  %8322 = vmatpush3.bf16.msk.msra.mxu0 %vm10777_vm11, %v8317_v61 }
 0xa4c   :  { %v7790_v25 = vpop.f32.mrb[138].mxu0 }
 0xa4d   :  { %v3960_v18 = vmul.f32 %v7790_v25, %v10718_v3  ;;  %v3920_v46 = vpop.f32.mrb[139].mxu0 }
 0xa4e   :  { %v3959_v47 = vmul.f32 %v7289_v17, %v3920_v46 }
 0xa4f   :  { %v3975_v14 = vadd.f32 %v6609_v9, %v3960_v18 }
 0xa50   :  { %v3974_v43 = vadd.f32 %v6609_v9, %v3959_v47 }
 0xa51   :  { %v3991_v53 = vmin.f32 %v3975_v14, 0.0  ;;  %vm3983_vm13 = vcmp.gt.f32.partialorder %v3975_v14, 0.0 }
 0xa52   :  { %v3990_v58 = vmin.f32 %v3974_v43, 0.0  ;;  %vm3982_vm12 = vcmp.gt.f32.partialorder %v3974_v43, 0.0 }
 0xa53   :  { %v4000_v28 = vmul.f32 1.442695, %v3991_v53 }
 0xa54   :  { %v3998_v21 = vmul.f32 1.442695, %v3990_v58  ;;  %v7793_v8 = vpop.f32.mrb[140].mxu0 }
 0xa55   :  { %8784 = vpow2.f32 %v4000_v28  ;;  %v3962_v38 = vmul.f32 %v7793_v8, %v10722_v56  ;;  %v3930_v52 = vpop.f32.mrb[141].mxu0  ;;  %v4046_v28 = vld [vmem:[%s11845_s17 + $0x8] sm:$0x3f] }
 0xa56   :  { %8786 = vpow2.f32 %v3998_v21  ;;  %v3961_v22 = vmul.f32 %v10720_v37, %v3930_v52  ;;  %6644 = vmatprep.subr.msk.mxu0 %vm4540_vm10, %v4046_v28  ;;  %v4045_v52 = vld [vmem:[%s11845_s17] sm:$0x3f]  ;;  %v11010_v28 = vld [vmem:[%s11847_s18 + $0x28] sm:$0xff] }
 0xa57   :  { %v3977_v11 = vadd.f32 %v6609_v9, %v3962_v38  ;;  %v11015_v38 = vld [vmem:[%s11847_s18 + $0x120] sm:$0xff] }
 0xa58   :  { %v3976_v16 = vadd.f32 %v6609_v9, %v3961_v22  ;;  %12115 = vst [vmem:[#allocation50_spill] sm:$0xff] %v11015_v38 }
 0xa59   :  { %v3993_v10 = vmin.f32 %v3977_v11, 0.0  ;;  %vm3985_vm2 = vcmp.gt.f32.partialorder %v3977_v11, 0.0 }
 0xa5a   :  { %v3992_v3 = vmin.f32 %v3976_v16, 0.0  ;;  %vm3984_vm14 = vcmp.gt.f32.partialorder %v3976_v16, 0.0 }
 0xa5b   :  { %v4004_v55 = vmul.f32 1.442695, %v3993_v10 }
 0xa5c   :  { %v4002_v44 = vmul.f32 1.442695, %v3992_v3  ;;  %v7796_v40 = vpop.f32.mrb[142].mxu0 }
 0xa5d   :  { %8788 = vpow2.f32 %v4004_v55  ;;  %v3964_v57 = vmul.f32 %v7796_v40, %v10728_v45  ;;  %v3940_v32 = vpop.f32.mrb[143].mxu0 }
 0xa5e   :  { %8790 = vpow2.f32 %v4002_v44  ;;  %v3963_v5 = vmul.f32 %v10725_v15, %v3940_v32 }
 0xa5f   :  { %v8785_v24 = vpop.eup %8784  ;;  %v3979_v56 = vadd.f32 %v6609_v9, %v3964_v57 }
 0xa60   :  { %v8787_v12 = vpop.eup %8786  ;;  %v6611_v29 = vadd.f32 -1.0, %v8785_v24  ;;  %v3978_v13 = vadd.f32 %v6609_v9, %v3963_v5  ;;  %v4047_v5 = vld [vmem:[%s11845_s17 + $0x10] sm:$0x3f] }
 0xa61   :  { %v3995_v37 = vmin.f32 %v3979_v56, 0.0  ;;  %v6610_v17 = vadd.f32 -1.0, %v8787_v12  ;;  %vm3987_vm6 = vcmp.gt.f32.partialorder %v3979_v56, 0.0 }
 0xa62   :  { %v3994_v27 = vmin.f32 %v3978_v13, 0.0  ;;  %v4023_v59 = vsel %vm3983_vm13, %v3975_v14, %v6611_v29  ;;  %vm3986_vm15 = vcmp.gt.f32.partialorder %v3978_v13, 0.0 }
 0xa63   :  { %v4008_v34 = vmul.f32 1.442695, %v3995_v37  ;;  %v4022_v36 = vsel %vm3982_vm12, %v3974_v43, %v6610_v17 }
 0xa64   :  { %v4006_v2 = vmul.f32 1.442695, %v3994_v27  ;;  %v7799_v54 = vpop.f32.mrb[144].mxu0  ;;  %7816 = vmatprep.mubr.msk.f32.mxu1 %vm1582_vm1, %v4022_v36 }
 0xa65   :  { %8792 = vpow2.f32 %v4008_v34  ;;  %v3966_v15 = vmul.f32 %v7799_v54, %v10734_v26  ;;  %v3950_v45 = vpop.f32.mrb[145].mxu0  ;;  %7817 = vmatmul.mubr.msk.f32.vlgmr.msra.gmra.mrb[122].mxu1 %vm1582_vm1, %v4023_v59 }
 0xa66   :  { %8794 = vpow2.f32 %v4006_v2  ;;  %v3965_v60 = vmul.f32 %v10731_v42, %v3950_v45 }
 0xa67   :  { %v8789_v51 = vpop.eup %8788  ;;  %v3981_v48 = vadd.f32 %v6609_v9, %v3966_v15 }
 0xa68   :  { %v8791_v41 = vpop.eup %8790  ;;  %v3980_v62 = vadd.f32 %v6609_v9, %v3965_v60  ;;  %v6613_v4 = vadd.f32 -1.0, %v8789_v51 }
 0xa69   :  { %v3997_v30 = vmin.f32 %v3981_v48, 0.0  ;;  %v6612_v0 = vadd.f32 -1.0, %v8791_v41  ;;  %vm3989_vm9 = vcmp.gt.f32.partialorder %v3981_v48, 0.0 }
 0xa6a   :  { %v3996_v35 = vmin.f32 %v3980_v62, 0.0  ;;  %v4025_v26 = vsel %vm3985_vm2, %v3977_v11, %v6613_v4  ;;  %vm3988_vm7 = vcmp.gt.f32.partialorder %v3980_v62, 0.0  ;;  %v10921_v4 = vld [vmem:[%s11847_s18 + $0x80] sm:$0xff] }
 0xa6b   :  { %v4012_v19 = vmul.f32 1.442695, %v3997_v30  ;;  %v4024_v50 = vsel %vm3984_vm14, %v3976_v16, %v6612_v0  ;;  %v10926_v30 = vld [vmem:[%s11847_s18 + $0x88] sm:$0xff] }
 0xa6c   :  { %v4010_v20 = vmul.f32 1.442695, %v3996_v35  ;;  %7819 = vmatprep.mubr.msk.f32.mxu1 %vm1582_vm1, %v4024_v50  ;;  %v8339_v39 = vpack.c.bf16 %v10926_v30, %v10921_v4  ;;  %v10938_v0 = vld [vmem:[%s11847_s18 + $0x8] sm:$0xff]  ;;  %v10943_v35 = vld [vmem:[%s11847_s18 + $0x100] sm:$0xff] }
 0xa6d   :  { %8796 = vpow2.f32 %v4012_v19  ;;  %7820 = vmatmul.mubr.msk.f32.gmra.mrb[124].mxu1 %vm1582_vm1, %v4025_v26  ;;  %12111 = vst [vmem:[#allocation49_spill] sm:$0xff] %v10943_v35  ;;  %v10948_v19 = vld [vmem:[%s11847_s18 + $0x108] sm:$0xff]  ;;  %v10957_v26 = vld [vmem:[%s11847_s18 + $0x90] sm:$0xff] }
 0xa6e   :  { %8798 = vpow2.f32 %v4010_v20  ;;  %12112 = vst [vmem:[#allocation35_spill] sm:$0xff] %v10948_v19  ;;  %v8371_v20 = vpack.c.bf16 %v10948_v19, %v10943_v35 }
 0xa6f   :  { %v8793_v42 = vpop.eup %8792 }
 0xa70   :  { %v8795_v49 = vpop.eup %8794  ;;  %v6615_v61 = vadd.f32 -1.0, %v8793_v42  ;;  %v10962_v42 = vld [vmem:[%s11847_s18 + $0x98] sm:$0xff] }
 0xa71   :  { %v6614_v25 = vadd.f32 -1.0, %v8795_v49  ;;  %v10967_v49 = vld [vmem:[%s11847_s18 + $0x10] sm:$0xff] }
 0xa72   :  { %v4027_v18 = vsel %vm3987_vm6, %v3979_v56, %v6615_v61  ;;  %v8343_v61 = vpack.c.bf16 %v10962_v42, %v10957_v26 }
 0xa73   :  { %v4026_v9 = vsel %vm3986_vm15, %v3978_v13, %v6614_v25  ;;  %v10974_v25 = vld [vmem:[%s11847_s18 + $0x18] sm:$0xff] }
 0xa74   :  { %7822 = vmatprep.mubr.msk.f32.mxu1 %vm1582_vm1, %v4026_v9  ;;  %v10979_v9 = vld [vmem:[%s11847_s18 + $0x110] sm:$0xff] }
 0xa75   :  { %7823 = vmatmul.mubr.msk.f32.gmra.mrb[126].mxu1 %vm1582_vm1, %v4027_v18  ;;  %12113 = vst [vmem:[#allocation43_spill] sm:$0xff] %v10979_v9  ;;  %v10984_v18 = vld [vmem:[%s11847_s18 + $0x118] sm:$0xff] }
 0xa76   :  { %12114 = vst [vmem:[#allocation28_spill] sm:$0xff] %v10984_v18 }
 0xa77   :  { %v8797_v46 = vpop.eup %8796 }
 0xa78   :  { %v8799_v47 = vpop.eup %8798  ;;  %v6617_v14 = vadd.f32 -1.0, %v8797_v46  ;;  %v8345_v46 = vpack.c.bf16 %v10974_v25, %v10967_v49 }
 0xa79   :  { %v6616_v43 = vadd.f32 -1.0, %v8799_v47  ;;  %v8375_v47 = vpack.c.bf16 %v10984_v18, %v10979_v9  ;;  %v11401_v18 = vld [vmem:[%s11847_s18 + $0x178] sm:$0xff] }
 0xa7a   :  { %v4029_v58 = vsel %vm3989_vm9, %v3981_v48, %v6617_v14  ;;  %v10993_v14 = vld [vmem:[%s11847_s18 + $0xa0] sm:$0xff]  ;;  %12134 = vst [vmem:[#allocation7_spill] sm:$0xff] %v11401_v18 }
 0xa7b   :  { %v4028_v53 = vsel %vm3988_vm7, %v3980_v62, %v6616_v43  ;;  %v10998_v43 = vld [vmem:[%s11847_s18 + $0xa8] sm:$0xff] }
 0xa7c   :  { %7825 = vmatprep.mubr.msk.f32.mxu1 %vm1582_vm1, %v4028_v53  ;;  %v11003_v53 = vld [vmem:[%s11847_s18 + $0x20] sm:$0xff] }
 0xa7d   :  { %7826 = vmatmul.mubr.msk.f32.gmra.mrb[128].mxu1 %vm1582_vm1, %v4029_v58  ;;  %v8347_v58 = vpack.c.bf16 %v10998_v43, %v10993_v14 }
 0xa7e   :  { %7868 = vmatprep.mubr.msk.f32.mxu1 %vm8947_vm0, %v12046_v33  ;;  %vm4515_vm0 = vcmask 48128  }
 0xb38   :  { %v10809_v21 = vpop.f32.mrb[122].mxu1 }
 0xb39   :  { %12101 = vst [vmem:[#allocation41_spill] sm:$0xff] %v10809_v21  ;;  %v10811_v8 = vpop.f32.mrb[123].mxu1 }
 0xb3a   :  { %12102 = vst [vmem:[#allocation26_spill] sm:$0xff] %v10811_v8  ;;  %7840 = vmatprep.mubr.msk.f32.mxu0 %vm4226_vm3, %v10811_v8  ;;  %v8324_v22 = vpack.c.bf16 %v10809_v21, %v10811_v8 }
 0xb3b   :  { %7841 = vmatmul.mubr.msk.f32.vlgmr.msra.gmra.mrb[146].mxu0 %vm4226_vm3, %v10809_v21 }
 0xb3c   :  { %8326 = vmatpush3.bf16.xpose.msk.msra.mxu1 %vm10815_vm4, %v8324_v22  ;;  %6645 = vmatpush1.msk.msra.mxu0 %vm4540_vm10, %v4045_v52  ;;  %v11020_v52 = vld [vmem:[%s11847_s18 + $0x128] sm:$0xff] }
 0xb3d   :  { %8327 = vmatprep.subr.bf16.mxu1 %v12045_v63  ;;  %8340 = vmatprep.subr.bf16.mxu0 %v8339_v39  ;;  %12116 = vst [vmem:[#allocation36_spill] sm:$0xff] %v11020_v52  ;;  %v8379_v22 = vpack.c.bf16 %v11020_v52, %v11015_v38  ;;  %v11372_v52 = vld [vmem:[%s11847_s18 + $0xf0] sm:$0xff] }
 0xb3e   :  { %12131 = vst [vmem:[#allocation32_spill] sm:$0xff] %v11372_v52 }
 0xb40   :  { %v10832_v11 = vpop.f32.mrb[124].mxu1 }
 0xb41   :  { %12105 = vst [vmem:[#allocation48_spill] sm:$0xff] %v10832_v11  ;;  %v10834_v16 = vpop.f32.mrb[125].mxu1 }
 0xb42   :  { %12106 = vst [vmem:[#allocation34_spill] sm:$0xff] %v10834_v16  ;;  %7843 = vmatprep.mubr.msk.f32.mxu0 %vm4226_vm3, %v10834_v16  ;;  %v8328_v10 = vpack.c.bf16 %v10832_v11, %v10834_v16 }
 0xb43   :  { %7844 = vmatmul.mubr.msk.f32.gmra.mrb[148].mxu0 %vm4226_vm3, %v10832_v11 }
 0xb44   :  { %8330 = vmatpush3.bf16.xpose.msk.msra.mxu1 %vm10815_vm4, %v8328_v10  ;;  %v11027_v10 = vld [vmem:[%s11847_s18 + $0xb0] sm:$0xff] }
 0xb45   :  { %8331 = vmatprep.subr.bf16.mxu1 %v12045_v63 }
 0xb48   :  { %v10845_v3 = vpop.f32.mrb[126].mxu1 }
 0xb49   :  { %12107 = vst [vmem:[#allocation3_spill] sm:$0xff] %v10845_v3  ;;  %v10847_v55 = vpop.f32.mrb[127].mxu1 }
 0xb4a   :  { %12108 = vst [vmem:[#allocation8_spill] sm:$0xff] %v10847_v55  ;;  %7846 = vmatprep.mubr.msk.f32.mxu0 %vm4226_vm3, %v10847_v55  ;;  %v8332_v44 = vpack.c.bf16 %v10845_v3, %v10847_v55  ;;  %v8936_v55 = vld [vmem:[%s11837_s1 + $0x48] sm:$0xff] }
 0xb4b   :  { %7847 = vmatmul.mubr.msk.f32.gmra.mrb[150].mxu0 %vm4226_vm3, %v10845_v3 }
 0xb4c   :  { %8334 = vmatpush3.bf16.xpose.msk.msra.mxu1 %vm10815_vm4, %v8332_v44  ;;  %v11032_v44 = vld [vmem:[%s11847_s18 + $0xb8] sm:$0xff] }
 0xb4d   :  { %8335 = vmatprep.subr.bf16.mxu1 %v12045_v63  ;;  %v4038_v63 = vld [vmem:[%s11846_s11] sm:$0x3f] }
 0xb50   :  { %v10858_v40 = vpop.f32.mrb[128].mxu1 }
 0xb51   :  { %12109 = vst [vmem:[#allocation42_spill] sm:$0xff] %v10858_v40  ;;  %v10860_v57 = vpop.f32.mrb[129].mxu1 }
 0xb52   :  { %12110 = vst [vmem:[#allocation27_spill] sm:$0xff] %v10860_v57  ;;  %7849 = vmatprep.mubr.msk.f32.mxu0 %vm4226_vm3, %v10860_v57  ;;  %v8336_v32 = vpack.c.bf16 %v10858_v40, %v10860_v57 }
 0xb53   :  { %7850 = vmatmul.mubr.msk.f32.gmra.mrb[152].mxu0 %vm4226_vm3, %v10858_v40 }
 0xb54   :  { %8338 = vmatpush3.bf16.xpose.msk.msra.mxu1 %vm10815_vm4, %v8336_v32  ;;  %4614 = vmatprep.mubr.f32.mxu0 %v12046_v33  ;;  %v11037_v32 = vld [vmem:[%s11847_s18 + $0x130] sm:$0xff] }
 0xb55   :  { %7871 = vmatprep.subr.msk.mxu1 %vm4540_vm10, %v4047_v5  ;;  %12117 = vst [vmem:[#allocation44_spill] sm:$0xff] %v11037_v32 }
 0xb5b   :  { %7869 = vmatmul.mubr.msk.f32.vlgmr.msra.gmra.mrb[130].mxu1 %vm4226_vm3, %v4038_v63  ;;  %v11042_v63 = vld [vmem:[%s11847_s18 + $0x138] sm:$0xff] }
 0xb5c   :  { %7872 = vmatpush3.msk.msra.mxu1 %vm4540_vm10, %v4047_v5  ;;  %12118 = vst [vmem:[#allocation29_spill] sm:$0xff] %v11042_v63  ;;  %v8349_v5 = vpack.c.bf16 %v11010_v28, %v11003_v53 }
 0xb5d   :  { %8372 = vmatprep.subr.bf16.mxu1 %v8371_v20 }
 0xc0e   :  { %v7842_v24 = vpop.f32.mrb[146].mxu0 }
 0xc0f   :  { %v4321_v56 = vpop.f32.mrb[147].mxu0 }
 0xc10   :  { %6646 = vmatmul.mubr.msk.f32.vlgmr.msra.gmra.mrb[154].mxu0 %vm4515_vm0, %v4321_v56  ;;  %7873 = vmatprep.mubr.msk.f32.mxu1 %vm4515_vm0, %v4321_v56  ;;  %v11051_v56 = vld [vmem:[%s11847_s18 + $0x30] sm:$0xff] }
 0xc11   :  { %7874 = vmatmul.mubr.msk.f32.vlgmr.msra.gmra.mrb[132].mxu1 %vm4515_vm0, %v7842_v24  ;;  %4620 = vmatprep.mubr.f32.mxu0 %v12046_v33 }
 0xc12   :  { %8374 = vmatpush3.bf16.msra.mxu1 %v8371_v20 }
 0xc13   :  { %8376 = vmatprep.subr.bf16.mxu1 %v8375_v47 }
 0xc14   :  { %6647 = vmatmul.mubr.msk.f32.gmra.mrb[156].mxu0 %vm4515_vm0, %v7842_v24  ;;  %v8351_v24 = vpack.c.bf16 %v11032_v44, %v11027_v10 }
 0xc15   :  { %4626 = vmatprep.mubr.f32.mxu0 %v12046_v33 }
 0xc16   :  { %v7845_v12 = vpop.f32.mrb[148].mxu0  ;;  %8378 = vmatpush3.bf16.msra.mxu1 %v8375_v47 }
 0xc17   :  { %v4331_v29 = vpop.f32.mrb[149].mxu0  ;;  %8380 = vmatprep.subr.bf16.mxu1 %v8379_v22 }
 0xc18   :  { %6648 = vmatmul.mubr.msk.f32.gmra.mrb[158].mxu0 %vm4515_vm0, %v4331_v29  ;;  %7876 = vmatprep.mubr.msk.f32.mxu1 %vm4515_vm0, %v4331_v29  ;;  %v8383_v29 = vpack.c.bf16 %v11042_v63, %v11037_v32 }
 0xc19   :  { %7877 = vmatmul.mubr.msk.f32.gmra.mrb[134].mxu1 %vm4515_vm0, %v7845_v12  ;;  %4632 = vmatprep.mubr.f32.mxu0 %v12046_v33 }
 0xc1a   :  { %8382 = vmatpush3.bf16.msra.mxu1 %v8379_v22 }
 0xc1b   :  { %8384 = vmatprep.subr.bf16.mxu1 %v8383_v29 }
 0xc1c   :  { %6649 = vmatmul.mubr.msk.f32.gmra.mrb[160].mxu0 %vm4515_vm0, %v7845_v12  ;;  %v11056_v12 = vld [vmem:[%s11847_s18 + $0x38] sm:$0xff] }
 0xc1d   :  { %4638 = vmatprep.mubr.f32.mxu0 %v12046_v33 }
 0xc1e   :  { %v7848_v13 = vpop.f32.mrb[150].mxu0  ;;  %8386 = vmatpush3.bf16.msra.mxu1 %v8383_v29 }
 0xc1f   :  { %v4341_v37 = vpop.f32.mrb[151].mxu0 }
 0xc20   :  { %6650 = vmatmul.mubr.msk.f32.gmra.mrb[162].mxu0 %vm4515_vm0, %v4341_v37  ;;  %7879 = vmatprep.mubr.msk.f32.mxu1 %vm4515_vm0, %v4341_v37 }
 0xc21   :  { %7880 = vmatmul.mubr.msk.f32.gmra.mrb[136].mxu1 %vm4515_vm0, %v7848_v13  ;;  %4644 = vmatprep.mubr.f32.mxu0 %v12046_v33 }
 0xc24   :  { %6651 = vmatmul.mubr.msk.f32.gmra.mrb[164].mxu0 %vm4515_vm0, %v7848_v13  ;;  %v8353_v13 = vpack.c.bf16 %v11056_v12, %v11051_v56 }
 0xc25   :  { %4650 = vmatprep.mubr.f32.mxu0 %v12046_v33 }
 0xc26   :  { %v7851_v17 = vpop.f32.mrb[152].mxu0 }
 0xc27   :  { %v4351_v27 = vpop.f32.mrb[153].mxu0 }
 0xc28   :  { %6652 = vmatmul.mubr.msk.f32.gmra.mrb[166].mxu0 %vm4515_vm0, %v4351_v27  ;;  %7882 = vmatprep.mubr.msk.f32.mxu1 %vm4515_vm0, %v4351_v27 }
 0xc29   :  { %7883 = vmatmul.mubr.msk.f32.gmra.mrb[138].mxu1 %vm4515_vm0, %v7851_v17  ;;  %4656 = vmatprep.mubr.f32.mxu0 %v12046_v33 }
 0xc2c   :  { %6653 = vmatmul.mubr.msk.f32.gmra.mrb[168].mxu0 %vm4515_vm0, %v7851_v17 }
 0xc2e   :  { %v4429_v34 = vpop.f32.mrb[130].mxu1 }
 0xc2f   :  { %4433 = vst.msk [vmem:[#allocation2] sm:$0x1] %vm9658_vm5, %v4429_v34  ;;  %v4441_v36 = vrot.slane %v4429_v34, %v12094_v31  ;;  %v4469_v59 = vcombine.high %v4429_v34, %v4429_v34  ;;  %v7870_v2 = vpop.f32.mrb[131].mxu1 }
 0xc31   :  { %v4442_v54 = vcombine.high %v4441_v36, %v4441_v36  ;;  %v4449_v15 = vrot.slane %v4441_v36, %v12094_v31  ;;  %v4476_v45 = vrot.slane %v4469_v59, %v12094_v31  ;;  %v12119_v36 = vld [vmem:[#allocation4_spill] sm:$0xff] }
 0xc32   :  { %v4510_v59 = vsub.s32 2, %v12119_v36 }
 0xc33   :  { %v4461_v60 = vcombine.high %v4449_v15, %v4449_v15  ;;  %v4456_v51 = vrot.slane %v4442_v54, %v12094_v31  ;;  %v4486_v48 = vcombine.high %v4476_v45, %v4476_v45  ;;  %v4483_v33 = vrot.slane %v4476_v45, %v12094_v31 }
 0xc35   :  { %4463 = vst.msk [vmem:[#allocation2 + $0x1] sm:$0x1] %vm9658_vm5, %v4461_v60  ;;  %4457 = vrot.lane.b32.xlu1 %v4456_v51, %s8950_s2  ;;  %v4493_v41 = vrot.slane %v4486_v48, %v12094_v31  ;;  %v4464_v62 = vcombine.high %v4456_v51, %v4456_v51  ;;  %4485 = vst.msk [vmem:[#allocation2 + $0x2] sm:$0x1] %vm9658_vm5, %v4483_v33  ;;  %v10931_v31 = vld [vmem:[%s11847_s18] sm:$0xff] }
 0xc36   :  { %v8341_v50 = vpack.c.bf16 %v10938_v0, %v10931_v31 }
 0xc37   :  { %4465 = vrot.lane.b32.xlu0 %v4464_v62, %s8950_s2 }
 0xc38   :  { %8342 = vmatpush3.bf16.msra.mxu0 %v8341_v50 }
 0xc39   :  { %4494 = vrot.lane.b32.xlu1 %v4493_v41, %s8950_s2  ;;  %8344 = vmatprep.subr.bf16.mxu0 %v8343_v61 }
 0xc3c   :  { %8346 = vmatpush3.bf16.msra.mxu0 %v8345_v46  ;;  %v71_v46 = vld [vmem:[%s11837_s1 + $0x10] sm:$0xff] }
 0xc3d   :  { %8348 = vmatprep.subr.bf16.mxu0 %v8347_v58 }
 0xc40   :  { %8350 = vmatpush3.bf16.msra.mxu0 %v8349_v5  ;;  %v8930_v5 = vld [vmem:[%s11837_s1] sm:$0xff] }
 0xc41   :  { %8352 = vmatprep.subr.bf16.mxu0 %v8351_v24 }
 0xc44   :  { %8354 = vmatpush3.bf16.msra.mxu0 %v8353_v13 }
 0xca7   :  { %v4458_v37 = vpop.permute.xlu1 %4457 }
 0xca8   :  { %4460 = vst.msk [vmem:[#allocation2] sm:$0x1] %vm9881_vm8, %v4458_v37  ;;  %v8931_v37 = vld [vmem:[%s11837_s1 + $0x8] sm:$0xff] }
 0xca9   :  { %v4466_v17 = vpop.permute.xlu0 %4465 }
 0xcaa   :  { %4468 = vst.msk [vmem:[#allocation2 + $0x1] sm:$0x1] %vm9881_vm8, %v4466_v17 }
 0xcab   :  { %v4495_v27 = vpop.permute.xlu1 %4494 }
 0xcac   :  { %4497 = vst.msk [vmem:[#allocation2 + $0x2] sm:$0x1] %vm9881_vm8, %v4495_v27  ;;  %v74_v27 = vld [vmem:[%s11837_s1 + $0x28] sm:$0xff] }
 0xcb3   :  { %v4498_v34 = vld [vmem:[#allocation2] sm:$0x7] }
 0xcb4   :  { %v11070_v2 = vrot.slane %v4498_v34, %v12096_v7  ;;  %v11073_v54 = vrot.slane %v4498_v34, %v12097_v6  ;;  %v11075_v15 = vrot.slane %v4498_v34, %v4510_v59 }
 0xce3   :  { %v4616_v45 = vpop.f32.mrb[154].mxu0 }
 0xce4   :  { %v4617_v60 = vadd.f32 %v4616_v45, %v11070_v2  ;;  %v4618_v51 = vpop.f32.mrb[155].mxu0  ;;  %v7875_v48 = vpop.f32.mrb[132].mxu1 }
 0xce5   :  { %v4619_v33 = vadd.f32 %v4618_v51, %v11073_v54  ;;  %v4735_v23 = vadd.f32 %v7875_v48, %v11075_v15  ;;  %v4729_v41 = vpop.f32.mrb[133].mxu1 }
 0xce6   :  { %vm4768_vm1 = vcmp.gt.f32.partialorder %v4617_v60, 0.0  ;;  %v4792_v62 = vmul.f32 0.2, %v4617_v60  ;;  %v4730_v7 = vadd.f32 %v4729_v41, %v11075_v15 }
 0xce7   :  { %vm4769_vm5 = vcmp.gt.f32.partialorder %v4619_v33, 0.0  ;;  %v4793_v39 = vmul.f32 0.2, %v4619_v33  ;;  %vm4773_vm8 = vcmp.gt.f32.partialorder %v4735_v23, 0.0  ;;  %v4797_v6 = vmul.f32 0.2, %v4735_v23 }
 0xce8   :  { %v4816_v50 = vsel %vm4768_vm1, %v4617_v60, %v4792_v62  ;;  %vm4770_vm12 = vcmp.gt.f32.partialorder %v4730_v7, 0.0  ;;  %v4794_v20 = vmul.f32 0.2, %v4730_v7  ;;  %v4622_v61 = vpop.f32.mrb[156].mxu0 }
 0xce9   :  { %v4817_v47 = vsel %vm4769_vm5, %v4619_v33, %v4793_v39  ;;  %v4623_v58 = vadd.f32 %v4622_v61, %v11070_v2  ;;  %v4624_v22 = vpop.f32.mrb[157].mxu0  ;;  %v11088_v24 = vadd.f32 %v8930_v5, %v4816_v50  ;;  %v4821_v34 = vsel %vm4773_vm8, %v4735_v23, %v4797_v6 }
 0xcea   :  { %v4625_v29 = vadd.f32 %v4624_v22, %v11073_v54  ;;  %v4818_v13 = vsel %vm4770_vm12, %v4730_v7, %v4794_v20  ;;  %v11094_v17 = vadd.f32 %v8931_v37, %v4817_v47  ;;  %v11109_v6 = vadd.f32 %v4821_v34, %v74_v27 }
 0xceb   :  { %vm4771_vm13 = vcmp.gt.f32.partialorder %v4623_v58, 0.0  ;;  %v4795_v36 = vmul.f32 0.2, %v4623_v58  ;;  %v4628_v59 = vpop.f32.mrb[158].mxu0  ;;  %v11100_v45 = vadd.f32 %v4818_v13, %v71_v46 }
 0xcec   :  { %vm4772_vm14 = vcmp.gt.f32.partialorder %v4625_v29, 0.0  ;;  %v4796_v60 = vmul.f32 0.2, %v4625_v29  ;;  %v4629_v51 = vadd.f32 %v4628_v59, %v11070_v2  ;;  %v4630_v48 = vpop.f32.mrb[159].mxu0  ;;  %v7878_v33 = vpop.f32.mrb[134].mxu1  ;;  %v4864_v41 = vmax.f32 %v11088_v24, %v11094_v17 }
 0xced   :  { %v4819_v62 = vsel %vm4771_vm13, %v4623_v58, %v4795_v36  ;;  %v4631_v7 = vadd.f32 %v4630_v48, %v11073_v54  ;;  %v11107_v39 = vadd.f32 %v7878_v33, %v11075_v15  ;;  %v4739_v23 = vpop.f32.mrb[135].mxu1  ;;  %v8932_v36 = vld [vmem:[%s11837_s1 + $0x18] sm:$0xff] }
 0xcee   :  { %v4820_v50 = vsel %vm4772_vm14, %v4625_v29, %v4796_v60  ;;  %vm4774_vm2 = vcmp.gt.f32.partialorder %v4629_v51, 0.0  ;;  %v4798_v20 = vmul.f32 0.2, %v4629_v51  ;;  %v4740_v61 = vadd.f32 %v4739_v23, %v11075_v15  ;;  %v77_v29 = vld [vmem:[%s11837_s1 + $0x40] sm:$0xff] }
 0xcef   :  { %vm4775_vm15 = vcmp.gt.f32.partialorder %v4631_v7, 0.0  ;;  %v4799_v46 = vmul.f32 0.2, %v4631_v7  ;;  %vm4779_vm6 = vcmp.gt.f32.partialorder %v11107_v39, 0.0  ;;  %v4803_v47 = vmul.f32 0.2, %v11107_v39 }
 0xcf0   :  { %v4822_v58 = vsel %vm4774_vm2, %v4629_v51, %v4798_v20  ;;  %vm4776_vm7 = vcmp.gt.f32.partialorder %v4740_v61, 0.0  ;;  %v4800_v22 = vmul.f32 0.2, %v4740_v61  ;;  %v4634_v5 = vpop.f32.mrb[160].mxu0  ;;  %v4865_v13 = vmax.f32 %v4864_v41, %v11100_v45  ;;  %v8933_v60 = vld [vmem:[%s11837_s1 + $0x20] sm:$0xff]  ;;  %v8934_v41 = vld [vmem:[%s11837_s1 + $0x30] sm:$0xff] }
 0xcf1   :  { %v4823_v37 = vsel %vm4775_vm15, %v4631_v7, %v4799_v46  ;;  %v4635_v27 = vadd.f32 %v4634_v5, %v11070_v2  ;;  %v4636_v34 = vpop.f32.mrb[161].mxu0  ;;  %v11122_v59 = vadd.f32 %v8932_v36, %v4819_v62  ;;  %v11127_v51 = vadd.f32 %v8933_v60, %v4820_v50  ;;  %v8935_v62 = vld [vmem:[%s11837_s1 + $0x38] sm:$0xff] }
 0xcf2   :  { %v4637_v48 = vadd.f32 %v4636_v34, %v11073_v54  ;;  %4866 = vmax.xlane.f32.xlu1 %v4865_v13  ;;  %v4824_v33 = vsel %vm4776_vm7, %v4740_v61, %v4800_v22  ;;  %v11133_v7 = vadd.f32 %v8934_v41, %v4822_v58  ;;  %v11138_v23 = vadd.f32 %v8935_v62, %v4823_v37 }
 0xcf3   :  { %vm4777_vm9 = vcmp.gt.f32.partialorder %v4635_v27, 0.0  ;;  %v4801_v20 = vmul.f32 0.2, %v4635_v27  ;;  %v4640_v50 = vpop.f32.mrb[162].mxu0  ;;  %v4868_v46 = vmax.f32 %v11122_v59, %v11127_v51  ;;  %v11142_v5 = vadd.f32 %v4824_v33, %v77_v29 }
 0xcf4   :  { %vm4778_vm4 = vcmp.gt.f32.partialorder %v4637_v48, 0.0  ;;  %v4802_v61 = vmul.f32 0.2, %v4637_v48  ;;  %v4641_v22 = vadd.f32 %v4640_v50, %v11070_v2  ;;  %v4642_v58 = vpop.f32.mrb[163].mxu0  ;;  %v7881_v13 = vpop.f32.mrb[136].mxu1  ;;  %v4872_v34 = vmax.f32 %v11133_v7, %v11138_v23  ;;  %v80_v50 = vld [vmem:[%s11837_s1 + $0x58] sm:$0xff] }
 0xcf5   :  { %v4825_v36 = vsel %vm4777_vm9, %v4635_v27, %v4801_v20  ;;  %v4643_v37 = vadd.f32 %v4642_v58, %v11073_v54  ;;  %v11149_v60 = vadd.f32 %v7881_v13, %v11075_v15  ;;  %v4869_v41 = vmax.f32 %v4868_v46, %v11109_v6  ;;  %v4749_v62 = vpop.f32.mrb[137].mxu1 }
 0xcf6   :  { %v4826_v29 = vsel %vm4778_vm4, %v4637_v48, %v4802_v61  ;;  %vm4780_vm1 = vcmp.gt.f32.partialorder %v4641_v22, 0.0  ;;  %v4804_v33 = vmul.f32 0.2, %v4641_v22  ;;  %v4750_v1 = vadd.f32 %v4749_v62, %v11075_v15 }
 0xcf7   :  { %vm4781_vm5 = vcmp.gt.f32.partialorder %v4643_v37, 0.0  ;;  %v4805_v57 = vmul.f32 0.2, %v4643_v37  ;;  %vm4785_vm8 = vcmp.gt.f32.partialorder %v11149_v60, 0.0  ;;  %v4809_v27 = vmul.f32 0.2, %v11149_v60  ;;  %4870 = vmax.xlane.f32.xlu0 %v4869_v41 }
 0xcf8   :  { %v4828_v20 = vsel %vm4780_vm1, %v4641_v22, %v4804_v33  ;;  %vm4782_vm12 = vcmp.gt.f32.partialorder %v4750_v1, 0.0  ;;  %v4806_v46 = vmul.f32 0.2, %v4750_v1  ;;  %v4646_v58 = vpop.f32.mrb[164].mxu0  ;;  %v4873_v48 = vmax.f32 %v4872_v34, %v11142_v5  ;;  %v8937_v34 = vld [vmem:[%s11837_s1 + $0x50] sm:$0xff] }
 0xcf9   :  { %v4829_v61 = vsel %vm4781_vm5, %v4643_v37, %v4805_v57  ;;  %v4647_v13 = vadd.f32 %v4646_v58, %v11070_v2  ;;  %v4648_v62 = vpop.f32.mrb[165].mxu0  ;;  %v4827_v40 = vsel %vm4779_vm6, %v11107_v39, %v4803_v47  ;;  %v11166_v3 = vadd.f32 %v8936_v55, %v4825_v36  ;;  %v83_v39 = vld [vmem:[%s11837_s1 + $0x70] sm:$0xff]  ;;  %v8938_v36 = vld [vmem:[%s11837_s1 + $0x60] sm:$0xff] }
 0xcfa   :  { %v4649_v22 = vadd.f32 %v4648_v62, %v11073_v54  ;;  %v11172_v57 = vadd.f32 %v8937_v34, %v4826_v29  ;;  %v11174_v37 = vadd.f32 %v4827_v40, %v80_v50  ;;  %v4830_v47 = vsel %vm4782_vm12, %v4750_v1, %v4806_v46  ;;  %v8939_v40 = vld [vmem:[%s11837_s1 + $0x68] sm:$0xff] }
 0xcfb   :  { %vm4783_vm13 = vcmp.gt.f32.partialorder %v4647_v13, 0.0  ;;  %v4807_v41 = vmul.f32 0.2, %v4647_v13  ;;  %4874 = vmax.xlane.f32.xlu0 %v4873_v48  ;;  %v4652_v55 = vpop.f32.mrb[166].mxu0  ;;  %v11182_v33 = vadd.f32 %v8938_v36, %v4828_v20  ;;  %v11187_v29 = vadd.f32 %v8939_v40, %v4829_v61 }
 0xcfc   :  { %vm4784_vm14 = vcmp.gt.f32.partialorder %v4649_v22, 0.0  ;;  %v4808_v50 = vmul.f32 0.2, %v4649_v22  ;;  %v4653_v1 = vadd.f32 %v4652_v55, %v11070_v2  ;;  %v4654_v46 = vpop.f32.mrb[167].mxu0  ;;  %v7884_v58 = vpop.f32.mrb[138].mxu1  ;;  %v4876_v48 = vmax.f32 %v11166_v3, %v11172_v57 }
 0xcfd   :  { %v4831_v62 = vsel %vm4783_vm13, %v4647_v13, %v4807_v41  ;;  %v4655_v34 = vadd.f32 %v4654_v46, %v11073_v54  ;;  %v4765_v20 = vadd.f32 %v7884_v58, %v11075_v15  ;;  %v4759_v36 = vpop.f32.mrb[139].mxu1  ;;  %v11194_v16 = vadd.f32 %v4830_v47, %v83_v39 }
 0xcfe   :  { %v4832_v11 = vsel %vm4784_vm14, %v4649_v22, %v4808_v50  ;;  %vm4786_vm2 = vcmp.gt.f32.partialorder %v4653_v1, 0.0  ;;  %v4810_v61 = vmul.f32 0.2, %v4653_v1  ;;  %v4877_v40 = vmax.f32 %v4876_v48, %v11174_v37  ;;  %v86_v22 = vld [vmem:[%s11837_s1 + $0x88] sm:$0xff]  ;;  %v8941_v48 = vld [vmem:[%s11837_s1 + $0x80] sm:$0xff] }
 0xcff   :  { %vm4787_vm15 = vcmp.gt.f32.partialorder %v4655_v34, 0.0  ;;  %v4811_v55 = vmul.f32 0.2, %v4655_v34  ;;  %vm4791_vm6 = vcmp.gt.f32.partialorder %v4765_v20, 0.0  ;;  %v4815_v8 = vmul.f32 0.2, %v4765_v20 }
 0xd00   :  { %v4834_v21 = vsel %vm4786_vm2, %v4653_v1, %v4810_v61  ;;  %4878 = vmax.xlane.f32.xlu1 %v4877_v40  ;;  %v4760_v13 = vadd.f32 %v4759_v36, %v11075_v15  ;;  %v4658_v41 = vpop.f32.mrb[168].mxu0  ;;  %v4880_v46 = vmax.f32 %v11182_v33, %v11187_v29  ;;  %v4833_v39 = vsel %vm4785_vm8, %v11149_v60, %v4809_v27  ;;  %v8940_v15 = vld [vmem:[%s11837_s1 + $0x78] sm:$0xff] }
 0xd01   :  { %v4835_v47 = vsel %vm4787_vm15, %v4655_v34, %v4811_v55  ;;  %v4659_v50 = vadd.f32 %v4658_v41, %v11070_v2  ;;  %v4660_v58 = vpop.f32.mrb[169].mxu0  ;;  %v11210_v1 = vadd.f32 %v8940_v15, %v4831_v62  ;;  %v11215_v36 = vadd.f32 %v8941_v48, %v4832_v11  ;;  %v89_v2 = vld [vmem:[%s11837_s1 + $0xa0] sm:$0xff] }
 0xd02   :  { %vm4788_vm7 = vcmp.gt.f32.partialorder %v4760_v13, 0.0  ;;  %v4812_v61 = vmul.f32 0.2, %v4760_v13  ;;  %v4661_v60 = vadd.f32 %v4660_v58, %v11073_v54  ;;  %v4881_v27 = vmax.f32 %v4880_v46, %v11194_v16  ;;  %v8942_v54 = vld [vmem:[%s11837_s1 + $0x90] sm:$0xff]  ;;  %v11234_v46 = vld [vmem:[%s11847_s18 + $0xc0] sm:$0xff] }
 0xd03   :  { %vm4789_vm9 = vcmp.gt.f32.partialorder %v4659_v50, 0.0  ;;  %v4813_v34 = vmul.f32 0.2, %v4659_v50  ;;  %v11222_v62 = vadd.f32 %v4833_v39, %v86_v22  ;;  %v4884_v40 = vmax.f32 %v11210_v1, %v11215_v36  ;;  %v11239_v22 = vld [vmem:[%s11847_s18 + $0xc8] sm:$0xff]  ;;  %v11252_v48 = vld [vmem:[%s11847_s18 + $0x40] sm:$0xff] }
 0xd04   :  { %vm4790_vm4 = vcmp.gt.f32.partialorder %v4661_v60, 0.0  ;;  %v4814_v11 = vmul.f32 0.2, %v4661_v60  ;;  %4882 = vmax.xlane.f32.xlu0 %v4881_v27  ;;  %v4836_v55 = vsel %vm4788_vm7, %v4760_v13, %v4812_v61  ;;  %v11229_v41 = vadd.f32 %v8942_v54, %v4834_v21  ;;  %12120 = vst [vmem:[#allocation51_spill] sm:$0xff] %v11239_v22  ;;  %v8943_v13 = vld [vmem:[%s11837_s1 + $0x98] sm:$0xff]  ;;  %v11257_v61 = vld [vmem:[%s11847_s18 + $0x48] sm:$0xff] }
 0xd05   :  { %v4837_v39 = vsel %vm4789_vm9, %v4659_v50, %v4813_v34  ;;  %v4885_v58 = vmax.f32 %v4884_v40, %v11222_v62  ;;  %v11245_v15 = vadd.f32 %v8943_v13, %v4835_v47  ;;  %v11247_v21 = vadd.f32 %v4836_v55, %v89_v2  ;;  %v92_v27 = vld [vmem:[%s11837_s1 + $0xb8] sm:$0xff]  ;;  %v8944_v2 = vld [vmem:[%s11837_s1 + $0xa8] sm:$0xff]  ;;  %v11273_v55 = vld [vmem:[%s11847_s18 + $0x140] sm:$0xff] }
 0xd06   :  { %v4838_v50 = vsel %vm4790_vm4, %v4661_v60, %v4814_v11  ;;  %v4839_v47 = vsel %vm4791_vm6, %v4765_v20, %v4815_v8  ;;  %v11266_v34 = vadd.f32 %v8944_v2, %v4837_v39  ;;  %v8355_v40 = vpack.c.bf16 %v11239_v22, %v11234_v46  ;;  %12121 = vst [vmem:[#allocation37_spill] sm:$0xff] %v11273_v55  ;;  %v11278_v60 = vld [vmem:[%s11847_s18 + $0x148] sm:$0xff]  ;;  %v8945_v20 = vld [vmem:[%s11837_s1 + $0xb0] sm:$0xff]  ;;  %v11299_v13 = vld [vmem:[%s11847_s18 + $0xd8] sm:$0xff] }
 0xd07   :  { %12122 = vst [vmem:[#allocation45_spill] sm:$0xff] %v11278_v60  ;;  %4886 = vmax.xlane.f32.xlu1 %v4885_v58  ;;  %v4888_v8 = vmax.f32 %v11229_v41, %v11245_v15  ;;  %v11285_v11 = vadd.f32 %v8945_v20, %v4838_v50  ;;  %v8357_v54 = vpack.c.bf16 %v11257_v61, %v11252_v48  ;;  %v11294_v58 = vld [vmem:[%s11847_s18 + $0xd0] sm:$0xff]  ;;  %12124 = vst [vmem:[#allocation52_spill] sm:$0xff] %v11299_v13 }
 0xd08   :  { %8356 = vmatprep.subr.bf16.mxu0 %v8355_v40  ;;  %v8387_v39 = vpack.c.bf16 %v11278_v60, %v11273_v55  ;;  %12123 = vst [vmem:[#allocation30_spill] sm:$0xff] %v11294_v58  ;;  %v11302_v2 = vadd.f32 %v4839_v47, %v92_v27  ;;  %v8359_v20 = vpack.c.bf16 %v11299_v13, %v11294_v58  ;;  %v11311_v60 = vld [vmem:[%s11847_s18 + $0x50] sm:$0xff]  ;;  %v11316_v55 = vld [vmem:[%s11847_s18 + $0x58] sm:$0xff] }
 0xd09   :  { %v4889_v50 = vmax.f32 %v4888_v8, %v11247_v21  ;;  %v4892_v40 = vmax.f32 %v11266_v34, %v11285_v11  ;;  %8358 = vmatpush3.bf16.msra.mxu0 %v8357_v54  ;;  %v8361_v27 = vpack.c.bf16 %v11316_v55, %v11311_v60  ;;  %v11324_v8 = vld [vmem:[%s11847_s18 + $0x150] sm:$0xff]  ;;  %v11329_v54 = vld [vmem:[%s11847_s18 + $0x158] sm:$0xff] }
 0xd0a   :  { %8388 = vmatprep.subr.bf16.mxu1 %v8387_v39  ;;  %8360 = vmatprep.subr.bf16.mxu0 %v8359_v20  ;;  %12125 = vst [vmem:[#allocation38_spill] sm:$0xff] %v11324_v8  ;;  %12126 = vst [vmem:[#allocation46_spill] sm:$0xff] %v11329_v54  ;;  %v8391_v63 = vpack.c.bf16 %v11329_v54, %v11324_v8  ;;  %v11353_v54 = vld [vmem:[%s11847_s18 + $0x68] sm:$0xff] }
 0xd0b   :  { %4890 = vmax.xlane.f32.xlu0 %v4889_v50  ;;  %v4893_v47 = vmax.f32 %v4892_v40, %v11302_v2  ;;  %8390 = vmatpush3.bf16.msra.mxu1 %v8387_v39  ;;  %v11336_v50 = vld [vmem:[%s11847_s18 + $0xe0] sm:$0xff]  ;;  %v11341_v40 = vld [vmem:[%s11847_s18 + $0xe8] sm:$0xff] }
 0xd0c   :  { %12127 = vst [vmem:[#allocation31_spill] sm:$0xff] %v11336_v50  ;;  %12128 = vst [vmem:[#allocation53_spill] sm:$0xff] %v11341_v40  ;;  %v8363_v20 = vpack.c.bf16 %v11341_v40, %v11336_v50  ;;  %v11348_v39 = vld [vmem:[%s11847_s18 + $0x60] sm:$0xff]  ;;  %8392 = vmatprep.subr.bf16.mxu1 %v8391_v63 }
 0xd0d   :  { %4894 = vmax.xlane.f32.xlu1 %v4893_v47  ;;  %8362 = vmatpush3.bf16.msra.mxu0 %v8361_v27  ;;  %v8365_v8 = vpack.c.bf16 %v11353_v54, %v11348_v39  ;;  %v11360_v27 = vld [vmem:[%s11847_s18 + $0x160] sm:$0xff]  ;;  %v11365_v47 = vld [vmem:[%s11847_s18 + $0x168] sm:$0xff] }
 0xd0e   :  { %8364 = vmatprep.subr.bf16.mxu0 %v8363_v20  ;;  %12129 = vst [vmem:[#allocation39_spill] sm:$0xff] %v11360_v27  ;;  %12130 = vst [vmem:[#allocation47_spill] sm:$0xff] %v11365_v47  ;;  %v8395_v32 = vpack.c.bf16 %v11365_v47, %v11360_v27  ;;  %v11377_v20 = vld [vmem:[%s11847_s18 + $0xf8] sm:$0xff] }
 0xd0f   :  { %8394 = vmatpush3.bf16.msra.mxu1 %v8391_v63  ;;  %12132 = vst [vmem:[#allocation54_spill] sm:$0xff] %v11377_v20  ;;  %v8367_v38 = vpack.c.bf16 %v11377_v20, %v11372_v52  ;;  %v11384_v63 = vld [vmem:[%s11847_s18 + $0x70] sm:$0xff]  ;;  %v11389_v47 = vld [vmem:[%s11847_s18 + $0x78] sm:$0xff] }
 0xd10   :  { %8396 = vmatprep.subr.bf16.mxu1 %v8395_v32  ;;  %v8369_v27 = vpack.c.bf16 %v11389_v47, %v11384_v63 }
 0xd11   :  { %8366 = vmatpush3.bf16.msra.mxu0 %v8365_v8  ;;  %v11396_v8 = vld [vmem:[%s11847_s18 + $0x170] sm:$0xff] }
 0xd12   :  { %8368 = vmatprep.subr.bf16.mxu0 %v8367_v38  ;;  %12133 = vst [vmem:[#allocation40_spill] sm:$0xff] %v11396_v8  ;;  %v8399_v9 = vpack.c.bf16 %v11401_v18, %v11396_v8  ;;  %v11408_v38 = vld [vmem:[%s11848_s19] sm:$0x3f] }
 0xd13   :  { %8398 = vmatpush3.bf16.msra.mxu1 %v8395_v32 }
 0xd14   :  { %8400 = vmatprep.subr.bf16.mxu1 %v8399_v9 }
 0xd15   :  { %8370 = vmatpush3.bf16.msra.mxu0 %v8369_v27 }
 0xd17   :  { %8402 = vmatpush3.bf16.msra.mxu1 %v8399_v9 }
 0xd18   :  { %7929 = vmatprep.subr.msk.mxu1 %vm4540_vm10, %v11408_v38 }
 0xd7f   :  { %v4867_v19 = vpop.xlane.xlu1 %4866 }
 0xd80   :  { %v4896_v35 = vsub.f32 %v11088_v24, %v4867_v19  ;;  %v4897_v20 = vsub.f32 %v11094_v17, %v4867_v19  ;;  %v4898_v32 = vsub.f32 %v11100_v45, %v4867_v19 }
 0xd82   :  { %v4920_v52 = vmul.f32 1.442695, %v4896_v35  ;;  %v4922_v18 = vmul.f32 1.442695, %v4897_v20  ;;  %v4924_v27 = vmul.f32 1.442695, %v4898_v32 }
 0xd84   :  { %8800 = vpow2.f32 %v4920_v52  ;;  %v4871_v9 = vpop.xlane.xlu0 %4870 }
 0xd85   :  { %8802 = vpow2.f32 %v4922_v18  ;;  %v4899_v8 = vsub.f32 %v11122_v59, %v4871_v9  ;;  %v4900_v40 = vsub.f32 %v11127_v51, %v4871_v9  ;;  %v4901_v50 = vsub.f32 %v11109_v6, %v4871_v9 }
 0xd86   :  { %8804 = vpow2.f32 %v4924_v27 }
 0xd87   :  { %v4926_v13 = vmul.f32 1.442695, %v4899_v8  ;;  %v4928_v58 = vmul.f32 1.442695, %v4900_v40  ;;  %v4930_v24 = vmul.f32 1.442695, %v4901_v50 }
 0xd88   :  { %v4875_v22 = vpop.xlane.xlu0 %4874 }
 0xd89   :  { %8806 = vpow2.f32 %v4926_v13  ;;  %v4902_v19 = vsub.f32 %v11133_v7, %v4875_v22  ;;  %v4903_v35 = vsub.f32 %v11138_v23, %v4875_v22  ;;  %v4904_v52 = vsub.f32 %v11142_v5, %v4875_v22 }
 0xd8a   :  { %8808 = vpow2.f32 %v4928_v58 }
 0xd8b   :  { %8810 = vpow2.f32 %v4930_v24  ;;  %v4932_v18 = vmul.f32 1.442695, %v4902_v19  ;;  %v4934_v17 = vmul.f32 1.442695, %v4903_v35  ;;  %v4936_v45 = vmul.f32 1.442695, %v4904_v52 }
 0xd8d   :  { %8812 = vpow2.f32 %v4932_v18  ;;  %v4879_v59 = vpop.xlane.xlu1 %4878 }
 0xd8e   :  { %v11421_v6 = vpop.eup %8800  ;;  %8814 = vpow2.f32 %v4934_v17  ;;  %v4905_v51 = vsub.f32 %v11166_v3, %v4879_v59  ;;  %v4906_v13 = vsub.f32 %v11172_v57, %v4879_v59  ;;  %v4907_v7 = vsub.f32 %v11174_v37, %v4879_v59 }
 0xd8f   :  { %v11426_v50 = vpop.eup %8802  ;;  %8816 = vpow2.f32 %v4936_v45 }
 0xd90   :  { %v11428_v23 = vpop.eup %8804  ;;  %v4938_v5 = vmul.f32 1.442695, %v4905_v51  ;;  %v4940_v22 = vmul.f32 1.442695, %v4906_v13  ;;  %v4942_v58 = vmul.f32 1.442695, %v4907_v7  ;;  %5032 = vmatprep.mubr.f32.mxu0 %v11426_v50 }
 0xd91   :  { %v4883_v40 = vpop.xlane.xlu0 %4882  ;;  %7917 = vmatprep.mubr.f32.mxu1 %v11428_v23  ;;  %5033 = vmatmul.mubr.f32.vlgmr.msra.gmra.mrb[170].mxu0 %v11421_v6 }
 0xd92   :  { %8818 = vpow2.f32 %v4938_v5  ;;  %v4908_v3 = vsub.f32 %v11182_v33, %v4883_v40  ;;  %v4909_v57 = vsub.f32 %v11187_v29, %v4883_v40  ;;  %v4910_v37 = vsub.f32 %v11194_v16, %v4883_v40 }
 0xd93   :  { %v11436_v20 = vpop.eup %8806  ;;  %8820 = vpow2.f32 %v4940_v22 }
 0xd94   :  { %v11438_v8 = vpop.eup %8808  ;;  %8822 = vpow2.f32 %v4942_v58  ;;  %v4944_v32 = vmul.f32 1.442695, %v4908_v3  ;;  %v4946_v27 = vmul.f32 1.442695, %v4909_v57  ;;  %v4948_v9 = vmul.f32 1.442695, %v4910_v37  ;;  %v4887_v24 = vpop.xlane.xlu1 %4886 }
 0xd95   :  { %v11440_v19 = vpop.eup %8810  ;;  %5037 = vmatprep.mubr.f32.mxu0 %v11438_v8  ;;  %v4911_v33 = vsub.f32 %v11210_v1, %v4887_v24  ;;  %v4912_v29 = vsub.f32 %v11215_v36, %v4887_v24  ;;  %v4913_v16 = vsub.f32 %v11222_v62, %v4887_v24 }
 0xd96   :  { %8824 = vpow2.f32 %v4944_v32  ;;  %7918 = vmatmul.mubr.f32.vlgmr.msra.gmra.mrb[140].mxu1 %v11440_v19  ;;  %5038 = vmatmul.mubr.f32.gmra.mrb[172].mxu0 %v11436_v20 }
 0xd97   :  { %v11448_v35 = vpop.eup %8812  ;;  %8826 = vpow2.f32 %v4946_v27  ;;  %v4950_v52 = vmul.f32 1.442695, %v4911_v33  ;;  %v4952_v18 = vmul.f32 1.442695, %v4912_v29  ;;  %v4954_v17 = vmul.f32 1.442695, %v4913_v16  ;;  %7930 = vmatpush3.msk.msra.mxu1 %vm4540_vm10, %v11408_v38 }
 0xd98   :  { %v11452_v45 = vpop.eup %8814  ;;  %8828 = vpow2.f32 %v4948_v9  ;;  %v4891_v1 = vpop.xlane.xlu0 %4890 }
 0xd99   :  { %v11454_v36 = vpop.eup %8816  ;;  %8830 = vpow2.f32 %v4950_v52  ;;  %v4914_v62 = vsub.f32 %v11229_v41, %v4891_v1  ;;  %v4915_v59 = vsub.f32 %v11245_v15, %v4891_v1  ;;  %v4916_v51 = vsub.f32 %v11247_v21, %v4891_v1  ;;  %5042 = vmatprep.mubr.f32.mxu0 %v11452_v45 }
 0xd9a   :  { %8832 = vpow2.f32 %v4952_v18  ;;  %7920 = vmatprep.mubr.f32.mxu1 %v11454_v36  ;;  %5043 = vmatmul.mubr.f32.gmra.mrb[174].mxu0 %v11448_v35  ;;  %v4895_v13 = vpop.xlane.xlu1 %4894 }
 0xd9b   :  { %8834 = vpow2.f32 %v4954_v17  ;;  %v4956_v7 = vmul.f32 1.442695, %v4914_v62  ;;  %v4958_v5 = vmul.f32 1.442695, %v4915_v59  ;;  %v4960_v22 = vmul.f32 1.442695, %v4916_v51 }
 0xd9c   :  { %v11462_v58 = vpop.eup %8818  ;;  %v4917_v41 = vsub.f32 %v11266_v34, %v4895_v13  ;;  %v4918_v15 = vsub.f32 %v11285_v11, %v4895_v13  ;;  %v4919_v21 = vsub.f32 %v11302_v2, %v4895_v13 }
 0xd9d   :  { %v11467_v40 = vpop.eup %8820  ;;  %8836 = vpow2.f32 %v4956_v7 }
 0xd9e   :  { %v11469_v3 = vpop.eup %8822  ;;  %8838 = vpow2.f32 %v4958_v5  ;;  %5047 = vmatprep.mubr.f32.mxu0 %v11467_v40  ;;  %v4962_v57 = vmul.f32 1.442695, %v4917_v41  ;;  %v4964_v37 = vmul.f32 1.442695, %v4918_v15  ;;  %v4966_v32 = vmul.f32 1.442695, %v4919_v21 }
 0xd9f   :  { %8840 = vpow2.f32 %v4960_v22  ;;  %7921 = vmatmul.mubr.f32.gmra.mrb[142].mxu1 %v11469_v3  ;;  %5048 = vmatmul.mubr.f32.gmra.mrb[176].mxu0 %v11462_v58 }
 0xda0   :  { %v11474_v34 = vpop.eup %8824  ;;  %8842 = vpow2.f32 %v4962_v57 }
 0xda1   :  { %v11476_v11 = vpop.eup %8826  ;;  %8844 = vpow2.f32 %v4964_v37 }
 0xda2   :  { %v11478_v2 = vpop.eup %8828  ;;  %8846 = vpow2.f32 %v4966_v32  ;;  %5052 = vmatprep.mubr.f32.mxu0 %v11476_v11 }
 0xda3   :  { %v11481_v27 = vpop.eup %8830  ;;  %7923 = vmatprep.mubr.f32.mxu1 %v11478_v2  ;;  %5053 = vmatmul.mubr.f32.gmra.mrb[178].mxu0 %v11474_v34 }
 0xda4   :  { %v11485_v9 = vpop.eup %8832 }
 0xda5   :  { %v11487_v24 = vpop.eup %8834  ;;  %5057 = vmatprep.mubr.f32.mxu0 %v11485_v9 }
 0xda6   :  { %7924 = vmatmul.mubr.f32.gmra.mrb[144].mxu1 %v11487_v24 }
 0xda7   :  { %v11491_v33 = vpop.eup %8836  ;;  %5058 = vmatmul.mubr.f32.gmra.mrb[180].mxu0 %v11481_v27 }
 0xda8   :  { %v11494_v29 = vpop.eup %8838 }
 0xda9   :  { %v11496_v16 = vpop.eup %8840  ;;  %5062 = vmatprep.mubr.f32.mxu0 %v11494_v29 }
 0xdaa   :  { %v11499_v52 = vpop.eup %8842  ;;  %7926 = vmatprep.mubr.f32.mxu1 %v11496_v16 }
 0xdab   :  { %v11502_v18 = vpop.eup %8844  ;;  %5063 = vmatmul.mubr.f32.gmra.mrb[182].mxu0 %v11491_v33 }
 0xdac   :  { %v11505_v17 = vpop.eup %8846  ;;  %5067 = vmatprep.mubr.f32.mxu0 %v11502_v18 }
 0xdad   :  { %7927 = vmatmul.mubr.f32.gmra.mrb[146].mxu1 %v11505_v17 }
 0xdae   :  { %7931 = vmatprep.mubr.msk.f32.mxu1 %vm4515_vm0, %v10931_v31  ;;  %v12137_v31 = vld [vmem:[#allocation52_spill] sm:$0xff] }
 0xdaf   :  { %5068 = vmatmul.mubr.f32.gmra.mrb[184].mxu0 %v11499_v52 }
 0xdb0   :  { %5742 = vmatprep.mubr.f32.mxu0 %v11426_v50 }
 0xdb1   :  { %7932 = vmatmul.mubr.msk.f32.vlgmr.msra.gmra.mrb[148].mxu1 %vm4515_vm0, %v10938_v0  ;;  %v12138_v0 = vld [vmem:[#allocation31_spill] sm:$0xff] }
 0xdb2   :  { %7934 = vmatprep.mubr.msk.f32.mxu1 %vm4515_vm0, %v10967_v49  ;;  %v12141_v49 = vld [vmem:[#allocation54_spill] sm:$0xff] }
 0xdb5   :  { %7935 = vmatmul.mubr.msk.f32.gmra.mrb[150].mxu1 %vm4515_vm0, %v10974_v25  ;;  %v12142_v25 = vld [vmem:[#allocation49_spill] sm:$0xff] }
 0xdb6   :  { %7937 = vmatprep.mubr.msk.f32.mxu1 %vm4515_vm0, %v11003_v53  ;;  %v12145_v53 = vld [vmem:[#allocation28_spill] sm:$0xff] }
 0xdb9   :  { %7938 = vmatmul.mubr.msk.f32.gmra.mrb[152].mxu1 %vm4515_vm0, %v11010_v28  ;;  %v12146_v28 = vld [vmem:[#allocation50_spill] sm:$0xff] }
 0xdba   :  { %7940 = vmatprep.mubr.msk.f32.mxu1 %vm4515_vm0, %v11051_v56  ;;  %v12149_v56 = vld [vmem:[#allocation29_spill] sm:$0xff] }
 0xdbd   :  { %7941 = vmatmul.mubr.msk.f32.gmra.mrb[154].mxu1 %vm4515_vm0, %v11056_v12  ;;  %v12150_v12 = vld [vmem:[#allocation37_spill] sm:$0xff] }
 0xdbe   :  { %7943 = vmatprep.mubr.msk.f32.mxu1 %vm4515_vm0, %v11252_v48  ;;  %v12152_v48 = vld [vmem:[#allocation38_spill] sm:$0xff] }
 0xdc1   :  { %7944 = vmatmul.mubr.msk.f32.gmra.mrb[156].mxu1 %vm4515_vm0, %v11257_v61  ;;  %v12153_v61 = vld [vmem:[#allocation46_spill] sm:$0xff] }
 0xdc2   :  { %7946 = vmatprep.mubr.msk.f32.mxu1 %vm4515_vm0, %v11311_v60  ;;  %v12155_v60 = vld [vmem:[#allocation47_spill] sm:$0xff] }
 0xdc5   :  { %7947 = vmatmul.mubr.msk.f32.gmra.mrb[158].mxu1 %vm4515_vm0, %v11316_v55  ;;  %v12154_v55 = vld [vmem:[#allocation39_spill] sm:$0xff] }
 0xdc6   :  { %7949 = vmatprep.mubr.msk.f32.mxu1 %vm4515_vm0, %v11348_v39  ;;  %v12157_v39 = vld [vmem:[#allocation7_spill] sm:$0xff] }
 0xdc9   :  { %7950 = vmatmul.mubr.msk.f32.gmra.mrb[160].mxu1 %vm4515_vm0, %v11353_v54  ;;  %v12156_v54 = vld [vmem:[#allocation40_spill] sm:$0xff] }
 0xdca   :  { %7952 = vmatprep.mubr.msk.f32.mxu1 %vm4515_vm0, %v11384_v63 }
 0xdcd   :  { %7953 = vmatmul.mubr.msk.f32.gmra.mrb[162].mxu1 %vm4515_vm0, %v11389_v47 }
 0xdce   :  { %7955 = vmatprep.mubr.msk.f32.mxu1 %vm4515_vm0, %v10921_v4  ;;  %v12135_v4 = vld [vmem:[#allocation51_spill] sm:$0xff] }
 0xdd1   :  { %7956 = vmatmul.mubr.msk.f32.gmra.mrb[164].mxu1 %vm4515_vm0, %v10926_v30  ;;  %v12136_v30 = vld [vmem:[#allocation30_spill] sm:$0xff] }
 0xdd2   :  { %7958 = vmatprep.mubr.msk.f32.mxu1 %vm4515_vm0, %v10957_v26  ;;  %v12139_v26 = vld [vmem:[#allocation53_spill] sm:$0xff] }
 0xdd5   :  { %7959 = vmatmul.mubr.msk.f32.gmra.mrb[166].mxu1 %vm4515_vm0, %v10962_v42  ;;  %v12140_v42 = vld [vmem:[#allocation32_spill] sm:$0xff] }
 0xdd6   :  { %7961 = vmatprep.mubr.msk.f32.mxu1 %vm4515_vm0, %v10993_v14  ;;  %v12143_v14 = vld [vmem:[#allocation35_spill] sm:$0xff] }
 0xdd9   :  { %7962 = vmatmul.mubr.msk.f32.gmra.mrb[168].mxu1 %vm4515_vm0, %v10998_v43  ;;  %v12144_v43 = vld [vmem:[#allocation43_spill] sm:$0xff] }
 0xdda   :  { %7964 = vmatprep.mubr.msk.f32.mxu1 %vm4515_vm0, %v11027_v10  ;;  %v12147_v10 = vld [vmem:[#allocation36_spill] sm:$0xff] }
 0xddd   :  { %7965 = vmatmul.mubr.msk.f32.gmra.mrb[170].mxu1 %vm4515_vm0, %v11032_v44  ;;  %v12148_v44 = vld [vmem:[#allocation44_spill] sm:$0xff] }
 0xdde   :  { %7967 = vmatprep.mubr.msk.f32.mxu1 %vm4515_vm0, %v11234_v46  ;;  %v12151_v46 = vld [vmem:[#allocation45_spill] sm:$0xff] }
 0xde1   :  { %7968 = vmatmul.mubr.msk.f32.gmra.mrb[172].mxu1 %vm4515_vm0, %v12135_v4 }
 0xde2   :  { %7970 = vmatprep.mubr.msk.f32.mxu1 %vm4515_vm0, %v12136_v30 }
 0xde5   :  { %7971 = vmatmul.mubr.msk.f32.gmra.mrb[174].mxu1 %vm4515_vm0, %v12137_v31 }
 0xde6   :  { %7973 = vmatprep.mubr.msk.f32.mxu1 %vm4515_vm0, %v12138_v0 }
 0xde9   :  { %7974 = vmatmul.mubr.msk.f32.gmra.mrb[176].mxu1 %vm4515_vm0, %v12139_v26 }
 0xdea   :  { %7976 = vmatprep.mubr.msk.f32.mxu1 %vm4515_vm0, %v12140_v42 }
 0xded   :  { %7977 = vmatmul.mubr.msk.f32.gmra.mrb[178].mxu1 %vm4515_vm0, %v12141_v49 }
 0xdee   :  { %7979 = vmatprep.mubr.msk.f32.mxu1 %vm4515_vm0, %v12142_v25 }
 0xdf1   :  { %7980 = vmatmul.mubr.msk.f32.gmra.mrb[180].mxu1 %vm4515_vm0, %v12143_v14 }
 0xdf2   :  { %7982 = vmatprep.mubr.msk.f32.mxu1 %vm4515_vm0, %v12144_v43 }
 0xdf5   :  { %7983 = vmatmul.mubr.msk.f32.gmra.mrb[182].mxu1 %vm4515_vm0, %v12145_v53 }
 0xdf6   :  { %7985 = vmatprep.mubr.msk.f32.mxu1 %vm4515_vm0, %v12146_v28 }
 0xdf9   :  { %7986 = vmatmul.mubr.msk.f32.gmra.mrb[184].mxu1 %vm4515_vm0, %v12147_v10 }
 0xdfa   :  { %7988 = vmatprep.mubr.msk.f32.mxu1 %vm4515_vm0, %v12148_v44 }
 0xdfd   :  { %7989 = vmatmul.mubr.msk.f32.gmra.mrb[186].mxu1 %vm4515_vm0, %v12149_v56 }
 0xdfe   :  { %7991 = vmatprep.mubr.msk.f32.mxu1 %vm4515_vm0, %v12150_v12 }
 0xe01   :  { %7992 = vmatmul.mubr.msk.f32.gmra.mrb[188].mxu1 %vm4515_vm0, %v12151_v46 }
 0xe02   :  { %7994 = vmatprep.mubr.msk.f32.mxu1 %vm4515_vm0, %v12152_v48 }
 0xe05   :  { %7995 = vmatmul.mubr.msk.f32.gmra.mrb[190].mxu1 %vm4515_vm0, %v12153_v61 }
 0xe06   :  { %7997 = vmatprep.mubr.msk.f32.mxu1 %vm4515_vm0, %v12154_v55 }
 0xe09   :  { %7998 = vmatmul.mubr.msk.f32.gmra.mrb[192].mxu1 %vm4515_vm0, %v12155_v60 }
 0xe0a   :  { %8000 = vmatprep.mubr.msk.f32.mxu1 %vm4515_vm0, %v12156_v54 }
 0xe0d   :  { %8001 = vmatmul.mubr.msk.f32.gmra.mrb[194].mxu1 %vm4515_vm0, %v12157_v39 }
 0xe64   :  { %v7400_v47 = vpop.f32.mrb[170].mxu0 }
 0xe65   :  { %v7401_v63 = vpop.f32.mrb[171].mxu0 }
 0xe66   :  { %v7402_v50 = vadd.f32 %v7401_v63, %v7400_v47  ;;  %v12158_v47 = vld [vmem:[#allocation41_spill] sm:$0xff] }
 0xe69   :  { %v7919_v1 = vpop.f32.mrb[140].mxu1  ;;  %v7403_v62 = vpop.f32.mrb[172].mxu0 }
 0xe6a   :  { %v5139_v59 = vpop.f32.mrb[141].mxu1  ;;  %v7404_v51 = vpop.f32.mrb[173].mxu0 }
 0xe6b   :  { %v11607_v13 = vadd.f32 %v7402_v50, %v5139_v59  ;;  %v7405_v7 = vadd.f32 %v7404_v51, %v7403_v62  ;;  %v12159_v62 = vld [vmem:[#allocation26_spill] sm:$0xff] }
 0xe6d   :  { %v11609_v5 = vadd.f32 %v7919_v1, %v7405_v7  ;;  %v7406_v22 = vpop.f32.mrb[174].mxu0  ;;  %8848 = vrcp.f32 %v11607_v13  ;;  %v6045_v13 = vld [vmem:[%s11849_s20 + $0x20] sm:$0xff] }
 0xe6e   :  { %v7407_v41 = vpop.f32.mrb[175].mxu0 }
 0xe6f   :  { %v7408_v15 = vadd.f32 %v7407_v41, %v7406_v22  ;;  %v12160_v22 = vld [vmem:[#allocation48_spill] sm:$0xff]  ;;  %8850 = vrcp.f32 %v11609_v5  ;;  %v6046_v5 = vld [vmem:[%s11849_s20 + $0x28] sm:$0x3] }
 0xe72   :  { %v7922_v21 = vpop.f32.mrb[142].mxu1  ;;  %v7409_v57 = vpop.f32.mrb[176].mxu0 }
 0xe73   :  { %v5149_v37 = vpop.f32.mrb[143].mxu1  ;;  %v7410_v32 = vpop.f32.mrb[177].mxu0 }
 0xe74   :  { %v11611_v4 = vadd.f32 %v7408_v15, %v5149_v37  ;;  %v7411_v30 = vadd.f32 %v7410_v32, %v7409_v57 }
 0xe76   :  { %v11613_v31 = vadd.f32 %v7922_v21, %v7411_v30  ;;  %v7412_v0 = vpop.f32.mrb[178].mxu0  ;;  %v12161_v21 = vld [vmem:[#allocation34_spill] sm:$0xff]  ;;  %v12162_v30 = vld [vmem:[#allocation3_spill] sm:$0xff]  ;;  %8852 = vrcp.f32 %v11611_v4  ;;  %v8475_v4 = vpack.c.bf16 %v6046_v5, %v6045_v13 }
 0xe77   :  { %v7413_v26 = vpop.f32.mrb[179].mxu0 }
 0xe78   :  { %v7414_v42 = vadd.f32 %v7413_v26, %v7412_v0  ;;  %8854 = vrcp.f32 %v11613_v31 }
 0xe79   :  { %v7925_v49 = vpop.f32.mrb[144].mxu1 }
 0xe7a   :  { %v7415_v25 = vpop.f32.mrb[180].mxu0  ;;  %v5159_v14 = vpop.f32.mrb[145].mxu1 }
 0xe7b   :  { %v11615_v43 = vadd.f32 %v7414_v42, %v5159_v14  ;;  %v7416_v53 = vpop.f32.mrb[181].mxu0  ;;  %v12163_v42 = vld [vmem:[#allocation8_spill] sm:$0xff] }
 0xe7c   :  { %v7417_v28 = vadd.f32 %v7416_v53, %v7415_v25  ;;  %v12164_v53 = vld [vmem:[#allocation42_spill] sm:$0xff] }
 0xe7d   :  { %8856 = vrcp.f32 %v11615_v43 }
 0xe7e   :  { %v11617_v10 = vadd.f32 %v7925_v49, %v7417_v28  ;;  %v7418_v44 = vpop.f32.mrb[182].mxu0 }
 0xe7f   :  { %v7419_v56 = vpop.f32.mrb[183].mxu0 }
 0xe80   :  { %v7420_v12 = vadd.f32 %v7419_v56, %v7418_v44  ;;  %v7928_v46 = vpop.f32.mrb[146].mxu1  ;;  %v12165_v56 = vld [vmem:[#allocation27_spill] sm:$0xff]  ;;  %8858 = vrcp.f32 %v11617_v10 }
 0xe81   :  { %v5169_v48 = vpop.f32.mrb[147].mxu1 }
 0xe82   :  { %v7421_v61 = vpop.f32.mrb[184].mxu0  ;;  %v11619_v55 = vadd.f32 %v7420_v12, %v5169_v48 }
 0xe83   :  { %v7422_v60 = vpop.f32.mrb[185].mxu0 }
 0xe84   :  { %v7423_v54 = vadd.f32 %v7422_v60, %v7421_v61  ;;  %v7933_v39 = vpop.f32.mrb[148].mxu1  ;;  %8860 = vrcp.f32 %v11619_v55 }
 0xe85   :  { %v5631_v63 = vmul.f32 %v7933_v39, %v12158_v47  ;;  %v5391_v50 = vpop.f32.mrb[149].mxu1 }
 0xe86   :  { %v11622_v1 = vadd.f32 %v7928_v46, %v7423_v54  ;;  %v5630_v59 = vmul.f32 %v5391_v50, %v12159_v62 }
 0xe88   :  { %v8405_v51 = vpack.c.bf16 %v5631_v63, %v5630_v59  ;;  %v7936_v7 = vpop.f32.mrb[150].mxu1  ;;  %8862 = vrcp.f32 %v11622_v1 }
 0xe89   :  { %v5633_v41 = vmul.f32 %v7936_v7, %v12160_v22  ;;  %v5401_v15 = vpop.f32.mrb[151].mxu1 }
 0xe8a   :  { %v5632_v57 = vmul.f32 %v5401_v15, %v12161_v21 }
 0xe8c   :  { %v8409_v37 = vpack.c.bf16 %v5633_v41, %v5632_v57  ;;  %v7939_v32 = vpop.f32.mrb[152].mxu1 }
 0xe8d   :  { %v5635_v0 = vmul.f32 %v7939_v32, %v12162_v30  ;;  %v5411_v26 = vpop.f32.mrb[153].mxu1 }
 0xe8e   :  { %v5634_v49 = vmul.f32 %v5411_v26, %v12163_v42 }
 0xe90   :  { %v8413_v25 = vpack.c.bf16 %v5635_v0, %v5634_v49  ;;  %v7942_v14 = vpop.f32.mrb[154].mxu1 }
 0xe91   :  { %v5637_v28 = vmul.f32 %v7942_v14, %v12164_v53  ;;  %v5421_v44 = vpop.f32.mrb[155].mxu1 }
 0xe92   :  { %v5636_v12 = vmul.f32 %v5421_v44, %v12165_v56 }
 0xe94   :  { %v8417_v46 = vpack.c.bf16 %v5637_v28, %v5636_v12  ;;  %v7945_v48 = vpop.f32.mrb[156].mxu1 }
 0xe95   :  { %v5639_v61 = vmul.f32 %v7945_v48, %v12158_v47  ;;  %v5431_v60 = vpop.f32.mrb[157].mxu1 }
 0xe96   :  { %v5638_v54 = vmul.f32 %v5431_v60, %v12159_v62 }
 0xe98   :  { %v8421_v39 = vpack.c.bf16 %v5639_v61, %v5638_v54  ;;  %v7948_v63 = vpop.f32.mrb[158].mxu1 }
 0xe99   :  { %v5641_v50 = vmul.f32 %v7948_v63, %v12160_v22  ;;  %v5441_v59 = vpop.f32.mrb[159].mxu1 }
 0xe9a   :  { %v5640_v7 = vmul.f32 %v5441_v59, %v12161_v21 }
 0xe9c   :  { %v8425_v41 = vpack.c.bf16 %v5641_v50, %v5640_v7  ;;  %v7951_v15 = vpop.f32.mrb[160].mxu1 }
 0xe9d   :  { %v5643_v57 = vmul.f32 %v7951_v15, %v12162_v30  ;;  %v5451_v32 = vpop.f32.mrb[161].mxu1 }
 0xe9e   :  { %v5642_v0 = vmul.f32 %v5451_v32, %v12163_v42 }
 0xea0   :  { %v8429_v26 = vpack.c.bf16 %v5643_v57, %v5642_v0  ;;  %v7954_v49 = vpop.f32.mrb[162].mxu1 }
 0xea1   :  { %v11638_v14 = vmul.f32 %v7954_v49, %v12164_v53  ;;  %v5461_v28 = vpop.f32.mrb[163].mxu1 }
 0xea2   :  { %v5644_v44 = vmul.f32 %v5461_v28, %v12165_v56 }
 0xea4   :  { %v8433_v12 = vpack.c.bf16 %v11638_v14, %v5644_v44  ;;  %v7957_v48 = vpop.f32.mrb[164].mxu1 }
 0xea5   :  { %v5647_v61 = vmul.f32 %v7957_v48, %v12158_v47  ;;  %v5471_v60 = vpop.f32.mrb[165].mxu1 }
 0xea6   :  { %v5646_v54 = vmul.f32 %v5471_v60, %v12159_v62 }
 0xea8   :  { %v8403_v63 = vpack.c.bf16 %v5647_v61, %v5646_v54  ;;  %v7960_v50 = vpop.f32.mrb[166].mxu1 }
 0xea9   :  { %v5649_v59 = vmul.f32 %v7960_v50, %v12160_v22  ;;  %v5481_v7 = vpop.f32.mrb[167].mxu1 }
 0xeaa   :  { %v5648_v15 = vmul.f32 %v5481_v7, %v12161_v21  ;;  %8404 = vmatprep.subr.bf16.mxu0 %v8403_v63 }
 0xeab   :  { %8406 = vmatpush3.bf16.msra.mxu0 %v8405_v51 }
 0xeac   :  { %v8407_v57 = vpack.c.bf16 %v5649_v59, %v5648_v15  ;;  %v7963_v32 = vpop.f32.mrb[168].mxu1 }
 0xead   :  { %v5651_v0 = vmul.f32 %v7963_v32, %v12162_v30  ;;  %v5491_v49 = vpop.f32.mrb[169].mxu1 }
 0xeae   :  { %v5650_v14 = vmul.f32 %v5491_v49, %v12163_v42  ;;  %8408 = vmatprep.subr.bf16.mxu0 %v8407_v57 }
 0xeaf   :  { %8410 = vmatpush3.bf16.msra.mxu0 %v8409_v37 }
 0xeb0   :  { %v8411_v28 = vpack.c.bf16 %v5651_v0, %v5650_v14  ;;  %v7966_v44 = vpop.f32.mrb[170].mxu1 }
 0xeb1   :  { %v5653_v48 = vmul.f32 %v7966_v44, %v12164_v53  ;;  %v5501_v61 = vpop.f32.mrb[171].mxu1 }
 0xeb2   :  { %v5652_v60 = vmul.f32 %v5501_v61, %v12165_v56  ;;  %8412 = vmatprep.subr.bf16.mxu0 %v8411_v28 }
 0xeb3   :  { %8414 = vmatpush3.bf16.msra.mxu0 %v8413_v25 }
 0xeb4   :  { %v8415_v54 = vpack.c.bf16 %v5653_v48, %v5652_v60  ;;  %v7969_v51 = vpop.f32.mrb[172].mxu1 }
 0xeb5   :  { %v5655_v63 = vmul.f32 %v7969_v51, %v12158_v47  ;;  %v5511_v50 = vpop.f32.mrb[173].mxu1 }
 0xeb6   :  { %v5654_v59 = vmul.f32 %v5511_v50, %v12159_v62  ;;  %8416 = vmatprep.subr.bf16.mxu0 %v8415_v54 }
 0xeb7   :  { %8418 = vmatpush3.bf16.msra.mxu0 %v8417_v46 }
 0xeb8   :  { %v8419_v7 = vpack.c.bf16 %v5655_v63, %v5654_v59  ;;  %v7972_v37 = vpop.f32.mrb[174].mxu1 }
 0xeb9   :  { %v5657_v15 = vmul.f32 %v7972_v37, %v12160_v22  ;;  %v5521_v57 = vpop.f32.mrb[175].mxu1 }
 0xeba   :  { %v5656_v32 = vmul.f32 %v5521_v57, %v12161_v21  ;;  %8420 = vmatprep.subr.bf16.mxu0 %v8419_v7 }
 0xebb   :  { %8422 = vmatpush3.bf16.msra.mxu0 %v8421_v39 }
 0xebc   :  { %v8423_v0 = vpack.c.bf16 %v5657_v15, %v5656_v32  ;;  %v7975_v25 = vpop.f32.mrb[176].mxu1 }
 0xebd   :  { %v5659_v49 = vmul.f32 %v7975_v25, %v12162_v30  ;;  %v5531_v14 = vpop.f32.mrb[177].mxu1 }
 0xebe   :  { %v5658_v28 = vmul.f32 %v5531_v14, %v12163_v42  ;;  %8424 = vmatprep.subr.bf16.mxu0 %v8423_v0 }
 0xebf   :  { %8426 = vmatpush3.bf16.msra.mxu0 %v8425_v41 }
 0xec0   :  { %v8427_v44 = vpack.c.bf16 %v5659_v49, %v5658_v28  ;;  %v7978_v46 = vpop.f32.mrb[178].mxu1 }
 0xec1   :  { %v5661_v48 = vmul.f32 %v7978_v46, %v12164_v53  ;;  %v5541_v61 = vpop.f32.mrb[179].mxu1 }
 0xec2   :  { %v5660_v60 = vmul.f32 %v5541_v61, %v12165_v56  ;;  %8428 = vmatprep.subr.bf16.mxu0 %v8427_v44 }
 0xec3   :  { %8430 = vmatpush3.bf16.msra.mxu0 %v8429_v26 }
 0xec4   :  { %v8431_v54 = vpack.c.bf16 %v5661_v48, %v5660_v60  ;;  %v7981_v39 = vpop.f32.mrb[180].mxu1 }
 0xec5   :  { %v5663_v51 = vmul.f32 %v7981_v39, %v12158_v47  ;;  %v5551_v63 = vpop.f32.mrb[181].mxu1 }
 0xec6   :  { %v5662_v50 = vmul.f32 %v5551_v63, %v12159_v62  ;;  %8432 = vmatprep.subr.bf16.mxu0 %v8431_v54 }
 0xec7   :  { %8434 = vmatpush3.bf16.msra.mxu0 %v8433_v12 }
 0xec8   :  { %v8435_v59 = vpack.c.bf16 %v5663_v51, %v5662_v50  ;;  %v7984_v41 = vpop.f32.mrb[182].mxu1 }
 0xec9   :  { %v5665_v7 = vmul.f32 %v7984_v41, %v12160_v22  ;;  %v5561_v37 = vpop.f32.mrb[183].mxu1 }
 0xeca   :  { %v5664_v15 = vmul.f32 %v5561_v37, %v12161_v21  ;;  %5743 = vmatmul.mubr.f32.vlgmr.msra.gmra.mrb[186].mxu0 %v11421_v6  ;;  %8436 = vmatprep.subr.bf16.mxu0 %v8435_v59 }
 0xecb   :  { %5747 = vmatprep.mubr.f32.mxu0 %v11438_v8  ;;  %8438 = vmatpush3.bf16.msra.mxu0 %v8435_v59 }
 0xecc   :  { %v8439_v26 = vpack.c.bf16 %v5665_v7, %v5664_v15  ;;  %v7987_v57 = vpop.f32.mrb[184].mxu1 }
 0xecd   :  { %v5667_v32 = vmul.f32 %v7987_v57, %v12162_v30  ;;  %v5571_v0 = vpop.f32.mrb[185].mxu1 }
 0xece   :  { %v5666_v12 = vmul.f32 %v5571_v0, %v12163_v42  ;;  %5748 = vmatmul.mubr.f32.gmra.mrb[188].mxu0 %v11436_v20  ;;  %8440 = vmatprep.subr.bf16.mxu0 %v8439_v26 }
 0xecf   :  { %5752 = vmatprep.mubr.f32.mxu0 %v11452_v45  ;;  %8442 = vmatpush3.bf16.msra.mxu0 %v8439_v26 }
 0xed0   :  { %v8443_v25 = vpack.c.bf16 %v5667_v32, %v5666_v12  ;;  %v7990_v49 = vpop.f32.mrb[186].mxu1 }
 0xed1   :  { %v5669_v6 = vmul.f32 %v7990_v49, %v12164_v53  ;;  %v5581_v14 = vpop.f32.mrb[187].mxu1 }
 0xed2   :  { %v5668_v8 = vmul.f32 %v5581_v14, %v12165_v56  ;;  %5753 = vmatmul.mubr.f32.gmra.mrb[190].mxu0 %v11448_v35  ;;  %8444 = vmatprep.subr.bf16.mxu0 %v8443_v25 }
 0xed3   :  { %5757 = vmatprep.mubr.f32.mxu0 %v11467_v40  ;;  %8446 = vmatpush3.bf16.msra.mxu0 %v8443_v25 }
 0xed4   :  { %v8447_v28 = vpack.c.bf16 %v5669_v6, %v5668_v8  ;;  %v7993_v44 = vpop.f32.mrb[188].mxu1 }
 0xed5   :  { %v5671_v20 = vmul.f32 %v7993_v44, %v12158_v47  ;;  %v5591_v46 = vpop.f32.mrb[189].mxu1 }
 0xed6   :  { %v5670_v45 = vmul.f32 %v5591_v46, %v12159_v62  ;;  %5758 = vmatmul.mubr.f32.gmra.mrb[192].mxu0 %v11462_v58  ;;  %8448 = vmatprep.subr.bf16.mxu0 %v8447_v28 }
 0xed7   :  { %5762 = vmatprep.mubr.f32.mxu0 %v11476_v11  ;;  %8450 = vmatpush3.bf16.msra.mxu0 %v8447_v28 }
 0xed8   :  { %v8451_v48 = vpack.c.bf16 %v5671_v20, %v5670_v45  ;;  %v7996_v61 = vpop.f32.mrb[190].mxu1 }
 0xed9   :  { %v5673_v35 = vmul.f32 %v7996_v61, %v12160_v22  ;;  %v5601_v60 = vpop.f32.mrb[191].mxu1 }
 0xeda   :  { %v5672_v40 = vmul.f32 %v5601_v60, %v12161_v21  ;;  %5763 = vmatmul.mubr.f32.gmra.mrb[194].mxu0 %v11474_v34  ;;  %8452 = vmatprep.subr.bf16.mxu0 %v8451_v48 }
 0xedb   :  { %5767 = vmatprep.mubr.f32.mxu0 %v11485_v9  ;;  %8454 = vmatpush3.bf16.msra.mxu0 %v8451_v48 }
 0xedc   :  { %v8455_v47 = vpack.c.bf16 %v5673_v35, %v5672_v40  ;;  %v7999_v62 = vpop.f32.mrb[192].mxu1 }
 0xedd   :  { %v5675_v58 = vmul.f32 %v7999_v62, %v12162_v30  ;;  %v5611_v54 = vpop.f32.mrb[193].mxu1 }
 0xede   :  { %v5674_v11 = vmul.f32 %v5611_v54, %v12163_v42  ;;  %5768 = vmatmul.mubr.f32.gmra.mrb[196].mxu0 %v11481_v27  ;;  %8456 = vmatprep.subr.bf16.mxu0 %v8455_v47 }
 0xedf   :  { %5772 = vmatprep.mubr.f32.mxu0 %v11494_v29  ;;  %8458 = vmatpush3.bf16.msra.mxu0 %v8455_v47  ;;  %v6042_v29 = vld [vmem:[%s11849_s20 + $0x8] sm:$0xff] }
 0xee0   :  { %v8459_v22 = vpack.c.bf16 %v5675_v58, %v5674_v11  ;;  %v8002_v21 = vpop.f32.mrb[194].mxu1 }
 0xee1   :  { %v5677_v34 = vmul.f32 %v8002_v21, %v12164_v53  ;;  %v5621_v39 = vpop.f32.mrb[195].mxu1 }
 0xee2   :  { %v5676_v9 = vmul.f32 %v5621_v39, %v12165_v56  ;;  %5773 = vmatmul.mubr.f32.gmra.mrb[198].mxu0 %v11491_v33  ;;  %8460 = vmatprep.subr.bf16.mxu0 %v8459_v22  ;;  %v6041_v33 = vld [vmem:[%s11849_s20] sm:$0xff] }
 0xee3   :  { %5777 = vmatprep.mubr.f32.mxu0 %v11502_v18  ;;  %8462 = vmatpush3.bf16.msra.mxu0 %v8459_v22  ;;  %v6044_v18 = vld [vmem:[%s11849_s20 + $0x18] sm:$0xff] }
 0xee4   :  { %v8463_v30 = vpack.c.bf16 %v5677_v34, %v5676_v9 }
 0xee6   :  { %5778 = vmatmul.mubr.f32.gmra.mrb[200].mxu0 %v11499_v52  ;;  %8464 = vmatprep.subr.bf16.mxu0 %v8463_v30  ;;  %v6043_v52 = vld [vmem:[%s11849_s20 + $0x10] sm:$0xff] }
 0xee7   :  { %8466 = vmatpush3.bf16.msra.mxu0 %v8463_v30  ;;  %8035 = vmatprep.mubr.f32.mxu0 %v11428_v23  ;;  %v8849_v23 = vpop.eup %8848 }
 0xee8   :  { %8047 = vmatprep.subr.msk.mxu0 %vm4540_vm10, %v11408_v38 }
 0xeea   :  { %8036 = vmatmul.mubr.f32.vlgmr.msra.gmra.mrb[202].mxu0 %v11440_v19 }
 0xeeb   :  { %8038 = vmatprep.mubr.f32.mxu0 %v11454_v36  ;;  %8048 = vmatpush3.msk.msra.mxu0 %vm4540_vm10, %v11408_v38  ;;  %v8851_v38 = vpop.eup %8850 }
 0xeec   :  { %v8853_v19 = vpop.eup %8852 }
 0xeed   :  { %v8855_v36 = vpop.eup %8854 }
 0xeee   :  { %8039 = vmatmul.mubr.f32.gmra.mrb[204].mxu0 %v11469_v3  ;;  %v8857_v3 = vpop.eup %8856 }
 0xeef   :  { %8041 = vmatprep.mubr.f32.mxu0 %v11478_v2  ;;  %v8859_v2 = vpop.eup %8858 }
 0xef0   :  { %v8861_v27 = vpop.eup %8860 }
 0xef2   :  { %8042 = vmatmul.mubr.f32.gmra.mrb[206].mxu0 %v11487_v24  ;;  %v8863_v24 = vpop.eup %8862 }
 0xef3   :  { %8044 = vmatprep.mubr.f32.mxu0 %v11496_v16  ;;  %v8467_v16 = vpack.c.bf16 %v6042_v29, %v6041_v33 }
 0xef5   :  { %8468 = vmatprep.subr.bf16.mxu0 %v8467_v16 }
 0xef6   :  { %8045 = vmatmul.mubr.f32.gmra.mrb[208].mxu0 %v11505_v17  ;;  %v8471_v17 = vpack.c.bf16 %v6044_v18, %v6043_v52 }
 0xef7   :  { %8049 = vmatprep.mubr.msk.f32.mxu0 %vm4515_vm0, %v8849_v23 }
 0xefa   :  { %8050 = vmatmul.mubr.msk.f32.vlgmr.msra.gmra.mrb[210].mxu0 %vm4515_vm0, %v8851_v38 }
 0xefb   :  { %8052 = vmatprep.mubr.msk.f32.mxu0 %vm4515_vm0, %v8853_v19  ;;  %8470 = vmatpush3.bf16.msra.mxu0 %v8467_v16  ;;  %v6721_v16 = vld [vmem:[%s11850_s13] ss:$0 sm:$0xff] }
 0xefc   :  { %8472 = vmatprep.subr.bf16.mxu0 %v8471_v17 }
 0xefe   :  { %8053 = vmatmul.mubr.msk.f32.gmra.mrb[212].mxu0 %vm4515_vm0, %v8855_v36 }
 0xeff   :  { %8055 = vmatprep.mubr.msk.f32.mxu0 %vm4515_vm0, %v8857_v3  ;;  %8474 = vmatpush3.bf16.msra.mxu0 %v8471_v17 }
 0xf00   :  { %8477 = vmatprep.subr.msk.bf16.mxu0 %vm10777_vm11, %v8475_v4 }
 0xf02   :  { %8056 = vmatmul.mubr.msk.f32.gmra.mrb[214].mxu0 %vm4515_vm0, %v8859_v2 }
 0xf03   :  { %8058 = vmatprep.mubr.msk.f32.mxu0 %vm4515_vm0, %v8861_v27  ;;  %8480 = vmatpush3.bf16.msk.msra.mxu0 %vm10777_vm11, %v8475_v4  ;;  %vm6234_vm11 = vcmask 56320  }
 0xf06   :  { %8059 = vmatmul.mubr.msk.f32.gmra.mrb[216].mxu0 %vm4515_vm0, %v8863_v24 }
 0xf9d   :  { %v7529_v43 = vpop.f32.mrb[186].mxu0 }
 0xf9e   :  { %v7530_v10 = vpop.f32.mrb[187].mxu0 }
 0xf9f   :  { %v7531_v55 = vadd.f32 %v7530_v10, %v7529_v43 }
 0xfa1   :  { %v7532_v1 = vpop.f32.mrb[188].mxu0 }
 0xfa2   :  { %v7533_v42 = vpop.f32.mrb[189].mxu0 }
 0xfa3   :  { %v7534_v53 = vadd.f32 %v7533_v42, %v7532_v1 }
 0xfa5   :  { %v7535_v56 = vpop.f32.mrb[190].mxu0 }
 0xfa6   :  { %v7536_v51 = vpop.f32.mrb[191].mxu0 }
 0xfa7   :  { %v7537_v63 = vadd.f32 %v7536_v51, %v7535_v56 }
 0xfa9   :  { %v7538_v50 = vpop.f32.mrb[192].mxu0 }
 0xfaa   :  { %v7539_v59 = vpop.f32.mrb[193].mxu0 }
 0xfab   :  { %v7540_v41 = vadd.f32 %v7539_v59, %v7538_v50 }
 0xfad   :  { %v7541_v7 = vpop.f32.mrb[194].mxu0 }
 0xfae   :  { %v7542_v37 = vpop.f32.mrb[195].mxu0 }
 0xfaf   :  { %v7543_v15 = vadd.f32 %v7542_v37, %v7541_v7 }
 0xfb1   :  { %v7544_v26 = vpop.f32.mrb[196].mxu0 }
 0xfb2   :  { %v7545_v57 = vpop.f32.mrb[197].mxu0 }
 0xfb3   :  { %v7546_v32 = vadd.f32 %v7545_v57, %v7544_v26 }
 0xfb5   :  { %v7547_v0 = vpop.f32.mrb[198].mxu0 }
 0xfb6   :  { %v7548_v12 = vpop.f32.mrb[199].mxu0 }
 0xfb7   :  { %v7549_v25 = vadd.f32 %v7548_v12, %v7547_v0 }
 0xfb9   :  { %v7550_v49 = vpop.f32.mrb[200].mxu0 }
 0xfba   :  { %v7551_v6 = vpop.f32.mrb[201].mxu0 }
 0xfbb   :  { %v7552_v14 = vadd.f32 %v7551_v6, %v7550_v49 }
 0xfbd   :  { %v8037_v8 = vpop.f32.mrb[202].mxu0 }
 0xfbe   :  { %v5855_v28 = vadd.f32 %v8037_v8, %v7534_v53  ;;  %v5849_v44 = vpop.f32.mrb[203].mxu0 }
 0xfbf   :  { %v5850_v20 = vadd.f32 %v7531_v55, %v5849_v44 }
 0xfc1   :  { %v8040_v46 = vpop.f32.mrb[204].mxu0 }
 0xfc2   :  { %v5865_v45 = vadd.f32 %v8040_v46, %v7540_v41  ;;  %v5859_v48 = vpop.f32.mrb[205].mxu0 }
 0xfc3   :  { %v5860_v61 = vadd.f32 %v7537_v63, %v5859_v48 }
 0xfc5   :  { %v8043_v35 = vpop.f32.mrb[206].mxu0 }
 0xfc6   :  { %v5875_v60 = vadd.f32 %v8043_v35, %v7546_v32  ;;  %v5869_v40 = vpop.f32.mrb[207].mxu0 }
 0xfc7   :  { %v5870_v47 = vadd.f32 %v7543_v15, %v5869_v40 }
 0xfc9   :  { %v8046_v62 = vpop.f32.mrb[208].mxu0 }
 0xfca   :  { %v5885_v58 = vadd.f32 %v8046_v62, %v7552_v14  ;;  %v5879_v54 = vpop.f32.mrb[209].mxu0 }
 0xfcb   :  { %v5880_v11 = vadd.f32 %v7549_v25, %v5879_v54 }
 0xfcd   :  { %v8051_v22 = vpop.f32.mrb[210].mxu0 }
 0xfce   :  { %v6034_v21 = vmul.f32 %v8051_v22, %v5855_v28  ;;  %v5994_v34 = vpop.f32.mrb[211].mxu0 }
 0xfcf   :  { %v6033_v39 = vmul.f32 %v5994_v34, %v5850_v20 }
 0xfd1   :  { %v8054_v9 = vpop.f32.mrb[212].mxu0  ;;  %8073 = vmatprep.mubr.msk.f32.mxu0 %vm4226_vm3, %v6033_v39 }
 0xfd2   :  { %v6036_v30 = vmul.f32 %v8054_v9, %v5865_v45  ;;  %v6004_v23 = vpop.f32.mrb[213].mxu0  ;;  %8074 = vmatmul.mubr.msk.f32.vlgmr.msra.gmra.mrb[218].mxu0 %vm4226_vm3, %v6034_v21 }
 0xfd3   :  { %v6035_v38 = vmul.f32 %v6004_v23, %v5860_v61 }
 0xfd5   :  { %v8057_v19 = vpop.f32.mrb[214].mxu0  ;;  %8076 = vmatprep.mubr.msk.f32.mxu0 %vm4226_vm3, %v6035_v38 }
 0xfd6   :  { %v6038_v36 = vmul.f32 %v8057_v19, %v5875_v60  ;;  %v6014_v3 = vpop.f32.mrb[215].mxu0  ;;  %8077 = vmatmul.mubr.msk.f32.gmra.mrb[220].mxu0 %vm4226_vm3, %v6036_v30 }
 0xfd7   :  { %v6037_v2 = vmul.f32 %v6014_v3, %v5870_v47 }
 0xfd9   :  { %v8060_v27 = vpop.f32.mrb[216].mxu0  ;;  %8079 = vmatprep.mubr.msk.f32.mxu0 %vm4226_vm3, %v6037_v2 }
 0xfda   :  { %v6040_v24 = vmul.f32 %v8060_v27, %v5885_v58  ;;  %v6024_v33 = vpop.f32.mrb[217].mxu0  ;;  %8080 = vmatmul.mubr.msk.f32.gmra.mrb[222].mxu0 %vm4226_vm3, %v6038_v36 }
 0xfdb   :  { %v6039_v29 = vmul.f32 %v6024_v33, %v5880_v11 }
 0xfdd   :  { %8082 = vmatprep.mubr.msk.f32.mxu0 %vm4226_vm3, %v6039_v29 }
 0xfde   :  { %8083 = vmatmul.mubr.msk.f32.gmra.mrb[224].mxu0 %vm4226_vm3, %v6040_v24 }
0x10a5   :  { %v8075_v52 = vpop.f32.mrb[218].mxu0 }
0x10a6   :  { %v6153_v18 = vadd.f32 %v8075_v52, %v6721_v16  ;;  %v6147_v17 = vpop.f32.mrb[219].mxu0 }
0x10a7   :  { %v6148_v13 = vadd.f32 %v6721_v16, %v6147_v17 }
0x10a8   :  { %v6195_v5 = vmin.f32 %v6153_v18, 0.0  ;;  %vm6187_vm10 = vcmp.gt.f32.partialorder %v6153_v18, 0.0 }
0x10a9   :  { %v6194_v4 = vmin.f32 %v6148_v13, 0.0  ;;  %v8078_v31 = vpop.f32.mrb[220].mxu0  ;;  %vm6186_vm3 = vcmp.gt.f32.partialorder %v6148_v13, 0.0 }
0x10aa   :  { %v6204_v43 = vmul.f32 1.442695, %v6195_v5  ;;  %v6163_v10 = vadd.f32 %v8078_v31, %v6721_v16  ;;  %v6157_v55 = vpop.f32.mrb[221].mxu0 }
0x10ab   :  { %v6202_v1 = vmul.f32 1.442695, %v6194_v4  ;;  %v6158_v42 = vadd.f32 %v6721_v16, %v6157_v55 }
0x10ac   :  { %8864 = vpow2.f32 %v6204_v43  ;;  %v6197_v53 = vmin.f32 %v6163_v10, 0.0  ;;  %vm6189_vm0 = vcmp.gt.f32.partialorder %v6163_v10, 0.0 }
0x10ad   :  { %8866 = vpow2.f32 %v6202_v1  ;;  %v6196_v56 = vmin.f32 %v6158_v42, 0.0  ;;  %v8081_v51 = vpop.f32.mrb[222].mxu0  ;;  %vm6188_vm1 = vcmp.gt.f32.partialorder %v6158_v42, 0.0 }
0x10ae   :  { %v6208_v63 = vmul.f32 1.442695, %v6197_v53  ;;  %v6173_v50 = vadd.f32 %v8081_v51, %v6721_v16  ;;  %v6167_v59 = vpop.f32.mrb[223].mxu0 }
0x10af   :  { %v6206_v41 = vmul.f32 1.442695, %v6196_v56  ;;  %v6168_v7 = vadd.f32 %v6721_v16, %v6167_v59 }
0x10b0   :  { %8868 = vpow2.f32 %v6208_v63  ;;  %v6199_v37 = vmin.f32 %v6173_v50, 0.0  ;;  %vm6191_vm5 = vcmp.gt.f32.partialorder %v6173_v50, 0.0 }
0x10b1   :  { %8870 = vpow2.f32 %v6206_v41  ;;  %v6198_v15 = vmin.f32 %v6168_v7, 0.0  ;;  %v8084_v26 = vpop.f32.mrb[224].mxu0  ;;  %vm6190_vm8 = vcmp.gt.f32.partialorder %v6168_v7, 0.0 }
0x10b2   :  { %v6212_v57 = vmul.f32 1.442695, %v6199_v37  ;;  %v6183_v32 = vadd.f32 %v8084_v26, %v6721_v16  ;;  %v6177_v0 = vpop.f32.mrb[225].mxu0 }
0x10b3   :  { %v6210_v12 = vmul.f32 1.442695, %v6198_v15  ;;  %v6178_v25 = vadd.f32 %v6721_v16, %v6177_v0 }
0x10b4   :  { %8872 = vpow2.f32 %v6212_v57  ;;  %v6201_v49 = vmin.f32 %v6183_v32, 0.0  ;;  %vm6193_vm12 = vcmp.gt.f32.partialorder %v6183_v32, 0.0 }
0x10b5   :  { %8874 = vpow2.f32 %v6210_v12  ;;  %v6200_v6 = vmin.f32 %v6178_v25, 0.0  ;;  %vm6192_vm13 = vcmp.gt.f32.partialorder %v6178_v25, 0.0 }
0x10b6   :  { %v8865_v14 = vpop.eup %8864  ;;  %v6216_v8 = vmul.f32 1.442695, %v6201_v49 }
0x10b7   :  { %v8867_v28 = vpop.eup %8866  ;;  %v6214_v44 = vmul.f32 1.442695, %v6200_v6  ;;  %v6732_v20 = vadd.f32 -1.0, %v8865_v14 }
0x10b8   :  { %8876 = vpow2.f32 %v6216_v8  ;;  %v6731_v46 = vadd.f32 -1.0, %v8867_v28 }
0x10b9   :  { %8878 = vpow2.f32 %v6214_v44  ;;  %v6227_v45 = vsel %vm6187_vm10, %v6153_v18, %v6732_v20 }
0x10ba   :  { %v8869_v48 = vpop.eup %8868  ;;  %v6238_v61 = vsel %vm6234_vm11, %v6227_v45, -inf  ;;  %v6226_v35 = vsel %vm6186_vm3, %v6148_v13, %v6731_v46 }
0x10bb   :  { %v8871_v60 = vpop.eup %8870  ;;  %6239 = vmax.xlane.f32.xlu1 %v6238_v61  ;;  %v6235_v40 = vsel %vm6234_vm11, %v6226_v35, -inf  ;;  %v6734_v47 = vadd.f32 -1.0, %v8869_v48 }
0x10bc   :  { %6236 = vmax.xlane.f32.xlu0 %v6235_v40  ;;  %v6733_v62 = vadd.f32 -1.0, %v8871_v60 }
0x10bd   :  { %v6229_v58 = vsel %vm6189_vm0, %v6163_v10, %v6734_v47 }
0x10be   :  { %v8873_v54 = vpop.eup %8872  ;;  %v6244_v11 = vsel %vm6234_vm11, %v6229_v58, -inf  ;;  %v6228_v22 = vsel %vm6188_vm1, %v6158_v42, %v6733_v62 }
0x10bf   :  { %v8875_v21 = vpop.eup %8874  ;;  %6245 = vmax.xlane.f32.xlu1 %v6244_v11  ;;  %v6241_v34 = vsel %vm6234_vm11, %v6228_v22, -inf  ;;  %v6736_v39 = vadd.f32 -1.0, %v8873_v54 }
0x10c0   :  { %6242 = vmax.xlane.f32.xlu0 %v6241_v34  ;;  %v6735_v9 = vadd.f32 -1.0, %v8875_v21 }
0x10c1   :  { %v6231_v30 = vsel %vm6191_vm5, %v6173_v50, %v6736_v39 }
0x10c2   :  { %v8877_v23 = vpop.eup %8876  ;;  %v6250_v38 = vsel %vm6234_vm11, %v6231_v30, -inf  ;;  %v6230_v19 = vsel %vm6190_vm8, %v6168_v7, %v6735_v9 }
0x10c3   :  { %v8879_v36 = vpop.eup %8878  ;;  %6251 = vmax.xlane.f32.xlu1 %v6250_v38  ;;  %v6247_v3 = vsel %vm6234_vm11, %v6230_v19, -inf  ;;  %v6738_v2 = vadd.f32 -1.0, %v8877_v23 }
0x10c4   :  { %6248 = vmax.xlane.f32.xlu0 %v6247_v3  ;;  %v6737_v27 = vadd.f32 -1.0, %v8879_v36 }
0x10c5   :  { %v6233_v24 = vsel %vm6193_vm12, %v6183_v32, %v6738_v2 }
0x10c6   :  { %v6256_v33 = vsel %vm6234_vm11, %v6233_v24, -inf  ;;  %v6232_v29 = vsel %vm6192_vm13, %v6178_v25, %v6737_v27 }
0x10c7   :  { %6257 = vmax.xlane.f32.xlu1 %v6256_v33  ;;  %v6253_v16 = vsel %vm6234_vm11, %v6232_v29, -inf }
0x10c8   :  { %6254 = vmax.xlane.f32.xlu0 %v6253_v16 }
0x1148   :  { %v6240_v52 = vpop.xlane.xlu1 %6239 }
0x1149   :  { %v11758_v18 = vsub.f32 %v6227_v45, %v6240_v52  ;;  %v6237_v17 = vpop.xlane.xlu0 %6236 }
0x114a   :  { %v11760_v13 = vsub.f32 %v6226_v35, %v6237_v17 }
0x114b   :  { %v6269_v5 = vmul.f32 1.442695, %v11758_v18 }
0x114c   :  { %v6267_v4 = vmul.f32 1.442695, %v11760_v13  ;;  %v6246_v31 = vpop.xlane.xlu1 %6245 }
0x114d   :  { %8880 = vpow2.f32 %v6269_v5  ;;  %v11764_v43 = vsub.f32 %v6229_v58, %v6246_v31  ;;  %v6243_v10 = vpop.xlane.xlu0 %6242 }
0x114e   :  { %8882 = vpow2.f32 %v6267_v4  ;;  %v11766_v55 = vsub.f32 %v6228_v22, %v6243_v10 }
0x114f   :  { %v6273_v1 = vmul.f32 1.442695, %v11764_v43 }
0x1150   :  { %v6271_v42 = vmul.f32 1.442695, %v11766_v55  ;;  %v6252_v53 = vpop.xlane.xlu1 %6251 }
0x1151   :  { %8884 = vpow2.f32 %v6273_v1  ;;  %v11770_v56 = vsub.f32 %v6231_v30, %v6252_v53  ;;  %v6249_v51 = vpop.xlane.xlu0 %6248 }
0x1152   :  { %8886 = vpow2.f32 %v6271_v42  ;;  %v11772_v63 = vsub.f32 %v6230_v19, %v6249_v51 }
0x1153   :  { %v6277_v50 = vmul.f32 1.442695, %v11770_v56 }
0x1154   :  { %v6275_v59 = vmul.f32 1.442695, %v11772_v63  ;;  %v6258_v41 = vpop.xlane.xlu1 %6257 }
0x1155   :  { %8888 = vpow2.f32 %v6277_v50  ;;  %v11776_v7 = vsub.f32 %v6233_v24, %v6258_v41  ;;  %v6255_v37 = vpop.xlane.xlu0 %6254 }
0x1156   :  { %8890 = vpow2.f32 %v6275_v59  ;;  %v11778_v15 = vsub.f32 %v6232_v29, %v6255_v37 }
0x1157   :  { %v8881_v26 = vpop.eup %8880  ;;  %v6281_v57 = vmul.f32 1.442695, %v11776_v7 }
0x1158   :  { %v8883_v32 = vpop.eup %8882  ;;  %v6279_v0 = vmul.f32 1.442695, %v11778_v15  ;;  %v6286_v12 = vsel %vm6234_vm11, %v8881_v26, 0.0 }
0x1159   :  { %8892 = vpow2.f32 %v6281_v57  ;;  %6287 = vadd.xlane.f32.xlu1 %v6286_v12  ;;  %v6283_v25 = vsel %vm6234_vm11, %v8883_v32, 0.0 }
0x115a   :  { %8894 = vpow2.f32 %v6279_v0  ;;  %6284 = vadd.xlane.f32.xlu0 %v6283_v25 }
0x115b   :  { %v8885_v49 = vpop.eup %8884 }
0x115c   :  { %v8887_v6 = vpop.eup %8886  ;;  %v6292_v14 = vsel %vm6234_vm11, %v8885_v49, 0.0 }
0x115d   :  { %6293 = vadd.xlane.f32.xlu1 %v6292_v14  ;;  %v6289_v8 = vsel %vm6234_vm11, %v8887_v6, 0.0 }
0x115e   :  { %6290 = vadd.xlane.f32.xlu0 %v6289_v8 }
0x115f   :  { %v8889_v28 = vpop.eup %8888 }
0x1160   :  { %v8891_v44 = vpop.eup %8890  ;;  %v6298_v20 = vsel %vm6234_vm11, %v8889_v28, 0.0 }
0x1161   :  { %6299 = vadd.xlane.f32.xlu1 %v6298_v20  ;;  %v6295_v46 = vsel %vm6234_vm11, %v8891_v44, 0.0 }
0x1162   :  { %6296 = vadd.xlane.f32.xlu0 %v6295_v46 }
0x1163   :  { %v8893_v45 = vpop.eup %8892 }
0x1164   :  { %v8895_v48 = vpop.eup %8894  ;;  %v6304_v61 = vsel %vm6234_vm11, %v8893_v45, 0.0 }
0x1165   :  { %6305 = vadd.xlane.f32.xlu1 %v6304_v61  ;;  %v6301_v35 = vsel %vm6234_vm11, %v8895_v48, 0.0 }
0x1166   :  { %6302 = vadd.xlane.f32.xlu0 %v6301_v35 }
0x11e6   :  { %v6288_v60 = vpop.xlane.xlu1 %6287 }
0x11e7   :  { %8896 = vlog2.f32 %v6288_v60  ;;  %v6285_v40 = vpop.xlane.xlu0 %6284 }
0x11e8   :  { %8898 = vlog2.f32 %v6285_v40 }
0x11ea   :  { %v6294_v47 = vpop.xlane.xlu1 %6293 }
0x11eb   :  { %8900 = vlog2.f32 %v6294_v47  ;;  %v6291_v62 = vpop.xlane.xlu0 %6290 }
0x11ec   :  { %8902 = vlog2.f32 %v6291_v62 }
0x11ee   :  { %v6300_v58 = vpop.xlane.xlu1 %6299 }
0x11ef   :  { %8904 = vlog2.f32 %v6300_v58  ;;  %v6297_v54 = vpop.xlane.xlu0 %6296 }
0x11f0   :  { %8906 = vlog2.f32 %v6297_v54 }
0x11f1   :  { %v8897_v11 = vpop.eup %8896 }
0x11f2   :  { %v8899_v22 = vpop.eup %8898  ;;  %v6310_v21 = vmul.f32 0.6931472, %v8897_v11  ;;  %v6306_v34 = vpop.xlane.xlu1 %6305 }
0x11f3   :  { %v6308_v39 = vmul.f32 0.6931472, %v8899_v22  ;;  %8908 = vlog2.f32 %v6306_v34  ;;  %v6303_v9 = vpop.xlane.xlu0 %6302 }
0x11f4   :  { %v6324_v30 = vsub.f32 %v11758_v18, %v6310_v21  ;;  %8910 = vlog2.f32 %v6303_v9 }
0x11f5   :  { %v8901_v23 = vpop.eup %8900  ;;  %v6323_v38 = vsub.f32 %v11760_v13, %v6308_v39 }
0x11f6   :  { %v8903_v19 = vpop.eup %8902  ;;  %6332 = vst.msk [vmem:[%s11851_s21 + $0x8] sm:$0xff] %vm6234_vm11, %v6324_v30  ;;  %v6314_v36 = vmul.f32 0.6931472, %v8901_v23 }
0x11f7   :  { %6331 = vst.msk [vmem:[%s11851_s21] sm:$0xff] %vm6234_vm11, %v6323_v38  ;;  %v6312_v3 = vmul.f32 0.6931472, %v8903_v19 }
0x11f8   :  { %v6326_v2 = vsub.f32 %v11764_v43, %v6314_v36 }
0x11f9   :  { %v8905_v27 = vpop.eup %8904  ;;  %v6325_v24 = vsub.f32 %v11766_v55, %v6312_v3 }
0x11fa   :  { %v8907_v33 = vpop.eup %8906  ;;  %6334 = vst.msk [vmem:[%s11851_s21 + $0x18] sm:$0xff] %vm6234_vm11, %v6326_v2  ;;  %v6318_v29 = vmul.f32 0.6931472, %v8905_v27 }
0x11fb   :  { %6333 = vst.msk [vmem:[%s11851_s21 + $0x10] sm:$0xff] %vm6234_vm11, %v6325_v24  ;;  %v6316_v16 = vmul.f32 0.6931472, %v8907_v33 }
0x11fc   :  { %v6328_v52 = vsub.f32 %v11770_v56, %v6318_v29 }
0x11fd   :  { %v8909_v18 = vpop.eup %8908  ;;  %v6327_v17 = vsub.f32 %v11772_v63, %v6316_v16 }
0x11fe   :  { %v8911_v13 = vpop.eup %8910  ;;  %6336 = vst.msk [vmem:[%s11851_s21 + $0x28] sm:$0xff] %vm6234_vm11, %v6328_v52  ;;  %v6322_v5 = vmul.f32 0.6931472, %v8909_v18 }
0x11ff   :  { %6335 = vst.msk [vmem:[%s11851_s21 + $0x20] sm:$0xff] %vm6234_vm11, %v6327_v17  ;;  %v6320_v4 = vmul.f32 0.6931472, %v8911_v13 }
0x1200   :  { %v6330_v31 = vsub.f32 %v11776_v7, %v6322_v5 }
0x1201   :  { %v6329_v43 = vsub.f32 %v11778_v15, %v6320_v4 }
0x1202   :  { %6338 = vst.msk [vmem:[%s11851_s21 + $0x38] sm:$0xff] %vm6234_vm11, %v6330_v31 }
0x1203   :  { %6337 = vst.msk [vmem:[%s11851_s21 + $0x30] sm:$0xff] %vm6234_vm11, %v6329_v43 }

</bundles_post_ra>
